<compile_context>
chip_gen: v5e
topology: v5e:2x2
jax: 0.10.0
libtpu: 0.0.40
codegen_flags: <defaults>
</compile_context>

<pallas_src>
import jax
import jax.numpy as jnp
from jax.experimental import pallas as pl
from jax.experimental.pallas import tpu as pltpu

_N_SUMS = 20      # d1, f1, d2, sf + 8 depth-l1 sums + 8 depth-l2 sums


# ----------------------------------------------------------------------------
# small helpers
# ----------------------------------------------------------------------------
def _cdiv(a, b):
    return -(-a // b)


def _round_up(a, b):
    return _cdiv(a, b) * b


def _vmem_capacity_bytes():
    try:
        return int(pltpu.get_tpu_info().vmem_capacity_bytes)
    except Exception:
        return 64 << 20      # assume the smallest part (v7x) if the query fails


def _interp_matrix(src, dst):
    """(dst, src) bilinear align_corners=True interpolation matrix (2 taps/row)."""
    if src == 1:
        return jnp.ones((dst, 1), jnp.float32)
    pos = jnp.linspace(0.0, src - 1.0, dst)
    lo = jnp.minimum(jnp.floor(pos).astype(jnp.int32), src - 2)
    hi = lo + 1
    w_hi = (pos - lo.astype(jnp.float32))[:, None]
    cols = jnp.arange(src)[None, :]
    return ((cols == lo[:, None]).astype(jnp.float32) * (1.0 - w_hi)
            + (cols == hi[:, None]).astype(jnp.float32) * w_hi)


# ----------------------------------------------------------------------------
# the Pallas kernel
# ----------------------------------------------------------------------------
def _eval_kernel(intrin_ref,                 # SMEM (B, 18): K (9) + K^-1 (9)
                 ry_ref,                     # (TH, h)   row-interp weights for this tile
                 rxt_ref,                    # (w, W)    column-interp weights (full, tiny)
                 lowres_ref,                 # (1, 4, h, w)  [disp*W, sfx, sfy, sfz]
                 tflow_ref,                  # (1, 2, TH, W) target optical flow
                 tdisp1_ref, tdisp2_ref,     # (1, 1, TH, W) target disparities
                 tfmask_ref, td1mask_ref, td2mask_ref,   # (1, 1, TH, W) masks (any dtype)
                 otl1_ref, pdisp1_ref, pdepth1_ref, oflow_ref,
                 otl2_ref, pdisp_next_ref, pdepth_next_ref,
                 sums_ref):                  # (1, 1, 1, 128) per-(b, tile) partial sums
    f32 = jnp.float32
    TH = tdisp1_ref.shape[2]
    W = tdisp1_ref.shape[3]
    b = pl.program_id(0)
    rt = pl.program_id(1)

    # --- camera intrinsics: K and K^-1 as SMEM scalars --------------------------
    k00 = intrin_ref[b, 0]; k01 = intrin_ref[b, 1]; k02 = intrin_ref[b, 2]
    k10 = intrin_ref[b, 3]; k11 = intrin_ref[b, 4]; k12 = intrin_ref[b, 5]
    k20 = intrin_ref[b, 6]; k21 = intrin_ref[b, 7]; k22 = intrin_ref[b, 8]
    i00 = intrin_ref[b, 9];  i01 = intrin_ref[b, 10]; i02 = intrin_ref[b, 11]
    i10 = intrin_ref[b, 12]; i11 = intrin_ref[b, 13]; i12 = intrin_ref[b, 14]
    i20 = intrin_ref[b, 15]; i21 = intrin_ref[b, 16]; i22 = intrin_ref[b, 17]
    fx054 = k00 * 0.54                       # intrinsic[:, 0, 0] * 0.54
    inv_fx054 = 1.0 / fx054

    # --- fused bilinear (align_corners=True) upsample of the low-res predictions --
    # out = Ry_tile @ lowres @ Rx^T.  The MXU is otherwise idle and the low-res
    # maps are tiny, so this removes the full-res HBM round trip of a glue upsample.
    ry = ry_ref[...]                         # (TH, h)
    rxt = rxt_ref[...]                       # (w, W)

    def upsample(ch):
        t = jnp.dot(ry, lowres_ref[0, ch], preferred_element_type=f32)    # (TH, w)
        return jnp.dot(t, rxt, preferred_element_type=f32)                # (TH, W)

    pdisp = upsample(0)        # predicted disparity ("* W" scale folded in glue)
    sfx = upsample(1)
    sfy = upsample(2)
    sfz = upsample(3)

    # --- target maps; masks stay boolean (no cast->multiply chains) --------------
    tfx = tflow_ref[0, 0]
    tfy = tflow_ref[0, 1]
    tdisp1 = tdisp1_ref[0, 0]
    tdisp2 = tdisp2_ref[0, 0]
    flow_mask = tfmask_ref[0, 0].astype(f32) == 1.0
    d1_mask = td1mask_ref[0, 0].astype(f32) == 1.0
    d2_mask = td2mask_ref[0, 0].astype(f32) == 1.0
    scene_mask = flow_mask & d1_mask & d2_mask
    d1_mask_f = d1_mask.astype(f32)
    d2_mask_f = d2_mask.astype(f32)

    def disp2depth(disp):
        # depth = fx*0.54 / (disp + (1 - (disp > 0)))   -- same formula as reference
        den = disp + jnp.where(disp > 0.0, 0.0, 1.0)
        return fx054 * pl.reciprocal(den), den

    pdepth_raw, _ = disp2depth(pdisp)                 # un-clamped (used in projection)
    pdepth = jnp.clip(pdepth_raw, 0.001, 80.0)        # predict_depth_l1
    tdepth1, tden1 = disp2depth(tdisp1)               # target_depth_l1
    inv_tdepth1 = tden1 * inv_fx054                   # 1 / target_depth_l1
    tdepth2, tden2 = disp2depth(tdisp2)               # target_depth_l1_next
    inv_tdepth2 = tden2 * inv_fx054

    # --- level-1 disparity outliers (d1) ------------------------------------------
    disp_epe1 = jnp.abs(pdisp - tdisp1)
    otl1 = (disp_epe1 > 3.0) & (disp_epe1 > 0.05 * tdisp1) & d1_mask
    otl1_f = otl1.astype(f32)

    # --- projectScene2Flow (pinhole back-project + scene flow + re-project) -------
    u = jax.lax.broadcasted_iota(jnp.int32, (TH, W), 1).astype(f32)
    v = (jax.lax.broadcasted_iota(jnp.int32, (TH, W), 0) + rt * TH).astype(f32)
    px = pdepth_raw * (i00 * u + i01 * v + i02)
    py = pdepth_raw * (i10 * u + i11 * v + i12)
    pz = pdepth_raw * (i20 * u + i21 * v + i22)
    ptx = px + sfx
    pty = py + sfy
    ptz = pz + sfz
    prx = k00 * ptx + k01 * pty + k02 * ptz
    pry = k10 * ptx + k11 * pty + k12 * ptz
    prz = k20 * ptx + k21 * pty + k22 * ptz
    inv_z = pl.reciprocal(prz + 1e-8)          # exact: keeps outlier thresholds stable
    flow_x = prx * inv_z - u
    flow_y = pry * inv_z - v

    # --- optical-flow outliers (f1): exact EPE / (|target flow| + 1e-8) test ------
    dx = flow_x - tfx
    dy = flow_y - tfy
    epe = jnp.sqrt(dx * dx + dy * dy)
    tf_mag = jnp.sqrt(tfx * tfx + tfy * tfy) + 1e-8
    f_otl = (epe > 3.0) & (epe > 0.05 * tf_mag) & flow_mask
    f_otl_f = f_otl.astype(f32)

    # --- level-2 (next frame) -------------------------------------------------------
    # NOTE: to stay faithful to the PyTorch reference, predict_depth_l1_next is NOT
    # re-clamped; non-positive depths propagate to disp / log exactly as torch would.
    pdepth_next = pdepth + sfz
    inv_pdepth_next = pl.reciprocal(pdepth_next)
    pdisp_next = fx054 * inv_pdepth_next              # depth2disp_stereo
    disp_epe2 = jnp.abs(pdisp_next - tdisp2)
    otl2 = (disp_epe2 > 3.0) & (disp_epe2 > 0.05 * tdisp2) & d2_mask
    otl2_f = otl2.astype(f32)

    out_sf_f = ((f_otl | otl1 | otl2) & scene_mask).astype(f32)

    # --- image outputs ---------------------------------------------------------------
    otl1_ref[0, 0] = otl1_f
    pdisp1_ref[0, 0] = pdisp
    pdepth1_ref[0, 0] = pdepth
    oflow_ref[0, 0] = flow_x
    oflow_ref[0, 1] = flow_y
    otl2_ref[0, 0] = otl2_f
    pdisp_next_ref[0, 0] = pdisp_next
    pdepth_next_ref[0, 0] = pdepth_next

    # --- masked depth-error partial sums (compute_depth_error numerators) -------------
    def depth_err_sums(sel, sel_f, t_dep, p_dep, inv_t, inv_p):
        diff = t_dep - p_dep
        sq = diff * diff
        ratio_tp = t_dep * inv_p
        thresh = jnp.maximum(ratio_tp, p_dep * inv_t)
        log_r = jnp.log(ratio_tp)                         # == log(t) - log(p)
        return [
            jnp.sum(jnp.where(sel, jnp.abs(diff) * inv_t, 0.0)),            # abs_rel
            jnp.sum(jnp.where(sel, sq * inv_t, 0.0)),                       # sqrt_rel
            jnp.sum(jnp.where(sel, sq, 0.0)),                               # mse
            jnp.sum(jnp.where(sel, log_r * log_r, 0.0)),                    # mse_log
            jnp.sum((sel & (thresh < 1.25)).astype(f32)),                   # a1
            jnp.sum((sel & (thresh < 1.25 ** 2)).astype(f32)),              # a2
            jnp.sum((sel & (thresh < 1.25 ** 3)).astype(f32)),              # a3
            jnp.sum(sel_f),                                                 # count
        ]

    inv_pdepth = pl.reciprocal(pdepth)
    l1_vals = depth_err_sums(d1_mask, d1_mask_f, tdepth1, pdepth, inv_tdepth1, inv_pdepth)
    l2_vals = depth_err_sums(d2_mask, d2_mask_f, tdepth2, pdepth_next,
                             inv_tdepth2, inv_pdepth_next)

    vals = [jnp.sum(otl1_f), jnp.sum(f_otl_f), jnp.sum(otl2_f),
            jnp.sum(out_sf_f)] + l1_vals + l2_vals

    # 20 scalars -> one lane-dense (1, 128) row per (batch, row-tile)
    lane = jax.lax.broadcasted_iota(jnp.int32, (1, 128), 1)
    row = jnp.zeros((1, 128), f32)
    for i, s in enumerate(vals):
        row = jnp.where(lane == i, s, row)
    sums_ref[0, 0] = row


# ----------------------------------------------------------------------------
# VMEM-aware tile planning
# ----------------------------------------------------------------------------
def _plan_tiles(B, H, W, h, w, mask_itemsizes, tile_rows):
    # sublane alignment required by the narrowest tiled dtype: f32->8, bf16->16, int8->32
    row_align = max([8] + [32 // s for s in mask_itemsizes])

    # double-buffered I/O blocks plus an estimate of the live f32 (TH, W) temporaries
    # Mosaic materializes in VMEM (charged per review feedback).
    in_b = 2 * 4 + 4 + 4 + sum(mask_itemsizes)       # flow(2) + disp1 + disp2 + masks
    out_b = 8 * 4                                    # 8 f32 output channels
    interm_b = 32 * 4                                # ~32 live f32 temporaries
    bytes_per_row = (2 * (in_b + out_b) + interm_b) * W + 2 * h * 4
    fixed = 2 * (4 * h * w * 4 + w * W * 4) + (2 << 20)

    cap = _vmem_capacity_bytes()                     # 64 MiB v7x, 128 MiB v5e/v6e
    budget = max(int(0.55 * cap) - fixed, bytes_per_row * row_align)
    max_rows = max(row_align, (budget // bytes_per_row) // row_align * row_align)

    if tile_rows is not None:
        if tile_rows <= 0 or tile_rows % row_align != 0:
            raise ValueError(f"tile_rows must be a positive multiple of {row_align}")
        TH = int(tile_rows)
    else:
        cands = [c for c in range(row_align, min(H, max_rows) + 1, row_align)
                 if H % c == 0]
        if cands:
            # prefer an even number of grid steps so both v7x TensorCores stay busy
            even = [c for c in cands if (B * (H // c)) % 2 == 0]
            TH = max(even) if even else max(cands)
        else:
            # H has no aligned divisor within budget (e.g. KITTI H=375): pad the rows
            nt = _cdiv(H, min(max_rows, _round_up(H, row_align)))
            TH = _round_up(_cdiv(H, nt), row_align)
    H_pad = _round_up(H, TH)
    return TH, H_pad, cap


# ----------------------------------------------------------------------------
# pallas_call wrapper
# ----------------------------------------------------------------------------
def _run_eval_kernel(intrin_flat, lowres, tflow, tdisp1, tdisp2,
                     tfmask, td1mask, td2mask, tile_rows=None):
    B, _, H, W = tdisp1.shape
    h, w = lowres.shape[2], lowres.shape[3]
    mask_items = [jnp.dtype(m.dtype).itemsize for m in (tfmask, td1mask, td2mask)]
    TH, H_pad, vmem_cap = _plan_tiles(B, H, W, h, w, mask_items, tile_rows)
    NT = H_pad // TH

    # bilinear (align_corners=True) weights; padded rows get zero weight so the
    # upsampled prediction (and every sum, via the zero-padded masks) ignores them.
    Ry = _interp_matrix(h, H)                               # (H, h)
    if H_pad > H:
        Ry = jnp.concatenate([Ry, jnp.zeros((H_pad - H, h), jnp.float32)], axis=0)
    RxT = _interp_matrix(w, W).T                            # (w, W)
    # TODO(synk): optionally pad W to a multiple of 128 for lane-dense stores; skipped
    # because slicing the padded outputs back would cost more HBM traffic than it saves.

    def pad_rows(x):
        if H_pad == H:
            return x
        return jnp.pad(x, ((0, 0), (0, 0), (0, H_pad - H), (0, 0)))

    tflow, tdisp1, tdisp2 = pad_rows(tflow), pad_rows(tdisp1), pad_rows(tdisp2)
    tfmask, td1mask, td2mask = pad_rows(tfmask), pad_rows(td1mask), pad_rows(td2mask)

    def im_spec(c):
        return pl.BlockSpec((1, c, TH, W), lambda b, rt: (b, 0, rt, 0))

    in_specs = [
        pl.BlockSpec(memory_space=pltpu.MemorySpace.SMEM),        # intrinsics (B, 18)
        pl.BlockSpec((TH, h), lambda b, rt: (rt, 0)),             # Ry row tile
        pl.BlockSpec((w, W), lambda b, rt: (0, 0)),               # RxT (full, tiny)
        pl.BlockSpec((1, 4, h, w), lambda b, rt: (b, 0, 0, 0)),   # low-res disp+sceneflow
        im_spec(2),   # target_flow
        im_spec(1),   # target_disp1
        im_spec(1),   # target_disp2_occ
        im_spec(1),   # target_flow_mask
        im_spec(1),   # target_disp1_mask
        im_spec(1),   # target_disp2_mask_occ
    ]
    out_specs = [
        im_spec(1),   # otl1_img
        im_spec(1),   # predict_disp_l1 (upsampled * W)
        im_spec(1),   # predict_depth_l1
        im_spec(2),   # optical_flow
        im_spec(1),   # otl2_img
        im_spec(1),   # predict_disp_l1_next
        im_spec(1),   # predict_depth_l1_next
        pl.BlockSpec((1, 1, 1, 128), lambda b, rt: (b, rt, 0, 0)),   # partial sums
    ]
    out_shape = [
        jax.ShapeDtypeStruct((B, 1, H_pad, W), jnp.float32),
        jax.ShapeDtypeStruct((B, 1, H_pad, W), jnp.float32),
        jax.ShapeDtypeStruct((B, 1, H_pad, W), jnp.float32),
        jax.ShapeDtypeStruct((B, 2, H_pad, W), jnp.float32),
        jax.ShapeDtypeStruct((B, 1, H_pad, W), jnp.float32),
        jax.ShapeDtypeStruct((B, 1, H_pad, W), jnp.float32),
        jax.ShapeDtypeStruct((B, 1, H_pad, W), jnp.float32),
        jax.ShapeDtypeStruct((B, NT, 1, 128), jnp.float32),
    ]

    vmem_limit = int(min(max(int(0.9 * vmem_cap), 32 << 20), 127 << 20))

    outs = pl.pallas_call(
        _eval_kernel,
        out_shape=out_shape,
        grid=(B, NT),
        in_specs=in_specs,
        out_specs=out_specs,
        compiler_params=pltpu.CompilerParams(
            dimension_semantics=("parallel", "parallel"),
            vmem_limit_bytes=vmem_limit),
    )(intrin_flat, Ry, RxT, lowres,
      tflow, tdisp1, tdisp2, tfmask, td1mask, td2mask)

    if H_pad > H:
        outs = [o[:, :, :H, :] if (o.ndim == 4 and o.shape[2] == H_pad) else o
                for o in outs]
    return tuple(outs)


# ----------------------------------------------------------------------------
# MonoSceneFlowEvaluation.forward equivalent
# ----------------------------------------------------------------------------
def mono_scene_flow_evaluation(inputs, outputs, tile_rows=None):
    f32 = jnp.float32
    target_flow = jnp.asarray(inputs['target_flow'], f32)
    target_disp1 = jnp.asarray(inputs['target_disp1'], f32)
    target_disp2 = jnp.asarray(inputs['target_disp2_occ'], f32)
    # masks are consumed in their native (possibly narrow) dtype -- no extra cast pass
    tfmask = inputs['target_flow_mask']
    td1mask = inputs['target_disp1_mask']
    td2mask = inputs['target_disp2_mask_occ']
    kl = jnp.asarray(inputs['kl'], f32)

    B, _, H, W = target_disp1.shape

    disp_lr = jnp.asarray(outputs['disp_l1_pp'][0], f32)
    sf_lr = jnp.asarray(outputs['scene_f_pp'][0], f32)
    if disp_lr.shape[2:] != sf_lr.shape[2:]:
        # TODO(synk): support differing low-res resolutions (needs per-map interp matrices)
        raise ValueError("disp_l1_pp and scene_f_pp must share spatial dimensions")

    # fold the reference's "* W" disparity scale into the tiny low-res map, then stack
    # disp + sceneflow into one (B, 4, h, w) input (fewer DMA streams).
    lowres = jnp.concatenate([disp_lr * float(W), sf_lr], axis=1)

    Kinv = jnp.linalg.inv(kl)
    intrin_flat = jnp.concatenate([kl.reshape(B, 9), Kinv.reshape(B, 9)],
                                  axis=1).astype(f32)

    (otl1_img, predict_disp_l1, predict_depth_l1, optical_flow,
     otl2_img, predict_disp_l1_next, predict_depth_l1_next, sums) = _run_eval_kernel(
        intrin_flat, lowres, target_flow, target_disp1, target_disp2,
        tfmask, td1mask, td2mask, tile_rows=tile_rows)

    # aggregate per-(batch, tile) partial sums
    total = jnp.sum(sums[:, :, 0, :_N_SUMS], axis=(0, 1))

    #  .view(B,-1).sum(1).mean() / const  ==  total_sum / B / const
    scene_dict = {
        'd1': total[0] / B / 91875.68,
        'f1': total[1] / B / 91875.68,
        'd2': total[2] / B / 91875.68,
        'sf': total[3] / B / 91873.4,
    }

    def depth_dict(v):
        cnt = v[7]
        return {
            'abs_rel': v[0] / cnt,
            'sqrt_rel': v[1] / cnt,
            'rmse': jnp.sqrt(v[2] / cnt),
            'rmse_log': jnp.sqrt(v[3] / cnt),
            'a1': v[4] / cnt,
            'a2': v[5] / cnt,
            'a3': v[6] / cnt,
        }

    depth_l1_dict = depth_dict(total[4:12])
    depth_l2_dict = depth_dict(total[12:20])

    outputs_updates = {
        'otl1_img': otl1_img,
        'predict_disp_l1': predict_disp_l1,
        'predict_depth_l1': predict_depth_l1,
        'optical_flow': optical_flow,
        'otl2_img': otl2_img,
        'predict_disp_l1_next': predict_disp_l1_next,
        'predict_depth_l1_next': predict_depth_l1_next,
    }
    return scene_dict, depth_l1_dict, depth_l2_dict, outputs_updates


if __name__ == "__main__":
    key = jax.random.PRNGKey(0)
    B, H, W = 2, 32, 64
    h, w = H // 4, W // 4
    ks = jax.random.split(key, 8)

    K = jnp.array([[40.0, 0.0, 32.0],
                   [0.0, 40.0, 16.0],
                   [0.0, 0.0, 1.0]], jnp.float32)

    inputs = {
        'target_flow': jax.random.normal(ks[0], (B, 2, H, W), jnp.float32) * 2.0,
        # masks in bf16 (narrow dtype path) -- kernel compares == 1 after widening
        'target_flow_mask': (jax.random.uniform(ks[1], (B, 1, H, W)) > 0.3
                             ).astype(jnp.bfloat16),
        'target_disp1': jax.random.uniform(ks[2], (B, 1, H, W), jnp.float32, 1.0, 25.0),
        'target_disp1_mask': (jax.random.uniform(ks[3], (B, 1, H, W)) > 0.3
                              ).astype(jnp.bfloat16),
        'target_disp2_occ': jax.random.uniform(ks[4], (B, 1, H, W), jnp.float32, 1.0, 25.0),
        'target_disp2_mask_occ': (jax.random.uniform(ks[5], (B, 1, H, W)) > 0.3
                                  ).astype(jnp.bfloat16),
        'kl': jnp.broadcast_to(K, (B, 3, 3)),
    }
    outputs = {
        'disp_l1_pp': [jax.random.uniform(ks[6], (B, 1, h, w), jnp.float32, 0.05, 0.4)],
        'scene_f_pp': [jax.random.uniform(ks[7], (B, 3, h, w), jnp.float32, -0.2, 0.2)],
    }

    # tile_rows=16 exercises the multi-tile grid path (H=32 -> 2 row tiles / batch)
    scene_dict, depth_l1_dict, depth_l2_dict, out_up = mono_scene_flow_evaluation(
        inputs, outputs, tile_rows=16)
    jax.block_until_ready(out_up['optical_flow'])

    # mimic .cpu().item(): convert metric scalars to python floats
    scene_dict = {k: float(v) for k, v in scene_dict.items()}
    depth_l1_dict = {k: float(v) for k, v in depth_l1_dict.items()}
    depth_l2_dict = {k: float(v) for k, v in depth_l2_dict.items()}

    print("KERNEL_OK")
</pallas_src>

<mosaic_0001>
module attributes {stable_mosaic.version = 11 : i64} {
  func.func @_eval_kernel(%arg0: i32, %arg1: i32, %arg2: memref<2x18xf32, #tpu.memory_space<smem>>, %arg3: memref<16x8xf32, #tpu.memory_space<vmem>>, %arg4: memref<16x64xf32, #tpu.memory_space<vmem>>, %arg5: memref<1x4x8x16xf32, #tpu.memory_space<vmem>>, %arg6: memref<1x2x16x64xf32, #tpu.memory_space<vmem>>, %arg7: memref<1x1x16x64xf32, #tpu.memory_space<vmem>>, %arg8: memref<1x1x16x64xf32, #tpu.memory_space<vmem>>, %arg9: memref<1x1x16x64xbf16, #tpu.memory_space<vmem>>, %arg10: memref<1x1x16x64xbf16, #tpu.memory_space<vmem>>, %arg11: memref<1x1x16x64xbf16, #tpu.memory_space<vmem>>, %arg12: memref<1x1x16x64xf32, #tpu.memory_space<vmem>>, %arg13: memref<1x1x16x64xf32, #tpu.memory_space<vmem>>, %arg14: memref<1x1x16x64xf32, #tpu.memory_space<vmem>>, %arg15: memref<1x2x16x64xf32, #tpu.memory_space<vmem>>, %arg16: memref<1x1x16x64xf32, #tpu.memory_space<vmem>>, %arg17: memref<1x1x16x64xf32, #tpu.memory_space<vmem>>, %arg18: memref<1x1x16x64xf32, #tpu.memory_space<vmem>>, %arg19: memref<1x1x1x128xf32, #tpu.memory_space<vmem>>) attributes {dimension_semantics = [#tpu.dimension_semantics<parallel>, #tpu.dimension_semantics<parallel>], iteration_bounds = array<i64: 2, 2>, scalar_prefetch = 0 : i64, scratch_operands = 0 : i64, tpu.core_type = #tpu.core_type<tc>, window_params = [{transform_indices = @transform_0, window_bounds = array<i64: 2, 18>}, {transform_indices = @transform_1, window_bounds = array<i64: 16, 8>}, {pipeline_mode = #tpu.pipeline_mode<synchronous>, transform_indices = @transform_2, window_bounds = array<i64: 16, 64>}, {transform_indices = @transform_3, window_bounds = array<i64: 1, 4, 8, 16>}, {transform_indices = @transform_4, window_bounds = array<i64: 1, 2, 16, 64>}, {transform_indices = @transform_5, window_bounds = array<i64: 1, 1, 16, 64>}, {transform_indices = @transform_6, window_bounds = array<i64: 1, 1, 16, 64>}, {transform_indices = @transform_7, window_bounds = array<i64: 1, 1, 16, 64>}, {transform_indices = @transform_8, window_bounds = array<i64: 1, 1, 16, 64>}, {transform_indices = @transform_9, window_bounds = array<i64: 1, 1, 16, 64>}, {transform_indices = @transform_10, window_bounds = array<i64: 1, 1, 16, 64>}, {transform_indices = @transform_11, window_bounds = array<i64: 1, 1, 16, 64>}, {transform_indices = @transform_12, window_bounds = array<i64: 1, 1, 16, 64>}, {transform_indices = @transform_13, window_bounds = array<i64: 1, 2, 16, 64>}, {transform_indices = @transform_14, window_bounds = array<i64: 1, 1, 16, 64>}, {transform_indices = @transform_15, window_bounds = array<i64: 1, 1, 16, 64>}, {transform_indices = @transform_16, window_bounds = array<i64: 1, 1, 16, 64>}, {transform_indices = @transform_17, window_bounds = array<i64: 1, 1, 1, 128>}]} {
    %0 = arith.index_cast %arg0 : i32 to index
    %c0 = arith.constant 0 : index
    %1 = memref.load %arg2[%0, %c0] : memref<2x18xf32, #tpu.memory_space<smem>>
    %2 = arith.index_cast %arg0 : i32 to index
    %c1 = arith.constant 1 : index
    %3 = memref.load %arg2[%2, %c1] : memref<2x18xf32, #tpu.memory_space<smem>>
    %4 = arith.index_cast %arg0 : i32 to index
    %c2 = arith.constant 2 : index
    %5 = memref.load %arg2[%4, %c2] : memref<2x18xf32, #tpu.memory_space<smem>>
    %6 = arith.index_cast %arg0 : i32 to index
    %c3 = arith.constant 3 : index
    %7 = memref.load %arg2[%6, %c3] : memref<2x18xf32, #tpu.memory_space<smem>>
    %8 = arith.index_cast %arg0 : i32 to index
    %c4 = arith.constant 4 : index
    %9 = memref.load %arg2[%8, %c4] : memref<2x18xf32, #tpu.memory_space<smem>>
    %10 = arith.index_cast %arg0 : i32 to index
    %c5 = arith.constant 5 : index
    %11 = memref.load %arg2[%10, %c5] : memref<2x18xf32, #tpu.memory_space<smem>>
    %12 = arith.index_cast %arg0 : i32 to index
    %c6 = arith.constant 6 : index
    %13 = memref.load %arg2[%12, %c6] : memref<2x18xf32, #tpu.memory_space<smem>>
    %14 = arith.index_cast %arg0 : i32 to index
    %c7 = arith.constant 7 : index
    %15 = memref.load %arg2[%14, %c7] : memref<2x18xf32, #tpu.memory_space<smem>>
    %16 = arith.index_cast %arg0 : i32 to index
    %c8 = arith.constant 8 : index
    %17 = memref.load %arg2[%16, %c8] : memref<2x18xf32, #tpu.memory_space<smem>>
    %18 = arith.index_cast %arg0 : i32 to index
    %c9 = arith.constant 9 : index
    %19 = memref.load %arg2[%18, %c9] : memref<2x18xf32, #tpu.memory_space<smem>>
    %20 = arith.index_cast %arg0 : i32 to index
    %c10 = arith.constant 10 : index
    %21 = memref.load %arg2[%20, %c10] : memref<2x18xf32, #tpu.memory_space<smem>>
    %22 = arith.index_cast %arg0 : i32 to index
    %c11 = arith.constant 11 : index
    %23 = memref.load %arg2[%22, %c11] : memref<2x18xf32, #tpu.memory_space<smem>>
    %24 = arith.index_cast %arg0 : i32 to index
    %c12 = arith.constant 12 : index
    %25 = memref.load %arg2[%24, %c12] : memref<2x18xf32, #tpu.memory_space<smem>>
    %26 = arith.index_cast %arg0 : i32 to index
    %c13 = arith.constant 13 : index
    %27 = memref.load %arg2[%26, %c13] : memref<2x18xf32, #tpu.memory_space<smem>>
    %28 = arith.index_cast %arg0 : i32 to index
    %c14 = arith.constant 14 : index
    %29 = memref.load %arg2[%28, %c14] : memref<2x18xf32, #tpu.memory_space<smem>>
    %30 = arith.index_cast %arg0 : i32 to index
    %c15 = arith.constant 15 : index
    %31 = memref.load %arg2[%30, %c15] : memref<2x18xf32, #tpu.memory_space<smem>>
    %32 = arith.index_cast %arg0 : i32 to index
    %c16 = arith.constant 16 : index
    %33 = memref.load %arg2[%32, %c16] : memref<2x18xf32, #tpu.memory_space<smem>>
    %34 = arith.index_cast %arg0 : i32 to index
    %c17 = arith.constant 17 : index
    %35 = memref.load %arg2[%34, %c17] : memref<2x18xf32, #tpu.memory_space<smem>>
    %cst = arith.constant 5.400000e-01 : f32
    %36 = arith.mulf %1, %cst : f32
    %cst_0 = arith.constant 1.000000e+00 : f32
    %37 = arith.divf %cst_0, %36 : f32
    %c0_1 = arith.constant 0 : index
    %c0_2 = arith.constant 0 : index
    %38 = vector.load %arg3[%c0_1, %c0_2] : memref<16x8xf32, #tpu.memory_space<vmem>>, vector<16x8xf32>
    %c0_3 = arith.constant 0 : index
    %c0_4 = arith.constant 0 : index
    %39 = vector.load %arg4[%c0_3, %c0_4] : memref<16x64xf32, #tpu.memory_space<vmem>>, vector<16x64xf32>
    %c0_5 = arith.constant 0 : index
    %c0_6 = arith.constant 0 : index
    %c0_7 = arith.constant 0 : index
    %c0_8 = arith.constant 0 : index
    %40 = vector.load %arg5[%c0_5, %c0_6, %c0_7, %c0_8] : memref<1x4x8x16xf32, #tpu.memory_space<vmem>>, vector<1x1x8x16xf32>
    %41 = vector.shape_cast %40 : vector<1x1x8x16xf32> to vector<8x16xf32>
    %cst_9 = arith.constant dense<0.000000e+00> : vector<16x16xf32>
    %42 = tpu.matmul %38, %41, %cst_9 {dimension_numbers = #tpu.dot_dimension_numbers<[1], [0], [0], [1], [0, 0, 1, 1], [], []>} : vector<16x8xf32>, vector<8x16xf32>, vector<16x16xf32> -> vector<16x16xf32>
    %cst_10 = arith.constant dense<0.000000e+00> : vector<16x64xf32>
    %43 = tpu.matmul %42, %39, %cst_10 {dimension_numbers = #tpu.dot_dimension_numbers<[1], [0], [0], [1], [0, 0, 1, 1], [], []>} : vector<16x16xf32>, vector<16x64xf32>, vector<16x64xf32> -> vector<16x64xf32>
    %c0_11 = arith.constant 0 : index
    %c1_12 = arith.constant 1 : index
    %c0_13 = arith.constant 0 : index
    %c0_14 = arith.constant 0 : index
    %44 = vector.load %arg5[%c0_11, %c1_12, %c0_13, %c0_14] : memref<1x4x8x16xf32, #tpu.memory_space<vmem>>, vector<1x1x8x16xf32>
    %45 = vector.shape_cast %44 : vector<1x1x8x16xf32> to vector<8x16xf32>
    %cst_15 = arith.constant dense<0.000000e+00> : vector<16x16xf32>
    %46 = tpu.matmul %38, %45, %cst_15 {dimension_numbers = #tpu.dot_dimension_numbers<[1], [0], [0], [1], [0, 0, 1, 1], [], []>} : vector<16x8xf32>, vector<8x16xf32>, vector<16x16xf32> -> vector<16x16xf32>
    %cst_16 = arith.constant dense<0.000000e+00> : vector<16x64xf32>
    %47 = tpu.matmul %46, %39, %cst_16 {dimension_numbers = #tpu.dot_dimension_numbers<[1], [0], [0], [1], [0, 0, 1, 1], [], []>} : vector<16x16xf32>, vector<16x64xf32>, vector<16x64xf32> -> vector<16x64xf32>
    %c0_17 = arith.constant 0 : index
    %c2_18 = arith.constant 2 : index
    %c0_19 = arith.constant 0 : index
    %c0_20 = arith.constant 0 : index
    %48 = vector.load %arg5[%c0_17, %c2_18, %c0_19, %c0_20] : memref<1x4x8x16xf32, #tpu.memory_space<vmem>>, vector<1x1x8x16xf32>
    %49 = vector.shape_cast %48 : vector<1x1x8x16xf32> to vector<8x16xf32>
    %cst_21 = arith.constant dense<0.000000e+00> : vector<16x16xf32>
    %50 = tpu.matmul %38, %49, %cst_21 {dimension_numbers = #tpu.dot_dimension_numbers<[1], [0], [0], [1], [0, 0, 1, 1], [], []>} : vector<16x8xf32>, vector<8x16xf32>, vector<16x16xf32> -> vector<16x16xf32>
    %cst_22 = arith.constant dense<0.000000e+00> : vector<16x64xf32>
    %51 = tpu.matmul %50, %39, %cst_22 {dimension_numbers = #tpu.dot_dimension_numbers<[1], [0], [0], [1], [0, 0, 1, 1], [], []>} : vector<16x16xf32>, vector<16x64xf32>, vector<16x64xf32> -> vector<16x64xf32>
    %c0_23 = arith.constant 0 : index
    %c3_24 = arith.constant 3 : index
    %c0_25 = arith.constant 0 : index
    %c0_26 = arith.constant 0 : index
    %52 = vector.load %arg5[%c0_23, %c3_24, %c0_25, %c0_26] : memref<1x4x8x16xf32, #tpu.memory_space<vmem>>, vector<1x1x8x16xf32>
    %53 = vector.shape_cast %52 : vector<1x1x8x16xf32> to vector<8x16xf32>
    %cst_27 = arith.constant dense<0.000000e+00> : vector<16x16xf32>
    %54 = tpu.matmul %38, %53, %cst_27 {dimension_numbers = #tpu.dot_dimension_numbers<[1], [0], [0], [1], [0, 0, 1, 1], [], []>} : vector<16x8xf32>, vector<8x16xf32>, vector<16x16xf32> -> vector<16x16xf32>
    %cst_28 = arith.constant dense<0.000000e+00> : vector<16x64xf32>
    %55 = tpu.matmul %54, %39, %cst_28 {dimension_numbers = #tpu.dot_dimension_numbers<[1], [0], [0], [1], [0, 0, 1, 1], [], []>} : vector<16x16xf32>, vector<16x64xf32>, vector<16x64xf32> -> vector<16x64xf32>
    %c0_29 = arith.constant 0 : index
    %c0_30 = arith.constant 0 : index
    %c0_31 = arith.constant 0 : index
    %c0_32 = arith.constant 0 : index
    %56 = vector.load %arg6[%c0_29, %c0_30, %c0_31, %c0_32] : memref<1x2x16x64xf32, #tpu.memory_space<vmem>>, vector<1x1x16x64xf32>
    %57 = vector.shape_cast %56 : vector<1x1x16x64xf32> to vector<16x64xf32>
    %c0_33 = arith.constant 0 : index
    %c1_34 = arith.constant 1 : index
    %c0_35 = arith.constant 0 : index
    %c0_36 = arith.constant 0 : index
    %58 = vector.load %arg6[%c0_33, %c1_34, %c0_35, %c0_36] : memref<1x2x16x64xf32, #tpu.memory_space<vmem>>, vector<1x1x16x64xf32>
    %59 = vector.shape_cast %58 : vector<1x1x16x64xf32> to vector<16x64xf32>
    %c0_37 = arith.constant 0 : index
    %c0_38 = arith.constant 0 : index
    %c0_39 = arith.constant 0 : index
    %c0_40 = arith.constant 0 : index
    %60 = vector.load %arg7[%c0_37, %c0_38, %c0_39, %c0_40] : memref<1x1x16x64xf32, #tpu.memory_space<vmem>>, vector<1x1x16x64xf32>
    %61 = vector.shape_cast %60 : vector<1x1x16x64xf32> to vector<16x64xf32>
    %c0_41 = arith.constant 0 : index
    %c0_42 = arith.constant 0 : index
    %c0_43 = arith.constant 0 : index
    %c0_44 = arith.constant 0 : index
    %62 = vector.load %arg8[%c0_41, %c0_42, %c0_43, %c0_44] : memref<1x1x16x64xf32, #tpu.memory_space<vmem>>, vector<1x1x16x64xf32>
    %63 = vector.shape_cast %62 : vector<1x1x16x64xf32> to vector<16x64xf32>
    %c0_45 = arith.constant 0 : index
    %c0_46 = arith.constant 0 : index
    %c0_47 = arith.constant 0 : index
    %c0_48 = arith.constant 0 : index
    %64 = vector.load %arg9[%c0_45, %c0_46, %c0_47, %c0_48] : memref<1x1x16x64xbf16, #tpu.memory_space<vmem>>, vector<1x1x16x64xbf16>
    %65 = vector.shape_cast %64 : vector<1x1x16x64xbf16> to vector<16x64xbf16>
    %66 = arith.extf %65 : vector<16x64xbf16> to vector<16x64xf32>
    %cst_49 = arith.constant 1.000000e+00 : f32
    %67 = vector.broadcast %cst_49 : f32 to vector<16x64xf32>
    %68 = arith.cmpf oeq, %66, %67 : vector<16x64xf32>
    %c0_50 = arith.constant 0 : index
    %c0_51 = arith.constant 0 : index
    %c0_52 = arith.constant 0 : index
    %c0_53 = arith.constant 0 : index
    %69 = vector.load %arg10[%c0_50, %c0_51, %c0_52, %c0_53] : memref<1x1x16x64xbf16, #tpu.memory_space<vmem>>, vector<1x1x16x64xbf16>
    %70 = vector.shape_cast %69 : vector<1x1x16x64xbf16> to vector<16x64xbf16>
    %71 = arith.extf %70 : vector<16x64xbf16> to vector<16x64xf32>
    %cst_54 = arith.constant 1.000000e+00 : f32
    %72 = vector.broadcast %cst_54 : f32 to vector<16x64xf32>
    %73 = arith.cmpf oeq, %71, %72 : vector<16x64xf32>
    %c0_55 = arith.constant 0 : index
    %c0_56 = arith.constant 0 : index
    %c0_57 = arith.constant 0 : index
    %c0_58 = arith.constant 0 : index
    %74 = vector.load %arg11[%c0_55, %c0_56, %c0_57, %c0_58] : memref<1x1x16x64xbf16, #tpu.memory_space<vmem>>, vector<1x1x16x64xbf16>
    %75 = vector.shape_cast %74 : vector<1x1x16x64xbf16> to vector<16x64xbf16>
    %76 = arith.extf %75 : vector<16x64xbf16> to vector<16x64xf32>
    %cst_59 = arith.constant 1.000000e+00 : f32
    %77 = vector.broadcast %cst_59 : f32 to vector<16x64xf32>
    %78 = arith.cmpf oeq, %76, %77 : vector<16x64xf32>
    %79 = arith.andi %68, %73 : vector<16x64xi1>
    %80 = arith.andi %79, %78 : vector<16x64xi1>
    %81 = arith.extui %73 : vector<16x64xi1> to vector<16x64xi32>
    %82 = arith.sitofp %81 : vector<16x64xi32> to vector<16x64xf32>
    %83 = arith.extui %78 : vector<16x64xi1> to vector<16x64xi32>
    %84 = arith.sitofp %83 : vector<16x64xi32> to vector<16x64xf32>
    %cst_60 = arith.constant 0.000000e+00 : f32
    %85 = vector.broadcast %cst_60 : f32 to vector<16x64xf32>
    %86 = arith.cmpf ogt, %43, %85 : vector<16x64xf32>
    %cst_61 = arith.constant 0.000000e+00 : f32
    %cst_62 = arith.constant 1.000000e+00 : f32
    %87 = vector.broadcast %cst_61 : f32 to vector<16x64xf32>
    %88 = vector.broadcast %cst_62 : f32 to vector<16x64xf32>
    %89 = arith.select %86, %87, %88 : vector<16x64xi1>, vector<16x64xf32>
    %90 = arith.addf %43, %89 : vector<16x64xf32>
    %91 = tpu.reciprocal %90 : vector<16x64xf32> -> vector<16x64xf32>
    %92 = vector.broadcast %36 : f32 to vector<16x64xf32>
    %93 = arith.mulf %92, %91 : vector<16x64xf32>
    %cst_63 = arith.constant 1.000000e-03 : f32
    %cst_64 = arith.constant 8.000000e+01 : f32
    %94 = vector.broadcast %cst_63 : f32 to vector<16x64xf32>
    %95 = arith.maximumf %94, %93 : vector<16x64xf32>
    %96 = vector.broadcast %cst_64 : f32 to vector<16x64xf32>
    %97 = arith.minimumf %96, %95 : vector<16x64xf32>
    %cst_65 = arith.constant 0.000000e+00 : f32
    %98 = vector.broadcast %cst_65 : f32 to vector<16x64xf32>
    %99 = arith.cmpf ogt, %61, %98 : vector<16x64xf32>
    %cst_66 = arith.constant 0.000000e+00 : f32
    %cst_67 = arith.constant 1.000000e+00 : f32
    %100 = vector.broadcast %cst_66 : f32 to vector<16x64xf32>
    %101 = vector.broadcast %cst_67 : f32 to vector<16x64xf32>
    %102 = arith.select %99, %100, %101 : vector<16x64xi1>, vector<16x64xf32>
    %103 = arith.addf %61, %102 : vector<16x64xf32>
    %104 = tpu.reciprocal %103 : vector<16x64xf32> -> vector<16x64xf32>
    %105 = vector.broadcast %36 : f32 to vector<16x64xf32>
    %106 = arith.mulf %105, %104 : vector<16x64xf32>
    %107 = vector.broadcast %37 : f32 to vector<16x64xf32>
    %108 = arith.mulf %103, %107 : vector<16x64xf32>
    %cst_68 = arith.constant 0.000000e+00 : f32
    %109 = vector.broadcast %cst_68 : f32 to vector<16x64xf32>
    %110 = arith.cmpf ogt, %63, %109 : vector<16x64xf32>
    %cst_69 = arith.constant 0.000000e+00 : f32
    %cst_70 = arith.constant 1.000000e+00 : f32
    %111 = vector.broadcast %cst_69 : f32 to vector<16x64xf32>
    %112 = vector.broadcast %cst_70 : f32 to vector<16x64xf32>
    %113 = arith.select %110, %111, %112 : vector<16x64xi1>, vector<16x64xf32>
    %114 = arith.addf %63, %113 : vector<16x64xf32>
    %115 = tpu.reciprocal %114 : vector<16x64xf32> -> vector<16x64xf32>
    %116 = vector.broadcast %36 : f32 to vector<16x64xf32>
    %117 = arith.mulf %116, %115 : vector<16x64xf32>
    %118 = vector.broadcast %37 : f32 to vector<16x64xf32>
    %119 = arith.mulf %114, %118 : vector<16x64xf32>
    %120 = arith.subf %43, %61 : vector<16x64xf32>
    %121 = math.absf %120 : vector<16x64xf32>
    %cst_71 = arith.constant 3.000000e+00 : f32
    %122 = vector.broadcast %cst_71 : f32 to vector<16x64xf32>
    %123 = arith.cmpf ogt, %121, %122 : vector<16x64xf32>
    %cst_72 = arith.constant 5.000000e-02 : f32
    %124 = vector.broadcast %cst_72 : f32 to vector<16x64xf32>
    %125 = arith.mulf %124, %61 : vector<16x64xf32>
    %126 = arith.cmpf ogt, %121, %125 : vector<16x64xf32>
    %127 = arith.andi %123, %126 : vector<16x64xi1>
    %128 = arith.andi %127, %73 : vector<16x64xi1>
    %129 = arith.extui %128 : vector<16x64xi1> to vector<16x64xi32>
    %130 = arith.sitofp %129 : vector<16x64xi32> to vector<16x64xf32>
    %131 = tpu.iota {dimensions = array<i32: 1>} : vector<16x64xi32>
    %132 = arith.sitofp %131 : vector<16x64xi32> to vector<16x64xf32>
    %133 = tpu.iota {dimensions = array<i32: 0>} : vector<16x64xi32>
    %c16_i32 = arith.constant 16 : i32
    %134 = arith.muli %arg1, %c16_i32 : i32
    %135 = vector.broadcast %134 : i32 to vector<16x64xi32>
    %136 = arith.addi %133, %135 : vector<16x64xi32>
    %137 = arith.sitofp %136 : vector<16x64xi32> to vector<16x64xf32>
    %138 = vector.broadcast %19 : f32 to vector<16x64xf32>
    %139 = arith.mulf %138, %132 : vector<16x64xf32>
    %140 = vector.broadcast %21 : f32 to vector<16x64xf32>
    %141 = arith.mulf %140, %137 : vector<16x64xf32>
    %142 = arith.addf %139, %141 : vector<16x64xf32>
    %143 = vector.broadcast %23 : f32 to vector<16x64xf32>
    %144 = arith.addf %142, %143 : vector<16x64xf32>
    %145 = arith.mulf %93, %144 : vector<16x64xf32>
    %146 = vector.broadcast %25 : f32 to vector<16x64xf32>
    %147 = arith.mulf %146, %132 : vector<16x64xf32>
    %148 = vector.broadcast %27 : f32 to vector<16x64xf32>
    %149 = arith.mulf %148, %137 : vector<16x64xf32>
    %150 = arith.addf %147, %149 : vector<16x64xf32>
    %151 = vector.broadcast %29 : f32 to vector<16x64xf32>
    %152 = arith.addf %150, %151 : vector<16x64xf32>
    %153 = arith.mulf %93, %152 : vector<16x64xf32>
    %154 = vector.broadcast %31 : f32 to vector<16x64xf32>
    %155 = arith.mulf %154, %132 : vector<16x64xf32>
    %156 = vector.broadcast %33 : f32 to vector<16x64xf32>
    %157 = arith.mulf %156, %137 : vector<16x64xf32>
    %158 = arith.addf %155, %157 : vector<16x64xf32>
    %159 = vector.broadcast %35 : f32 to vector<16x64xf32>
    %160 = arith.addf %158, %159 : vector<16x64xf32>
    %161 = arith.mulf %93, %160 : vector<16x64xf32>
    %162 = arith.addf %145, %47 : vector<16x64xf32>
    %163 = arith.addf %153, %51 : vector<16x64xf32>
    %164 = arith.addf %161, %55 : vector<16x64xf32>
    %165 = vector.broadcast %1 : f32 to vector<16x64xf32>
    %166 = arith.mulf %165, %162 : vector<16x64xf32>
    %167 = vector.broadcast %3 : f32 to vector<16x64xf32>
    %168 = arith.mulf %167, %163 : vector<16x64xf32>
    %169 = arith.addf %166, %168 : vector<16x64xf32>
    %170 = vector.broadcast %5 : f32 to vector<16x64xf32>
    %171 = arith.mulf %170, %164 : vector<16x64xf32>
    %172 = arith.addf %169, %171 : vector<16x64xf32>
    %173 = vector.broadcast %7 : f32 to vector<16x64xf32>
    %174 = arith.mulf %173, %162 : vector<16x64xf32>
    %175 = vector.broadcast %9 : f32 to vector<16x64xf32>
    %176 = arith.mulf %175, %163 : vector<16x64xf32>
    %177 = arith.addf %174, %176 : vector<16x64xf32>
    %178 = vector.broadcast %11 : f32 to vector<16x64xf32>
    %179 = arith.mulf %178, %164 : vector<16x64xf32>
    %180 = arith.addf %177, %179 : vector<16x64xf32>
    %181 = vector.broadcast %13 : f32 to vector<16x64xf32>
    %182 = arith.mulf %181, %162 : vector<16x64xf32>
    %183 = vector.broadcast %15 : f32 to vector<16x64xf32>
    %184 = arith.mulf %183, %163 : vector<16x64xf32>
    %185 = arith.addf %182, %184 : vector<16x64xf32>
    %186 = vector.broadcast %17 : f32 to vector<16x64xf32>
    %187 = arith.mulf %186, %164 : vector<16x64xf32>
    %188 = arith.addf %185, %187 : vector<16x64xf32>
    %cst_73 = arith.constant 9.99999993E-9 : f32
    %189 = vector.broadcast %cst_73 : f32 to vector<16x64xf32>
    %190 = arith.addf %188, %189 : vector<16x64xf32>
    %191 = tpu.reciprocal %190 : vector<16x64xf32> -> vector<16x64xf32>
    %192 = arith.mulf %172, %191 : vector<16x64xf32>
    %193 = arith.subf %192, %132 : vector<16x64xf32>
    %194 = arith.mulf %180, %191 : vector<16x64xf32>
    %195 = arith.subf %194, %137 : vector<16x64xf32>
    %196 = arith.subf %193, %57 : vector<16x64xf32>
    %197 = arith.subf %195, %59 : vector<16x64xf32>
    %198 = arith.mulf %196, %196 : vector<16x64xf32>
    %199 = arith.mulf %197, %197 : vector<16x64xf32>
    %200 = arith.addf %198, %199 : vector<16x64xf32>
    %201 = math.sqrt %200 : vector<16x64xf32>
    %202 = arith.mulf %57, %57 : vector<16x64xf32>
    %203 = arith.mulf %59, %59 : vector<16x64xf32>
    %204 = arith.addf %202, %203 : vector<16x64xf32>
    %205 = math.sqrt %204 : vector<16x64xf32>
    %cst_74 = arith.constant 9.99999993E-9 : f32
    %206 = vector.broadcast %cst_74 : f32 to vector<16x64xf32>
    %207 = arith.addf %205, %206 : vector<16x64xf32>
    %cst_75 = arith.constant 3.000000e+00 : f32
    %208 = vector.broadcast %cst_75 : f32 to vector<16x64xf32>
    %209 = arith.cmpf ogt, %201, %208 : vector<16x64xf32>
    %cst_76 = arith.constant 5.000000e-02 : f32
    %210 = vector.broadcast %cst_76 : f32 to vector<16x64xf32>
    %211 = arith.mulf %210, %207 : vector<16x64xf32>
    %212 = arith.cmpf ogt, %201, %211 : vector<16x64xf32>
    %213 = arith.andi %209, %212 : vector<16x64xi1>
    %214 = arith.andi %213, %68 : vector<16x64xi1>
    %215 = arith.extui %214 : vector<16x64xi1> to vector<16x64xi32>
    %216 = arith.sitofp %215 : vector<16x64xi32> to vector<16x64xf32>
    %217 = arith.addf %97, %55 : vector<16x64xf32>
    %218 = tpu.reciprocal %217 : vector<16x64xf32> -> vector<16x64xf32>
    %219 = vector.broadcast %36 : f32 to vector<16x64xf32>
    %220 = arith.mulf %219, %218 : vector<16x64xf32>
    %221 = arith.subf %220, %63 : vector<16x64xf32>
    %222 = math.absf %221 : vector<16x64xf32>
    %cst_77 = arith.constant 3.000000e+00 : f32
    %223 = vector.broadcast %cst_77 : f32 to vector<16x64xf32>
    %224 = arith.cmpf ogt, %222, %223 : vector<16x64xf32>
    %cst_78 = arith.constant 5.000000e-02 : f32
    %225 = vector.broadcast %cst_78 : f32 to vector<16x64xf32>
    %226 = arith.mulf %225, %63 : vector<16x64xf32>
    %227 = arith.cmpf ogt, %222, %226 : vector<16x64xf32>
    %228 = arith.andi %224, %227 : vector<16x64xi1>
    %229 = arith.andi %228, %78 : vector<16x64xi1>
    %230 = arith.extui %229 : vector<16x64xi1> to vector<16x64xi32>
    %231 = arith.sitofp %230 : vector<16x64xi32> to vector<16x64xf32>
    %232 = arith.ori %214, %128 : vector<16x64xi1>
    %233 = arith.ori %232, %229 : vector<16x64xi1>
    %234 = arith.andi %233, %80 : vector<16x64xi1>
    %235 = arith.extui %234 : vector<16x64xi1> to vector<16x64xi32>
    %236 = arith.sitofp %235 : vector<16x64xi32> to vector<16x64xf32>
    %c0_79 = arith.constant 0 : index
    %c0_80 = arith.constant 0 : index
    %c0_81 = arith.constant 0 : index
    %c0_82 = arith.constant 0 : index
    %237 = vector.load %arg12[%c0_79, %c0_80, %c0_81, %c0_82] : memref<1x1x16x64xf32, #tpu.memory_space<vmem>>, vector<1x1x16x64xf32>
    %238 = vector.shape_cast %237 : vector<1x1x16x64xf32> to vector<16x64xf32>
    %239 = vector.shape_cast %130 : vector<16x64xf32> to vector<1x1x16x64xf32>
    tpu.vector_store %arg12[%c0_79, %c0_80, %c0_81, %c0_82], %239 {strides = array<i32>} : memref<1x1x16x64xf32, #tpu.memory_space<vmem>>, vector<1x1x16x64xf32>,
    %c0_83 = arith.constant 0 : index
    %c0_84 = arith.constant 0 : index
    %c0_85 = arith.constant 0 : index
    %c0_86 = arith.constant 0 : index
    %240 = vector.load %arg13[%c0_83, %c0_84, %c0_85, %c0_86] : memref<1x1x16x64xf32, #tpu.memory_space<vmem>>, vector<1x1x16x64xf32>
    %241 = vector.shape_cast %240 : vector<1x1x16x64xf32> to vector<16x64xf32>
    %242 = vector.shape_cast %43 : vector<16x64xf32> to vector<1x1x16x64xf32>
    tpu.vector_store %arg13[%c0_83, %c0_84, %c0_85, %c0_86], %242 {strides = array<i32>} : memref<1x1x16x64xf32, #tpu.memory_space<vmem>>, vector<1x1x16x64xf32>,
    %c0_87 = arith.constant 0 : index
    %c0_88 = arith.constant 0 : index
    %c0_89 = arith.constant 0 : index
    %c0_90 = arith.constant 0 : index
    %243 = vector.load %arg14[%c0_87, %c0_88, %c0_89, %c0_90] : memref<1x1x16x64xf32, #tpu.memory_space<vmem>>, vector<1x1x16x64xf32>
    %244 = vector.shape_cast %243 : vector<1x1x16x64xf32> to vector<16x64xf32>
    %245 = vector.shape_cast %97 : vector<16x64xf32> to vector<1x1x16x64xf32>
    tpu.vector_store %arg14[%c0_87, %c0_88, %c0_89, %c0_90], %245 {strides = array<i32>} : memref<1x1x16x64xf32, #tpu.memory_space<vmem>>, vector<1x1x16x64xf32>,
    %c0_91 = arith.constant 0 : index
    %c0_92 = arith.constant 0 : index
    %c0_93 = arith.constant 0 : index
    %c0_94 = arith.constant 0 : index
    %246 = vector.load %arg15[%c0_91, %c0_92, %c0_93, %c0_94] : memref<1x2x16x64xf32, #tpu.memory_space<vmem>>, vector<1x1x16x64xf32>
    %247 = vector.shape_cast %246 : vector<1x1x16x64xf32> to vector<16x64xf32>
    %248 = vector.shape_cast %193 : vector<16x64xf32> to vector<1x1x16x64xf32>
    tpu.vector_store %arg15[%c0_91, %c0_92, %c0_93, %c0_94], %248 {strides = array<i32>} : memref<1x2x16x64xf32, #tpu.memory_space<vmem>>, vector<1x1x16x64xf32>,
    %c0_95 = arith.constant 0 : index
    %c1_96 = arith.constant 1 : index
    %c0_97 = arith.constant 0 : index
    %c0_98 = arith.constant 0 : index
    %249 = vector.load %arg15[%c0_95, %c1_96, %c0_97, %c0_98] : memref<1x2x16x64xf32, #tpu.memory_space<vmem>>, vector<1x1x16x64xf32>
    %250 = vector.shape_cast %249 : vector<1x1x16x64xf32> to vector<16x64xf32>
    %251 = vector.shape_cast %195 : vector<16x64xf32> to vector<1x1x16x64xf32>
    tpu.vector_store %arg15[%c0_95, %c1_96, %c0_97, %c0_98], %251 {strides = array<i32>} : memref<1x2x16x64xf32, #tpu.memory_space<vmem>>, vector<1x1x16x64xf32>,
    %c0_99 = arith.constant 0 : index
    %c0_100 = arith.constant 0 : index
    %c0_101 = arith.constant 0 : index
    %c0_102 = arith.constant 0 : index
    %252 = vector.load %arg16[%c0_99, %c0_100, %c0_101, %c0_102] : memref<1x1x16x64xf32, #tpu.memory_space<vmem>>, vector<1x1x16x64xf32>
    %253 = vector.shape_cast %252 : vector<1x1x16x64xf32> to vector<16x64xf32>
    %254 = vector.shape_cast %231 : vector<16x64xf32> to vector<1x1x16x64xf32>
    tpu.vector_store %arg16[%c0_99, %c0_100, %c0_101, %c0_102], %254 {strides = array<i32>} : memref<1x1x16x64xf32, #tpu.memory_space<vmem>>, vector<1x1x16x64xf32>,
    %c0_103 = arith.constant 0 : index
    %c0_104 = arith.constant 0 : index
    %c0_105 = arith.constant 0 : index
    %c0_106 = arith.constant 0 : index
    %255 = vector.load %arg17[%c0_103, %c0_104, %c0_105, %c0_106] : memref<1x1x16x64xf32, #tpu.memory_space<vmem>>, vector<1x1x16x64xf32>
    %256 = vector.shape_cast %255 : vector<1x1x16x64xf32> to vector<16x64xf32>
    %257 = vector.shape_cast %220 : vector<16x64xf32> to vector<1x1x16x64xf32>
    tpu.vector_store %arg17[%c0_103, %c0_104, %c0_105, %c0_106], %257 {strides = array<i32>} : memref<1x1x16x64xf32, #tpu.memory_space<vmem>>, vector<1x1x16x64xf32>,
    %c0_107 = arith.constant 0 : index
    %c0_108 = arith.constant 0 : index
    %c0_109 = arith.constant 0 : index
    %c0_110 = arith.constant 0 : index
    %258 = vector.load %arg18[%c0_107, %c0_108, %c0_109, %c0_110] : memref<1x1x16x64xf32, #tpu.memory_space<vmem>>, vector<1x1x16x64xf32>
    %259 = vector.shape_cast %258 : vector<1x1x16x64xf32> to vector<16x64xf32>
    %260 = vector.shape_cast %217 : vector<16x64xf32> to vector<1x1x16x64xf32>
    tpu.vector_store %arg18[%c0_107, %c0_108, %c0_109, %c0_110], %260 {strides = array<i32>} : memref<1x1x16x64xf32, #tpu.memory_space<vmem>>, vector<1x1x16x64xf32>,
    %261 = tpu.reciprocal %97 : vector<16x64xf32> -> vector<16x64xf32>
    %262 = arith.subf %106, %97 : vector<16x64xf32>
    %263 = arith.mulf %262, %262 : vector<16x64xf32>
    %264 = arith.mulf %106, %261 : vector<16x64xf32>
    %265 = arith.mulf %97, %108 : vector<16x64xf32>
    %266 = arith.maximumf %264, %265 : vector<16x64xf32>
    %267 = math.log %264 : vector<16x64xf32>
    %268 = math.absf %262 : vector<16x64xf32>
    %269 = arith.mulf %268, %108 : vector<16x64xf32>
    %cst_111 = arith.constant 0.000000e+00 : f32
    %270 = vector.broadcast %cst_111 : f32 to vector<16x64xf32>
    %271 = arith.select %73, %269, %270 : vector<16x64xi1>, vector<16x64xf32>
    %272 = vector.shape_cast %271 : vector<16x64xf32> to vector<1x16x64xf32>
    %cst_112 = arith.constant dense<0.000000e+00> : vector<1xf32>
    %273 = vector.multi_reduction <add>, %272, %cst_112 [1, 2] : vector<1x16x64xf32> to vector<1xf32>
    %274 = vector.shape_cast %273 : vector<1xf32> to vector<1x1x1xf32>
    %275 = vector.extract %274[0, 0, 0] : f32 from vector<1x1x1xf32>
    %276 = arith.mulf %263, %108 : vector<16x64xf32>
    %cst_113 = arith.constant 0.000000e+00 : f32
    %277 = vector.broadcast %cst_113 : f32 to vector<16x64xf32>
    %278 = arith.select %73, %276, %277 : vector<16x64xi1>, vector<16x64xf32>
    %279 = vector.shape_cast %278 : vector<16x64xf32> to vector<1x16x64xf32>
    %cst_114 = arith.constant dense<0.000000e+00> : vector<1xf32>
    %280 = vector.multi_reduction <add>, %279, %cst_114 [1, 2] : vector<1x16x64xf32> to vector<1xf32>
    %281 = vector.shape_cast %280 : vector<1xf32> to vector<1x1x1xf32>
    %282 = vector.extract %281[0, 0, 0] : f32 from vector<1x1x1xf32>
    %cst_115 = arith.constant 0.000000e+00 : f32
    %283 = vector.broadcast %cst_115 : f32 to vector<16x64xf32>
    %284 = arith.select %73, %263, %283 : vector<16x64xi1>, vector<16x64xf32>
    %285 = vector.shape_cast %284 : vector<16x64xf32> to vector<1x16x64xf32>
    %cst_116 = arith.constant dense<0.000000e+00> : vector<1xf32>
    %286 = vector.multi_reduction <add>, %285, %cst_116 [1, 2] : vector<1x16x64xf32> to vector<1xf32>
    %287 = vector.shape_cast %286 : vector<1xf32> to vector<1x1x1xf32>
    %288 = vector.extract %287[0, 0, 0] : f32 from vector<1x1x1xf32>
    %289 = arith.mulf %267, %267 : vector<16x64xf32>
    %cst_117 = arith.constant 0.000000e+00 : f32
    %290 = vector.broadcast %cst_117 : f32 to vector<16x64xf32>
    %291 = arith.select %73, %289, %290 : vector<16x64xi1>, vector<16x64xf32>
    %292 = vector.shape_cast %291 : vector<16x64xf32> to vector<1x16x64xf32>
    %cst_118 = arith.constant dense<0.000000e+00> : vector<1xf32>
    %293 = vector.multi_reduction <add>, %292, %cst_118 [1, 2] : vector<1x16x64xf32> to vector<1xf32>
    %294 = vector.shape_cast %293 : vector<1xf32> to vector<1x1x1xf32>
    %295 = vector.extract %294[0, 0, 0] : f32 from vector<1x1x1xf32>
    %cst_119 = arith.constant 1.250000e+00 : f32
    %296 = vector.broadcast %cst_119 : f32 to vector<16x64xf32>
    %297 = arith.cmpf olt, %266, %296 : vector<16x64xf32>
    %298 = arith.andi %73, %297 : vector<16x64xi1>
    %299 = arith.extui %298 : vector<16x64xi1> to vector<16x64xi32>
    %300 = arith.sitofp %299 : vector<16x64xi32> to vector<16x64xf32>
    %301 = vector.shape_cast %300 : vector<16x64xf32> to vector<1x16x64xf32>
    %cst_120 = arith.constant dense<0.000000e+00> : vector<1xf32>
    %302 = vector.multi_reduction <add>, %301, %cst_120 [1, 2] : vector<1x16x64xf32> to vector<1xf32>
    %303 = vector.shape_cast %302 : vector<1xf32> to vector<1x1x1xf32>
    %304 = vector.extract %303[0, 0, 0] : f32 from vector<1x1x1xf32>
    %cst_121 = arith.constant 1.562500e+00 : f32
    %305 = vector.broadcast %cst_121 : f32 to vector<16x64xf32>
    %306 = arith.cmpf olt, %266, %305 : vector<16x64xf32>
    %307 = arith.andi %73, %306 : vector<16x64xi1>
    %308 = arith.extui %307 : vector<16x64xi1> to vector<16x64xi32>
    %309 = arith.sitofp %308 : vector<16x64xi32> to vector<16x64xf32>
    %310 = vector.shape_cast %309 : vector<16x64xf32> to vector<1x16x64xf32>
    %cst_122 = arith.constant dense<0.000000e+00> : vector<1xf32>
    %311 = vector.multi_reduction <add>, %310, %cst_122 [1, 2] : vector<1x16x64xf32> to vector<1xf32>
    %312 = vector.shape_cast %311 : vector<1xf32> to vector<1x1x1xf32>
    %313 = vector.extract %312[0, 0, 0] : f32 from vector<1x1x1xf32>
    %cst_123 = arith.constant 1.953125 : f32
    %314 = vector.broadcast %cst_123 : f32 to vector<16x64xf32>
    %315 = arith.cmpf olt, %266, %314 : vector<16x64xf32>
    %316 = arith.andi %73, %315 : vector<16x64xi1>
    %317 = arith.extui %316 : vector<16x64xi1> to vector<16x64xi32>
    %318 = arith.sitofp %317 : vector<16x64xi32> to vector<16x64xf32>
    %319 = vector.shape_cast %318 : vector<16x64xf32> to vector<1x16x64xf32>
    %cst_124 = arith.constant dense<0.000000e+00> : vector<1xf32>
    %320 = vector.multi_reduction <add>, %319, %cst_124 [1, 2] : vector<1x16x64xf32> to vector<1xf32>
    %321 = vector.shape_cast %320 : vector<1xf32> to vector<1x1x1xf32>
    %322 = vector.extract %321[0, 0, 0] : f32 from vector<1x1x1xf32>
    %323 = vector.shape_cast %82 : vector<16x64xf32> to vector<1x16x64xf32>
    %cst_125 = arith.constant dense<0.000000e+00> : vector<1xf32>
    %324 = vector.multi_reduction <add>, %323, %cst_125 [1, 2] : vector<1x16x64xf32> to vector<1xf32>
    %325 = vector.shape_cast %324 : vector<1xf32> to vector<1x1x1xf32>
    %326 = vector.extract %325[0, 0, 0] : f32 from vector<1x1x1xf32>
    %327 = arith.subf %117, %217 : vector<16x64xf32>
    %328 = arith.mulf %327, %327 : vector<16x64xf32>
    %329 = arith.mulf %117, %218 : vector<16x64xf32>
    %330 = arith.mulf %217, %119 : vector<16x64xf32>
    %331 = arith.maximumf %329, %330 : vector<16x64xf32>
    %332 = math.log %329 : vector<16x64xf32>
    %333 = math.absf %327 : vector<16x64xf32>
    %334 = arith.mulf %333, %119 : vector<16x64xf32>
    %cst_126 = arith.constant 0.000000e+00 : f32
    %335 = vector.broadcast %cst_126 : f32 to vector<16x64xf32>
    %336 = arith.select %78, %334, %335 : vector<16x64xi1>, vector<16x64xf32>
    %337 = vector.shape_cast %336 : vector<16x64xf32> to vector<1x16x64xf32>
    %cst_127 = arith.constant dense<0.000000e+00> : vector<1xf32>
    %338 = vector.multi_reduction <add>, %337, %cst_127 [1, 2] : vector<1x16x64xf32> to vector<1xf32>
    %339 = vector.shape_cast %338 : vector<1xf32> to vector<1x1x1xf32>
    %340 = vector.extract %339[0, 0, 0] : f32 from vector<1x1x1xf32>
    %341 = arith.mulf %328, %119 : vector<16x64xf32>
    %cst_128 = arith.constant 0.000000e+00 : f32
    %342 = vector.broadcast %cst_128 : f32 to vector<16x64xf32>
    %343 = arith.select %78, %341, %342 : vector<16x64xi1>, vector<16x64xf32>
    %344 = vector.shape_cast %343 : vector<16x64xf32> to vector<1x16x64xf32>
    %cst_129 = arith.constant dense<0.000000e+00> : vector<1xf32>
    %345 = vector.multi_reduction <add>, %344, %cst_129 [1, 2] : vector<1x16x64xf32> to vector<1xf32>
    %346 = vector.shape_cast %345 : vector<1xf32> to vector<1x1x1xf32>
    %347 = vector.extract %346[0, 0, 0] : f32 from vector<1x1x1xf32>
    %cst_130 = arith.constant 0.000000e+00 : f32
    %348 = vector.broadcast %cst_130 : f32 to vector<16x64xf32>
    %349 = arith.select %78, %328, %348 : vector<16x64xi1>, vector<16x64xf32>
    %350 = vector.shape_cast %349 : vector<16x64xf32> to vector<1x16x64xf32>
    %cst_131 = arith.constant dense<0.000000e+00> : vector<1xf32>
    %351 = vector.multi_reduction <add>, %350, %cst_131 [1, 2] : vector<1x16x64xf32> to vector<1xf32>
    %352 = vector.shape_cast %351 : vector<1xf32> to vector<1x1x1xf32>
    %353 = vector.extract %352[0, 0, 0] : f32 from vector<1x1x1xf32>
    %354 = arith.mulf %332, %332 : vector<16x64xf32>
    %cst_132 = arith.constant 0.000000e+00 : f32
    %355 = vector.broadcast %cst_132 : f32 to vector<16x64xf32>
    %356 = arith.select %78, %354, %355 : vector<16x64xi1>, vector<16x64xf32>
    %357 = vector.shape_cast %356 : vector<16x64xf32> to vector<1x16x64xf32>
    %cst_133 = arith.constant dense<0.000000e+00> : vector<1xf32>
    %358 = vector.multi_reduction <add>, %357, %cst_133 [1, 2] : vector<1x16x64xf32> to vector<1xf32>
    %359 = vector.shape_cast %358 : vector<1xf32> to vector<1x1x1xf32>
    %360 = vector.extract %359[0, 0, 0] : f32 from vector<1x1x1xf32>
    %cst_134 = arith.constant 1.250000e+00 : f32
    %361 = vector.broadcast %cst_134 : f32 to vector<16x64xf32>
    %362 = arith.cmpf olt, %331, %361 : vector<16x64xf32>
    %363 = arith.andi %78, %362 : vector<16x64xi1>
    %364 = arith.extui %363 : vector<16x64xi1> to vector<16x64xi32>
    %365 = arith.sitofp %364 : vector<16x64xi32> to vector<16x64xf32>
    %366 = vector.shape_cast %365 : vector<16x64xf32> to vector<1x16x64xf32>
    %cst_135 = arith.constant dense<0.000000e+00> : vector<1xf32>
    %367 = vector.multi_reduction <add>, %366, %cst_135 [1, 2] : vector<1x16x64xf32> to vector<1xf32>
    %368 = vector.shape_cast %367 : vector<1xf32> to vector<1x1x1xf32>
    %369 = vector.extract %368[0, 0, 0] : f32 from vector<1x1x1xf32>
    %cst_136 = arith.constant 1.562500e+00 : f32
    %370 = vector.broadcast %cst_136 : f32 to vector<16x64xf32>
    %371 = arith.cmpf olt, %331, %370 : vector<16x64xf32>
    %372 = arith.andi %78, %371 : vector<16x64xi1>
    %373 = arith.extui %372 : vector<16x64xi1> to vector<16x64xi32>
    %374 = arith.sitofp %373 : vector<16x64xi32> to vector<16x64xf32>
    %375 = vector.shape_cast %374 : vector<16x64xf32> to vector<1x16x64xf32>
    %cst_137 = arith.constant dense<0.000000e+00> : vector<1xf32>
    %376 = vector.multi_reduction <add>, %375, %cst_137 [1, 2] : vector<1x16x64xf32> to vector<1xf32>
    %377 = vector.shape_cast %376 : vector<1xf32> to vector<1x1x1xf32>
    %378 = vector.extract %377[0, 0, 0] : f32 from vector<1x1x1xf32>
    %cst_138 = arith.constant 1.953125 : f32
    %379 = vector.broadcast %cst_138 : f32 to vector<16x64xf32>
    %380 = arith.cmpf olt, %331, %379 : vector<16x64xf32>
    %381 = arith.andi %78, %380 : vector<16x64xi1>
    %382 = arith.extui %381 : vector<16x64xi1> to vector<16x64xi32>
    %383 = arith.sitofp %382 : vector<16x64xi32> to vector<16x64xf32>
    %384 = vector.shape_cast %383 : vector<16x64xf32> to vector<1x16x64xf32>
    %cst_139 = arith.constant dense<0.000000e+00> : vector<1xf32>
    %385 = vector.multi_reduction <add>, %384, %cst_139 [1, 2] : vector<1x16x64xf32> to vector<1xf32>
    %386 = vector.shape_cast %385 : vector<1xf32> to vector<1x1x1xf32>
    %387 = vector.extract %386[0, 0, 0] : f32 from vector<1x1x1xf32>
    %388 = vector.shape_cast %84 : vector<16x64xf32> to vector<1x16x64xf32>
    %cst_140 = arith.constant dense<0.000000e+00> : vector<1xf32>
    %389 = vector.multi_reduction <add>, %388, %cst_140 [1, 2] : vector<1x16x64xf32> to vector<1xf32>
    %390 = vector.shape_cast %389 : vector<1xf32> to vector<1x1x1xf32>
    %391 = vector.extract %390[0, 0, 0] : f32 from vector<1x1x1xf32>
    %392 = vector.shape_cast %130 : vector<16x64xf32> to vector<1x16x64xf32>
    %cst_141 = arith.constant dense<0.000000e+00> : vector<1xf32>
    %393 = vector.multi_reduction <add>, %392, %cst_141 [1, 2] : vector<1x16x64xf32> to vector<1xf32>
    %394 = vector.shape_cast %393 : vector<1xf32> to vector<1x1x1xf32>
    %395 = vector.extract %394[0, 0, 0] : f32 from vector<1x1x1xf32>
    %396 = vector.shape_cast %216 : vector<16x64xf32> to vector<1x16x64xf32>
    %cst_142 = arith.constant dense<0.000000e+00> : vector<1xf32>
    %397 = vector.multi_reduction <add>, %396, %cst_142 [1, 2] : vector<1x16x64xf32> to vector<1xf32>
    %398 = vector.shape_cast %397 : vector<1xf32> to vector<1x1x1xf32>
    %399 = vector.extract %398[0, 0, 0] : f32 from vector<1x1x1xf32>
    %400 = vector.shape_cast %231 : vector<16x64xf32> to vector<1x16x64xf32>
    %cst_143 = arith.constant dense<0.000000e+00> : vector<1xf32>
    %401 = vector.multi_reduction <add>, %400, %cst_143 [1, 2] : vector<1x16x64xf32> to vector<1xf32>
    %402 = vector.shape_cast %401 : vector<1xf32> to vector<1x1x1xf32>
    %403 = vector.extract %402[0, 0, 0] : f32 from vector<1x1x1xf32>
    %404 = vector.shape_cast %236 : vector<16x64xf32> to vector<1x16x64xf32>
    %cst_144 = arith.constant dense<0.000000e+00> : vector<1xf32>
    %405 = vector.multi_reduction <add>, %404, %cst_144 [1, 2] : vector<1x16x64xf32> to vector<1xf32>
    %406 = vector.shape_cast %405 : vector<1xf32> to vector<1x1x1xf32>
    %407 = vector.extract %406[0, 0, 0] : f32 from vector<1x1x1xf32>
    %408 = tpu.iota {dimensions = array<i32: 1>} : vector<1x128xi32>
    %cst_145 = arith.constant 0.000000e+00 : f32
    %409 = vector.broadcast %cst_145 : f32 to vector<1x128xf32>
    %c0_i32 = arith.constant 0 : i32
    %410 = vector.broadcast %c0_i32 : i32 to vector<1x128xi32>
    %411 = arith.cmpi eq, %408, %410 : vector<1x128xi32>
    %412 = vector.broadcast %395 : f32 to vector<1x128xf32>
    %413 = arith.select %411, %412, %409 : vector<1x128xi1>, vector<1x128xf32>
    %c1_i32 = arith.constant 1 : i32
    %414 = vector.broadcast %c1_i32 : i32 to vector<1x128xi32>
    %415 = arith.cmpi eq, %408, %414 : vector<1x128xi32>
    %416 = vector.broadcast %399 : f32 to vector<1x128xf32>
    %417 = arith.select %415, %416, %413 : vector<1x128xi1>, vector<1x128xf32>
    %c2_i32 = arith.constant 2 : i32
    %418 = vector.broadcast %c2_i32 : i32 to vector<1x128xi32>
    %419 = arith.cmpi eq, %408, %418 : vector<1x128xi32>
    %420 = vector.broadcast %403 : f32 to vector<1x128xf32>
    %421 = arith.select %419, %420, %417 : vector<1x128xi1>, vector<1x128xf32>
    %c3_i32 = arith.constant 3 : i32
    %422 = vector.broadcast %c3_i32 : i32 to vector<1x128xi32>
    %423 = arith.cmpi eq, %408, %422 : vector<1x128xi32>
    %424 = vector.broadcast %407 : f32 to vector<1x128xf32>
    %425 = arith.select %423, %424, %421 : vector<1x128xi1>, vector<1x128xf32>
    %c4_i32 = arith.constant 4 : i32
    %426 = vector.broadcast %c4_i32 : i32 to vector<1x128xi32>
    %427 = arith.cmpi eq, %408, %426 : vector<1x128xi32>
    %428 = vector.broadcast %275 : f32 to vector<1x128xf32>
    %429 = arith.select %427, %428, %425 : vector<1x128xi1>, vector<1x128xf32>
    %c5_i32 = arith.constant 5 : i32
    %430 = vector.broadcast %c5_i32 : i32 to vector<1x128xi32>
    %431 = arith.cmpi eq, %408, %430 : vector<1x128xi32>
    %432 = vector.broadcast %282 : f32 to vector<1x128xf32>
    %433 = arith.select %431, %432, %429 : vector<1x128xi1>, vector<1x128xf32>
    %c6_i32 = arith.constant 6 : i32
    %434 = vector.broadcast %c6_i32 : i32 to vector<1x128xi32>
    %435 = arith.cmpi eq, %408, %434 : vector<1x128xi32>
    %436 = vector.broadcast %288 : f32 to vector<1x128xf32>
    %437 = arith.select %435, %436, %433 : vector<1x128xi1>, vector<1x128xf32>
    %c7_i32 = arith.constant 7 : i32
    %438 = vector.broadcast %c7_i32 : i32 to vector<1x128xi32>
    %439 = arith.cmpi eq, %408, %438 : vector<1x128xi32>
    %440 = vector.broadcast %295 : f32 to vector<1x128xf32>
    %441 = arith.select %439, %440, %437 : vector<1x128xi1>, vector<1x128xf32>
    %c8_i32 = arith.constant 8 : i32
    %442 = vector.broadcast %c8_i32 : i32 to vector<1x128xi32>
    %443 = arith.cmpi eq, %408, %442 : vector<1x128xi32>
    %444 = vector.broadcast %304 : f32 to vector<1x128xf32>
    %445 = arith.select %443, %444, %441 : vector<1x128xi1>, vector<1x128xf32>
    %c9_i32 = arith.constant 9 : i32
    %446 = vector.broadcast %c9_i32 : i32 to vector<1x128xi32>
    %447 = arith.cmpi eq, %408, %446 : vector<1x128xi32>
    %448 = vector.broadcast %313 : f32 to vector<1x128xf32>
    %449 = arith.select %447, %448, %445 : vector<1x128xi1>, vector<1x128xf32>
    %c10_i32 = arith.constant 10 : i32
    %450 = vector.broadcast %c10_i32 : i32 to vector<1x128xi32>
    %451 = arith.cmpi eq, %408, %450 : vector<1x128xi32>
    %452 = vector.broadcast %322 : f32 to vector<1x128xf32>
    %453 = arith.select %451, %452, %449 : vector<1x128xi1>, vector<1x128xf32>
    %c11_i32 = arith.constant 11 : i32
    %454 = vector.broadcast %c11_i32 : i32 to vector<1x128xi32>
    %455 = arith.cmpi eq, %408, %454 : vector<1x128xi32>
    %456 = vector.broadcast %326 : f32 to vector<1x128xf32>
    %457 = arith.select %455, %456, %453 : vector<1x128xi1>, vector<1x128xf32>
    %c12_i32 = arith.constant 12 : i32
    %458 = vector.broadcast %c12_i32 : i32 to vector<1x128xi32>
    %459 = arith.cmpi eq, %408, %458 : vector<1x128xi32>
    %460 = vector.broadcast %340 : f32 to vector<1x128xf32>
    %461 = arith.select %459, %460, %457 : vector<1x128xi1>, vector<1x128xf32>
    %c13_i32 = arith.constant 13 : i32
    %462 = vector.broadcast %c13_i32 : i32 to vector<1x128xi32>
    %463 = arith.cmpi eq, %408, %462 : vector<1x128xi32>
    %464 = vector.broadcast %347 : f32 to vector<1x128xf32>
    %465 = arith.select %463, %464, %461 : vector<1x128xi1>, vector<1x128xf32>
    %c14_i32 = arith.constant 14 : i32
    %466 = vector.broadcast %c14_i32 : i32 to vector<1x128xi32>
    %467 = arith.cmpi eq, %408, %466 : vector<1x128xi32>
    %468 = vector.broadcast %353 : f32 to vector<1x128xf32>
    %469 = arith.select %467, %468, %465 : vector<1x128xi1>, vector<1x128xf32>
    %c15_i32 = arith.constant 15 : i32
    %470 = vector.broadcast %c15_i32 : i32 to vector<1x128xi32>
    %471 = arith.cmpi eq, %408, %470 : vector<1x128xi32>
    %472 = vector.broadcast %360 : f32 to vector<1x128xf32>
    %473 = arith.select %471, %472, %469 : vector<1x128xi1>, vector<1x128xf32>
    %c16_i32_146 = arith.constant 16 : i32
    %474 = vector.broadcast %c16_i32_146 : i32 to vector<1x128xi32>
    %475 = arith.cmpi eq, %408, %474 : vector<1x128xi32>
    %476 = vector.broadcast %369 : f32 to vector<1x128xf32>
    %477 = arith.select %475, %476, %473 : vector<1x128xi1>, vector<1x128xf32>
    %c17_i32 = arith.constant 17 : i32
    %478 = vector.broadcast %c17_i32 : i32 to vector<1x128xi32>
    %479 = arith.cmpi eq, %408, %478 : vector<1x128xi32>
    %480 = vector.broadcast %378 : f32 to vector<1x128xf32>
    %481 = arith.select %479, %480, %477 : vector<1x128xi1>, vector<1x128xf32>
    %c18_i32 = arith.constant 18 : i32
    %482 = vector.broadcast %c18_i32 : i32 to vector<1x128xi32>
    %483 = arith.cmpi eq, %408, %482 : vector<1x128xi32>
    %484 = vector.broadcast %387 : f32 to vector<1x128xf32>
    %485 = arith.select %483, %484, %481 : vector<1x128xi1>, vector<1x128xf32>
    %c19_i32 = arith.constant 19 : i32
    %486 = vector.broadcast %c19_i32 : i32 to vector<1x128xi32>
    %487 = arith.cmpi eq, %408, %486 : vector<1x128xi32>
    %488 = vector.broadcast %391 : f32 to vector<1x128xf32>
    %489 = arith.select %487, %488, %485 : vector<1x128xi1>, vector<1x128xf32>
    %c0_147 = arith.constant 0 : index
    %c0_148 = arith.constant 0 : index
    %c0_149 = arith.constant 0 : index
    %c0_150 = arith.constant 0 : index
    %490 = vector.load %arg19[%c0_147, %c0_148, %c0_149, %c0_150] : memref<1x1x1x128xf32, #tpu.memory_space<vmem>>, vector<1x1x1x128xf32>
    %491 = vector.shape_cast %490 : vector<1x1x1x128xf32> to vector<1x128xf32>
    %492 = vector.shape_cast %489 : vector<1x128xf32> to vector<1x1x1x128xf32>
    tpu.vector_store %arg19[%c0_147, %c0_148, %c0_149, %c0_150], %492 {strides = array<i32>} : memref<1x1x1x128xf32, #tpu.memory_space<vmem>>, vector<1x1x1x128xf32>,
    return
  }
  func.func @transform_0(%arg0: i32, %arg1: i32) -> (i32, i32) {
    %c0_i32 = arith.constant 0 : i32
    %c0_i32_0 = arith.constant 0 : i32
    %c0_i32_1 = arith.constant 0 : i32
    return %c0_i32, %c0_i32_0 : i32, i32
  }
  func.func @transform_1(%arg0: i32, %arg1: i32) -> (i32, i32) {
    %c0_i32 = arith.constant 0 : i32
    %c0_i32_0 = arith.constant 0 : i32
    return %arg1, %c0_i32 : i32, i32
  }
  func.func @transform_2(%arg0: i32, %arg1: i32) -> (i32, i32) {
    %c0_i32 = arith.constant 0 : i32
    %c0_i32_0 = arith.constant 0 : i32
    %c0_i32_1 = arith.constant 0 : i32
    return %c0_i32, %c0_i32_0 : i32, i32
  }
  func.func @transform_3(%arg0: i32, %arg1: i32) -> (i32, i32, i32, i32) {
    %c0_i32 = arith.constant 0 : i32
    %c0_i32_0 = arith.constant 0 : i32
    %c0_i32_1 = arith.constant 0 : i32
    %c0_i32_2 = arith.constant 0 : i32
    return %arg0, %c0_i32, %c0_i32_0, %c0_i32_1 : i32, i32, i32, i32
  }
  func.func @transform_4(%arg0: i32, %arg1: i32) -> (i32, i32, i32, i32) {
    %c0_i32 = arith.constant 0 : i32
    %c0_i32_0 = arith.constant 0 : i32
    %c0_i32_1 = arith.constant 0 : i32
    return %arg0, %c0_i32, %arg1, %c0_i32_0 : i32, i32, i32, i32
  }
  func.func @transform_5(%arg0: i32, %arg1: i32) -> (i32, i32, i32, i32) {
    %c0_i32 = arith.constant 0 : i32
    %c0_i32_0 = arith.constant 0 : i32
    %c0_i32_1 = arith.constant 0 : i32
    return %arg0, %c0_i32, %arg1, %c0_i32_0 : i32, i32, i32, i32
  }
  func.func @transform_6(%arg0: i32, %arg1: i32) -> (i32, i32, i32, i32) {
    %c0_i32 = arith.constant 0 : i32
    %c0_i32_0 = arith.constant 0 : i32
    %c0_i32_1 = arith.constant 0 : i32
    return %arg0, %c0_i32, %arg1, %c0_i32_0 : i32, i32, i32, i32
  }
  func.func @transform_7(%arg0: i32, %arg1: i32) -> (i32, i32, i32, i32) {
    %c0_i32 = arith.constant 0 : i32
    %c0_i32_0 = arith.constant 0 : i32
    %c0_i32_1 = arith.constant 0 : i32
    return %arg0, %c0_i32, %arg1, %c0_i32_0 : i32, i32, i32, i32
  }
  func.func @transform_8(%arg0: i32, %arg1: i32) -> (i32, i32, i32, i32) {
    %c0_i32 = arith.constant 0 : i32
    %c0_i32_0 = arith.constant 0 : i32
    %c0_i32_1 = arith.constant 0 : i32
    return %arg0, %c0_i32, %arg1, %c0_i32_0 : i32, i32, i32, i32
  }
  func.func @transform_9(%arg0: i32, %arg1: i32) -> (i32, i32, i32, i32) {
    %c0_i32 = arith.constant 0 : i32
    %c0_i32_0 = arith.constant 0 : i32
    %c0_i32_1 = arith.constant 0 : i32
    return %arg0, %c0_i32, %arg1, %c0_i32_0 : i32, i32, i32, i32
  }
  func.func @transform_10(%arg0: i32, %arg1: i32) -> (i32, i32, i32, i32) {
    %c0_i32 = arith.constant 0 : i32
    %c0_i32_0 = arith.constant 0 : i32
    %c0_i32_1 = arith.constant 0 : i32
    return %arg0, %c0_i32, %arg1, %c0_i32_0 : i32, i32, i32, i32
  }
  func.func @transform_11(%arg0: i32, %arg1: i32) -> (i32, i32, i32, i32) {
    %c0_i32 = arith.constant 0 : i32
    %c0_i32_0 = arith.constant 0 : i32
    %c0_i32_1 = arith.constant 0 : i32
    return %arg0, %c0_i32, %arg1, %c0_i32_0 : i32, i32, i32, i32
  }
  func.func @transform_12(%arg0: i32, %arg1: i32) -> (i32, i32, i32, i32) {
    %c0_i32 = arith.constant 0 : i32
    %c0_i32_0 = arith.constant 0 : i32
    %c0_i32_1 = arith.constant 0 : i32
    return %arg0, %c0_i32, %arg1, %c0_i32_0 : i32, i32, i32, i32
  }
  func.func @transform_13(%arg0: i32, %arg1: i32) -> (i32, i32, i32, i32) {
    %c0_i32 = arith.constant 0 : i32
    %c0_i32_0 = arith.constant 0 : i32
    %c0_i32_1 = arith.constant 0 : i32
    return %arg0, %c0_i32, %arg1, %c0_i32_0 : i32, i32, i32, i32
  }
  func.func @transform_14(%arg0: i32, %arg1: i32) -> (i32, i32, i32, i32) {
    %c0_i32 = arith.constant 0 : i32
    %c0_i32_0 = arith.constant 0 : i32
    %c0_i32_1 = arith.constant 0 : i32
    return %arg0, %c0_i32, %arg1, %c0_i32_0 : i32, i32, i32, i32
  }
  func.func @transform_15(%arg0: i32, %arg1: i32) -> (i32, i32, i32, i32) {
    %c0_i32 = arith.constant 0 : i32
    %c0_i32_0 = arith.constant 0 : i32
    %c0_i32_1 = arith.constant 0 : i32
    return %arg0, %c0_i32, %arg1, %c0_i32_0 : i32, i32, i32, i32
  }
  func.func @transform_16(%arg0: i32, %arg1: i32) -> (i32, i32, i32, i32) {
    %c0_i32 = arith.constant 0 : i32
    %c0_i32_0 = arith.constant 0 : i32
    %c0_i32_1 = arith.constant 0 : i32
    return %arg0, %c0_i32, %arg1, %c0_i32_0 : i32, i32, i32, i32
  }
  func.func @transform_17(%arg0: i32, %arg1: i32) -> (i32, i32, i32, i32) {
    %c0_i32 = arith.constant 0 : i32
    %c0_i32_0 = arith.constant 0 : i32
    %c0_i32_1 = arith.constant 0 : i32
    return %arg0, %arg1, %c0_i32, %c0_i32_0 : i32, i32, i32, i32
  }
}

</mosaic_0001>

<bundles_post_ra>
// kernel: tpu_custom_call.1
= control target key start
LH: loop header
LB: loop body
LE: loop exit
PB: predicated region body
PF: predicated region fallthrough
CT: control target
= control target key end

     0   :  { %s5408_s0 = inlined_call_operand.vmem [shape: f32[2,18], index: 0, kind: input, shape index: {}]   ;;  %s5409_s1 = inlined_call_operand.vmem [shape: f32[32,8], index: 1, kind: input, shape index: {}]   ;;  %s5410_s2 = inlined_call_operand.hbm [shape: f32[16,64], index: 2, kind: input, shape index: {}]   ;;  %s5411_s3 = inlined_call_operand.hbm [shape: f32[2,4,8,16], index: 3, kind: input, shape index: {}]   ;;  %s5412_s4 = inlined_call_operand.hbm [shape: f32[2,2,32,64], index: 4, kind: input, shape index: {}]   ;;  %s5413_s5 = inlined_call_operand.hbm [shape: f32[2,1,32,64], index: 5, kind: input, shape index: {}]   ;;  %s5414_s6 = inlined_call_operand.hbm [shape: f32[2,1,32,64], index: 6, kind: input, shape index: {}]   ;;  %s5415_s7 = inlined_call_operand.vmem [shape: bf16[2,1,32,64], index: 7, kind: input, shape index: {}]   ;;  %s5416_s8 = inlined_call_operand.hbm [shape: bf16[2,1,32,64], index: 8, kind: input, shape index: {}]   ;;  %s5417_s9 = inlined_call_operand.hbm [shape: bf16[2,1,32,64], index: 9, kind: input, shape index: {}]   ;;  %s5418_s10 = inlined_call_operand.hbm [shape: f32[2,1,32,64], index: 10, kind: output, shape index: {0}]   ;;  %s5419_s11 = inlined_call_operand.hbm [shape: f32[2,1,32,64], index: 11, kind: output, shape index: {1}]   ;;  %s5420_s12 = inlined_call_operand.hbm [shape: f32[2,1,32,64], index: 12, kind: output, shape index: {2}]   ;;  %s5421_s13 = inlined_call_operand.hbm [shape: f32[2,2,32,64], index: 13, kind: output, shape index: {3}]   ;;  %s5422_s14 = inlined_call_operand.hbm [shape: f32[2,1,32,64], index: 14, kind: output, shape index: {4}]   ;;  %s5423_s15 = inlined_call_operand.hbm [shape: f32[2,1,32,64], index: 15, kind: output, shape index: {5}]   ;;  %s5424_s16 = inlined_call_operand.hbm [shape: f32[2,1,32,64], index: 16, kind: output, shape index: {6}]   ;;  %s5425_s17 = inlined_call_operand.hbm [shape: f32[2,2,1,128], index: 17, kind: output, shape index: {7}]  }
   0x1   :  { %5480 = sst [smem:[#allocation62_spill]] %s5408_s0 }
   0x2   :  { %5481 = sst [smem:[#allocation63_spill]] %s5409_s1 }
   0x3   :  { %5482 = sst [smem:[#allocation64_spill]] %s5410_s2 }
   0x4   :  { %5483 = sst [smem:[#allocation65_spill]] %s5411_s3 }
   0x5   :  { %5484 = sst [smem:[#allocation66_spill]] %s5412_s4 }
   0x6   :  { %5485 = sst [smem:[#allocation67_spill]] %s5413_s5 }
   0x7   :  { %5486 = sst [smem:[#allocation68_spill]] %s5414_s6 }
   0x8   :  { %5487 = sst [smem:[#allocation69_spill]] %s5415_s7 }
   0x9   :  { %5488 = sst [smem:[#allocation70_spill]] %s5416_s8 }
   0xa   :  { %5489 = sst [smem:[#allocation71_spill]] %s5417_s9 }
   0xb   :  { %5490 = sst [smem:[#allocation72_spill]] %s5418_s10 }
   0xc   :  { %5491 = sst [smem:[#allocation73_spill]] %s5419_s11 }
   0xd   :  { %5492 = sst [smem:[#allocation74_spill]] %s5420_s12 }
   0xe   :  { %5493 = sst [smem:[#allocation75_spill]] %s5421_s13 }
   0xf   :  { %5494 = sst [smem:[#allocation76_spill]] %s5422_s14 }
  0x10   :  { %5495 = sst [smem:[#allocation77_spill]] %s5423_s15 }
  0x11   :  { %5496 = sst [smem:[#allocation78_spill]] %s5424_s16 }
  0x12   :  { %5497 = sst [smem:[#allocation79_spill]] %s5425_s17 }
  0x13   :  { %23 = vsyncpa [#allocation5], 0 }
  0x14   :  { %24 = vsyncpa [#allocation3], 0 }
  0x15   :  { %25 = vsyncpa [#allocation8], 0 }
  0x16   :  { %27 = vsyncpa [#allocation8 + $0x1], 0 }
  0x17   :  { %28 = vsyncpa [#allocation11], 0 }
  0x18   :  { %30 = vsyncpa [#allocation11 + $0x1], 0 }
  0x19   :  { %31 = vsyncpa [#allocation14], 0 }
  0x1a   :  { %33 = vsyncpa [#allocation14 + $0x1], 0 }
  0x1b   :  { %34 = vsyncpa [#allocation4], 0 }
  0x1c   :  { %36 = vsyncpa [#allocation4 + $0x1], 0 }
  0x1d   :  { %37 = vsyncpa [#allocation18], 0 }
  0x1e   :  { %39 = vsyncpa [#allocation18 + $0x1], 0 }
  0x1f   :  { %40 = vsyncpa [#allocation21], 0 }
  0x20   :  { %42 = vsyncpa [#allocation21 + $0x1], 0 }
  0x21   :  { %43 = vsyncpa [#allocation24], 0 }
  0x22   :  { %45 = vsyncpa [#allocation24 + $0x1], 0 }
  0x23   :  { %46 = vsyncpa [#allocation27], 0 }
  0x24   :  { %48 = vsyncpa [#allocation27 + $0x1], 0  ;;  %s3947_s24 = smov 0   ;;  %s3949_s25 = smov 0  }
  0x25   :  { %s3951_s26 = smov 0   ;;  %s3953_s27 = smov 0  }
  0x26   :  { %s3955_s28 = smov 0   ;;  %s3957_s29 = smov 0  }
  0x27   :  { %s3959_s0 = smov 0   ;;  %s3961_s30 = smov 0  }
  0x28   :  { %s3963_s18 = smov 0   ;;  %s3965_s19 = smov 0  }
  0x29   :  { %s3967_s1 = smov 0  }
  0x2a LB: > { %5498 = sst [smem:[#allocation44_spill]] %s3790_s24  ;;  %s4001_s20 = sadd.s32 4294967295, %s3830_s1   ;;  %s3830_s1 = sphi %s3967_s1, %s54_s1   ;;  %s3826_s19 = sphi %s3965_s19, %s5632_s19   ;;  %s3822_s18 = sphi %s3963_s18, %s5631_s18   ;;  %s3818_s30 = sphi %s3961_s30, %s5630_s30   ;;  %s3814_s0 = sphi %s3959_s0, %s5629_s0   ;;  %s3810_s29 = sphi %s3957_s29, %s5628_s29   ;;  %s3806_s28 = sphi %s3955_s28, %s5627_s28   ;;  %s3802_s27 = sphi %s3953_s27, %s5626_s27   ;;  %s3798_s26 = sphi %s3951_s26, %s5625_s26   ;;  %s3794_s25 = sphi %s3949_s25, %s5624_s25   ;;  %s3790_s24 = sphi %s3947_s24, %s5623_s24  }
  0x2b   : > { %5499 = sst [smem:[#allocation45_spill]] %s3794_s25  ;;  %s63_s22 = sadd.s32 1, %s3822_s18 }
  0x2c   : > { %5500 = sst [smem:[#allocation46_spill]] %s3798_s26  ;;  %s66_s23 = sadd.s32 1, %s3826_s19 }
  0x2d   : > { %5501 = sst [smem:[#allocation47_spill]] %s3806_s28  ;;  %p64_p0 = scmp.ge.s32.totalorder %s63_s22, 2 }
  0x2e   : > { %5502 = sst [smem:[#allocation48_spill]] %s3810_s29  ;;  %s141_s17 = sadd.s32 1, %s3810_s29 }
  0x2f   : > { %5503 = sst [smem:[#allocation49_spill]] %s3814_s0  ;;  %p148_p1 = scmp.ne.s32.totalorder %s3810_s29, %s3806_s28 }
  0x30   : > { %5504 = sst [smem:[#allocation50_spill]] %s3818_s30  ;;  %p149_p2 = scmp.eq.s32.totalorder %s3830_s1, 0 }
  0x31   : > { %5505 = sst [smem:[#allocation51_spill]] %s3822_s18  ;;  %s5634_s22 = smov (%p64_p0, %s63_s22), 0 }
  0x32   : > { %5506 = sst [smem:[#allocation52_spill]] %s3826_s19  ;;  %s5636_s23 = smov (!%p64_p0, %s66_s23), %s3826_s19 }
  0x33   : > { %5507 = sst [smem:[#allocation53_spill]] %s3830_s1  ;;  %p4015_p3 = por %p149_p2, %p148_p1 }
  0x34   : > { %5508 = sst [smem:[#allocation54_spill]] %s5634_s22  ;;  %p154_p4 = scmp.ne.s32.totalorder %s3806_s28, %s3802_s27 }
  0x35   : > { %p68_p5 = scmp.ge.s32.totalorder %s5636_s23, 2  ;;  %p155_p6 = scmp.eq.s32.totalorder %s4001_s20, 0 }
  0x36   : > { %s165_s16 = ssub.s32 %s3822_s18, %s5634_s22  ;;  %s169_s14 = sadd.s32 1, %s3798_s26 }
  0x37   : > { %s5638_s23 = smov (%p68_p5, %s5636_s23), 0  ;;  %p4028_p7 = por %p155_p6, %p154_p4 }
  0x38   : > { %5510 = sst [smem:[#allocation55_spill]] %s5638_s23  ;;  %p176_p8 = scmp.ne.s32.totalorder %s3798_s26, %s3794_s25 }
  0x39   : > { %s138_s27 = ssub.s32 %s3826_s19, %s5638_s23  ;;  %p182_p9 = scmp.ne.s32.totalorder %s3794_s25, %s3790_s24 }
  0x3a   : > { %p139_p10 = scmp.eq.s32.totalorder %s138_s27, 0  ;;  %s166_s22 = sor.u32 %s165_s16, %s138_s27 }
  0x3b   : > { %p167_p11 = scmp.eq.s32.totalorder %s166_s22, 0  ;;  %p4043_p12 = por %p176_p8, %p149_p2 }
  0x3c   : > { %s4048_s10 = scalar_select %p139_p10, %s3810_s29, %s141_s17  }
  0x3d   : > { %s4051_s11 = scalar_select %p167_p11, %s3798_s26, %s169_s14  }
  0x3e   : > { %5513 = sst [smem:[#allocation56_spill]] %s4048_s10  ;;  %p4058_p13 = por %p182_p9, %p155_p6 }
  0x3f   : > { %5514 = sst [smem:[#allocation57_spill]] %s4051_s11  ;;  %p348_p0 = scmp.eq.s32.totalorder %s4001_s20, 3 }
  0x40   : > { %s5515_s12 = scalar_select %p4058_p13, 1, 0 }
  0x41   : > { %s5517_s16 = sadd.s32 4294967294, %s3830_s1   ;;  %p2891_p4 = scmp.ge.s32.totalorder %s3830_s1, 1 }
  0x42   : > { %5516 = sst [smem:[#allocation58_spill]] %s5515_s12  ;;  %p354_p1 = scmp.eq.s32.totalorder %s5517_s16, 3 }
  0x43   : > { %p4069_p2 = por %p348_p0, %p176_p8  ;;  %p557_p5 = scmp.lt.s32.totalorder %s3830_s1, 5 }
  0x44   : > { %p4077_p10 = por %p354_p1, %p182_p9  ;;  %s5523_s10 = sld [smem:[#allocation62_spill]] }
  0x45   : > { %s5518_s22 = scalar_select %p4069_p2, 1, 0 }
  0x46   : > { %s5520_s14 = scalar_select %p4077_p10, 1, 0 }
  0x47   : > { %5519 = sst [smem:[#allocation59_spill]] %s5518_s22  ;;  %p4081_p11 = pnand %p2891_p4, %p557_p5 }
  0x48   : > { %5521 = sst [smem:[#allocation60_spill]] %s5520_s14  ;;  %s3832_s14 = smov [#allocation6]  }
  0x49   : > { %p3125_p8 = pneg %p4081_p11  ;;  %s5524_s2 = sld [smem:[#allocation64_spill]] }
  0x4a   : > { %s569_s16 = sshll.u32 %s5523_s10, 4  ;;  %s580_s7 = sshll.u32 %s3832_s14, 4  ;;  %s570_s16 = int_to_ptr.vmem [resolvable:$true] %s569_s16  ;;  %s581_s7 = int_to_ptr.vmem [resolvable:$true] %s580_s7 }
  0x4b   : > { %p3126_p9 = pnand %p3125_p8, %p155_p6  ;;  %s3833_s30 = smov [#allocation2]  }
  0x4c   : > { %s3834_s0 = smov 128   ;;  %s3835_s12 = smov 8  }
  0x4d   : > { %3128 = dma.vmem_to_smem (!%p3126_p9), %s570_s16, 32, %s3833_s30, [#allocation5]  }
  0x4e   : > { %p2894_p0 = scmp.ge.s32.totalorder %s3830_s1, 4 }
  0x4f   : > { %s578_s24 = sshll.u32 %s5524_s2, 4  ;;  %s4097_s10 = sand.u32 (!%p2894_p0), 1, %s3830_s1   ;;  %s579_s24 = int_to_ptr.hbm [resolvable:$true] %s578_s24 }
  0x50   : > { %3131 = dma.hbm_to_vmem [thread:$0]  (!%p3126_p9), %s579_s24, 256, %s581_s7, [#allocation3], %s3834_s0, %s3834_s0, %s3835_s12  }
  0x51   : > { %590 = sbr.rel (%p2894_p0) target bundleno = 129 (0x81), region = 24  ;;  %s605_s11 = sand.u32 (!%p2894_p0), 1, %s3810_s29  }
  0x52   : > { %s2895_s23 = sshll.u32 (!%p2894_p0), %s605_s11, 5  ;;  %s3021_s22 = sshll.u32 (!%p2894_p0), %s3826_s19, 5 }
  0x53   : > { %s5525_s3 = sld [smem:[#allocation65_spill]] (!%p2894_p0)  ;;  %s607_s16 = scalar_lea.vmem (!%p2894_p0), [#allocation7], %s2895_s23 }
  0x54   : > { %s615_s7 = sshll.u32 (!%p2894_p0), %s607_s16, 4  ;;  %s5447_s24 = scalar_lea.sflag (!%p2894_p0), [#allocation8], %s4097_s10  ;;  %s616_s7 = int_to_ptr.vmem [resolvable:$true] %s615_s7 }
  0x55   : > { %s5443_s0 = smov (!%p2894_p0), 128   ;;  %s5445_s2 = smov (!%p2894_p0), 8  }
  0x59   : > { %s612_s30 = scalar_lea.hbm %s5525_s3, %s3021_s22 }
  0x5a   : > { %s613_s12 = sshll.u32 %s612_s30, 4  ;;  %s614_s12 = int_to_ptr.hbm [resolvable:$true] %s613_s12 }
  0x5b   : > { %3080 = dma.hbm_to_vmem [thread:$0]  (%p4015_p3), %s614_s12, 512, %s616_s7, %s5447_s24, %s5443_s0, %s5443_s0, %s5445_s2  }
  0x5c   : > { %s4113_s11 = sand.u32 1, %s3798_s26   ;;  %s2899_s23 = sshll.u32 %s3822_s18, 1 }
  0x5d   : > { %s2898_s22 = sshll.u32 %s4113_s11, 5  ;;  %s2900_s14 = sshll.u32 %s3826_s19, 3 }
  0x5e   : > { %s634_s21 = sadd.s32 %s2900_s14, %s2899_s23  ;;  %s629_s30 = scalar_lea.vmem [#allocation9], %s2898_s22 }
  0x5f   : > { %s2901_s27 = sshll.u32 %s634_s21, 3  ;;  %s651_s16 = sshll.u32 %s629_s30, 4  ;;  %s652_s16 = int_to_ptr.vmem [resolvable:$true] %s651_s16 }
  0x60   : > { %s5526_s4 = sld [smem:[#allocation66_spill]]  ;;  %s3838_s29 = smov 512  }
  0x61   : > { %s3081_s2 = scalar_select %p4043_p12, [#allocation0], [#allocation32] }
  0x62   : > { %3082 = sst [smem:[#allocation29]] (%p4043_p12), %s3838_s29  ;;  %s3839_s14 = smov 256  }
  0x63   : > { %s641_s3 = sld [smem:[%s3081_s2]]   ;;  %s3840_s22 = smov 2  }
  0x64   : > { %3083 = sst [smem:[#allocation29 + $0x1]] (%p4043_p12), %s3839_s14  ;;  %s3841_s21 = smov 128  }
  0x65   : > { %3084 = sst [smem:[#allocation29 + $0x2]] (%p4043_p12), %s3840_s22  ;;  %s3843_s30 = smov [#allocation28]  }
  0x66   : > { %s636_s0 = scalar_lea.hbm %s5526_s4, %s2901_s27  ;;  %3085 = sst [smem:[#allocation29 + $0x3]] (%p4043_p12), %s3841_s21 }
  0x67   : > { %s649_s24 = sshll.u32 %s636_s0, 4  ;;  %3086 = sst [smem:[#allocation29 + $0x4]] (%p4043_p12), %s3841_s21  ;;  %s650_s24 = int_to_ptr.hbm [resolvable:$true] %s649_s24 }
  0x68   : > { %s3842_s0 = smov 8   ;;  %s5527_s7 = scalar_lea.sflag [#allocation8], %s4097_s10 }
  0x69   : > { %s2902_s27 = sshll.u32 %s641_s3, 26  ;;  %3087 = sst [smem:[#allocation29 + $0x5]] (%p4043_p12), %s3842_s0 }
  0x6a   : > { %s2903_s2 = sadd.s32 134217728, %s2902_s27  ;;  %s5449_s29 = sshll.u32 %s4113_s11, 4 }
  0x6b   : > { %3088 = dma.general (%p4043_p12), %s650_s24, 512, %s652_s16, %s5527_s7, %s3843_s30, [#allocation29], %s2903_s2, 0  }
  0x6c   : > { %s2906_s12 = sshll.u32 %s3826_s19, 2  ;;  %s678_s3 = scalar_lea.vmem [#allocation10], %s5449_s29 }
  0x6d   : > { %s4145_s14 = sadd.s32 %s2906_s12, %s2899_s23  ;;  %s688_s22 = sshll.u32 %s678_s3, 4  ;;  %s689_s22 = int_to_ptr.vmem [resolvable:$true] %s688_s22 }
  0x6e   : > { %s2907_s21 = sshll.u32 %s4145_s14, 3  ;;  %s5528_s5 = sld [smem:[#allocation67_spill]] }
  0x6f   : > { %s2915_s0 = sshll.u32 %s4145_s14, 2  ;;  %s5529_s9 = sld [smem:[#allocation71_spill]] }
  0x70   : > { %s675_s12 = scalar_lea.sflag [#allocation11], %s4097_s10  ;;  %s5530_s29 = smov 8  }
  0x71   : > { %s5531_s3 = smov 128   ;;  %s2912_s24 = sshll.u32 %s4113_s11, 3 }
  0x72   : > { %s5532_s8 = sld [smem:[#allocation70_spill]]  ;;  %s739_s30 = scalar_lea.vmem [#allocation13], %s2912_s24 }
  0x73   : > { %s749_s7 = sshll.u32 %s739_s30, 4  ;;  %s3845_s19 = smov 4   ;;  %s750_s7 = int_to_ptr.vmem [resolvable:$true] %s749_s7 }
  0x74   : > { %s685_s27 = scalar_lea.hbm %s5528_s5, %s2907_s21  ;;  %s5533_s6 = sld [smem:[#allocation68_spill]] }
  0x75   : > { %s686_s2 = sshll.u32 %s685_s27, 4  ;;  %s770_s4 = scalar_lea.hbm %s5529_s9, %s2915_s0  ;;  %s687_s2 = int_to_ptr.hbm [resolvable:$true] %s686_s2 }
  0x76   : > { %s771_s23 = sshll.u32 %s770_s4, 4  ;;  %s736_s4 = scalar_lea.sflag [#allocation14], %s4097_s10  ;;  %s772_s23 = int_to_ptr.hbm [resolvable:$true] %s771_s23 }
  0x77   : > { %3089 = dma.hbm_to_vmem [thread:$0]  (%p4043_p12), %s687_s2, 256, %s689_s22, %s675_s12, %s5531_s3, %s5531_s3, %s5530_s29  }
  0x78   : > { %s746_s14 = scalar_lea.hbm %s5532_s8, %s2915_s0  ;;  %s3844_s9 = smov 64  }
  0x79   : > { %s747_s27 = sshll.u32 %s746_s14, 4  ;;  %s763_s22 = scalar_lea.vmem [#allocation15], %s2912_s24  ;;  %s748_s27 = int_to_ptr.hbm [resolvable:$true] %s747_s27 }
  0x7a   : > { %3091 = dma.hbm_to_vmem [thread:$0]  (%p4043_p12), %s748_s27, 128, %s750_s7, %s736_s4, %s3844_s9, %s3844_s9, %s3845_s19  }
  0x7b   : > { %s773_s2 = sshll.u32 %s763_s22, 4  ;;  %s709_s1 = scalar_lea.hbm %s5533_s6, %s2907_s21  ;;  %s774_s2 = int_to_ptr.vmem [resolvable:$true] %s773_s2 }
  0x7c   : > { %s5534_s5 = sshll.u32 %s4113_s11, 4  ;;  %s710_s14 = sshll.u32 %s709_s1, 4  ;;  %s711_s14 = int_to_ptr.hbm [resolvable:$true] %s710_s14 }
  0x7d   : > { %s702_s0 = scalar_lea.vmem [#allocation12], %s5534_s5 }
  0x7e   : > { %s712_s16 = sshll.u32 %s702_s0, 4  ;;  %s713_s16 = int_to_ptr.vmem [resolvable:$true] %s712_s16 }
  0x7f   : > { %3090 = dma.hbm_to_vmem [thread:$0]  (%p4043_p12), %s711_s14, 256, %s713_s16, %s675_s12, %s5531_s3, %s5531_s3, %s5530_s29  }
  0x80   : > { %3092 = dma.hbm_to_vmem [thread:$0]  (%p4043_p12), %s772_s23, 128, %s774_s2, %s736_s4, %s3844_s9, %s3844_s9, %s3845_s19  }
  0x81 PF: > { %785 = sbr.rel (%p4081_p11) target bundleno = 950 (0x3b6), region = 60 }
  0x86   : > { %3745 = dma.done.wait (%p155_p6), [#allocation5], 32  }
  0x87   : > { %3747 = vsyncadd (%p155_p6), [#allocation5], 4294967264 }
  0x88   : > { %3749 = dma.done.wait (%p155_p6), [#allocation3], 256  }
  0x89   : > { %3751 = vsyncadd (%p155_p6), [#allocation3], 4294967040  ;;  %s4193_s9 = sand.u32 1, %s4001_s20   ;;  %s799_s13 = sand.u32 1, %s3806_s28  }
  0x8a   : > { %s2923_s26 = sshll.u32 %s799_s13, 5  ;;  %s798_s18 = scalar_lea.sflag [#allocation8], %s4193_s9 }
  0x8b   : > { %s4197_s19 = scalar_lea.vmem [#allocation7], %s2923_s26 }
  0x8c   : > { %3753 = dma.done.wait (%p4028_p7), %s798_s18, 512  }
  0x8d   : > { %3755 = vsyncadd (%p4028_p7), %s798_s18, 4294966784  ;;  %s4204_s17 = sand.u32 1, %s3794_s25  }
  0x8e   : > { %s2924_s10 = sshll.u32 %s4204_s17, 5 }
  0x8f   : > { %s4209_s20 = scalar_lea.vmem [#allocation9], %s2924_s10 }
  0x90   : > { %3757 = dma.done.wait (%p4058_p13), %s798_s18, 512  }
  0x91   : > { %3759 = vsyncadd (%p4058_p13), %s798_s18, 4294966784  ;;  %s4216_s15 = sshll.u32 %s4204_s17, 4  ;;  %s818_s11 = scalar_lea.sflag [#allocation11], %s4193_s9 }
  0x92   : > { %s821_s29 = scalar_lea.vmem [#allocation10], %s4216_s15 }
  0x93   : > { %3761 = dma.done.wait (%p4058_p13), %s818_s11, 512  }
  0x94   : > { %3763 = vsyncadd (%p4058_p13), %s818_s11, 4294966784  ;;  %s2927_s21 = sshll.u32 %s4204_s17, 3  ;;  %s4226_s23 = scalar_lea.vmem [#allocation12], %s4216_s15 }
  0x95   : > { %s838_s12 = scalar_lea.sflag [#allocation14], %s4193_s9  ;;  %s4229_s3 = scalar_lea.vmem [#allocation13], %s2927_s21 }
  0x96   : > { %3765 = dma.done.wait (%p4058_p13), %s838_s12, 256  }
  0x97   : > { %3767 = vsyncadd (%p4058_p13), %s838_s12, 4294967040  ;;  %s4235_s24 = scalar_lea.vmem [#allocation15], %s2927_s21 }
  0x98   : > { %857 = sfence }
  0x99   : > { %s5536_s27 = sld [smem:[#allocation49_spill]]  ;;  %v1062_v0 = vld [vmem:[%s4197_s19] sm:$0xff]  ;;  %v2946_v1 = vld [vmem:[%s4197_s19 + $0x8] sm:$0xff]  ;;  %v2951_v2 = vld [vmem:[%s4197_s19 + $0x10] sm:$0xff]  ;;  %vm1063_vm0 = vcmask 64512   ;;  %vm1093_vm1 = vcmask 130048  }
  0x9a   : > { %1085 = vmatpush.msra.mxu0 %v1062_v0  ;;  %1140 = vmatpush.msra.mxu2 %v2946_v1  ;;  %v1061_v3 = vld [vmem:[#allocation6 + $0x8] sm:$0xff]  ;;  %s5537_s5 = sld [smem:[#allocation63_spill]]  ;;  %v1060_v6 = vld [vmem:[#allocation6] sm:$0xff]  ;;  %v3027_v25 = vld [vmem:[%s4229_s3] sm:$0xff]   ;;  %v5539_v28 = vmov 0  ;;  %v5541_v29 = vmov 0 }
  0x9b   : > { %1114 = vmatpush.msra.mxu1 %v1061_v3  ;;  %1168 = vmatpush.msra.mxu3 %v1061_v3  ;;  %s5538_s16 = sld [smem:[#allocation50_spill]]  ;;  %v2956_v7 = vld [vmem:[%s4197_s19 + $0x18] sm:$0xff]  ;;  %v3028_v26 = vunpack.c.l.bf16 %v3027_v25  ;;  %v3029_v27 = vunpack.c.h.bf16 %v3027_v25  ;;  %vm5461_vm8 = vcmask 523264   ;;  %v5457_v30 = vmov 0.0   ;;  %v1290_v36 = vld [vmem:[%s821_s29] sm:$0xff]  ;;  %s4308_s18 = scalar_lea.vmem [#allocation17], %s4216_s15 }
  0x9c   : > { %1194 = vmatpush.msrb.mxu0 %v2951_v2  ;;  %1222 = vmatpush.msrb.mxu2 %v1061_v3  ;;  %vm1365_vm9 = vcmp.gt.f32.partialorder %v1290_v36, 0.0  ;;  %v3847_v37 = vmov 1.0   ;;  %v1291_v39 = vld [vmem:[%s821_s29 + $0x8] sm:$0xff]  ;;  %v1448_v46 = vmul.f32 0.05, %v1290_v36  ;;  %v1292_v49 = vld [vmem:[%s4226_s23] sm:$0xff] }
  0x9d   : > { %1115 = vmatpush.msra.mxu1 %v1060_v6  ;;  %1169 = vmatpush.msra.mxu3 %v1060_v6  ;;  %vm4281_vm6 = vcmp.eq.f32.partialorder %v3028_v26, 1.0  ;;  %vm4285_vm7 = vcmp.eq.f32.partialorder %v3029_v27, 1.0  ;;  %v1367_v38 = vsel %vm1365_vm9, 0.0, %v3847_v37  ;;  %vm1366_vm10 = vcmp.gt.f32.partialorder %v1291_v39, 0.0  ;;  %v3031_v44 = vld [vmem:[%s4235_s24] sm:$0xff]   ;;  %s4370_s1 = scalar_lea.vmem [#allocation16], %s4216_s15 }
  0x9e   : > { %1223 = vmatpush.msrb.mxu2 %v1060_v6  ;;  %v5540_v28 = vsel %vm4281_vm6, 4294967295, %v5539_v28  ;;  %v5542_v29 = vsel %vm4285_vm7, 4294967295, %v5541_v29  ;;  %v2963_v31 = vsel %vm4281_vm6, 1.0, %v5457_v30  ;;  %v2964_v32 = vsel %vm4285_vm7, 1.0, %v5457_v30  ;;  %v1293_v50 = vld [vmem:[%s4226_s23 + $0x8] sm:$0xff]  ;;  %s4452_s11 = scalar_lea.vmem [#allocation19], %s4216_s15 }
  0x9f   : > { %s4239_s30 = sshll.u32 %s5536_s27, 1  ;;  %1276 = vmatpush.msrb.mxu3 %v1061_v3  ;;  %1248 = vmatpush.msrb.mxu1 %v2956_v7  ;;  %v1915_v33 = vsel %vm5461_vm8, %v2963_v31, 0.0  ;;  %v1916_v34 = vsel %vm5461_vm8, %v2964_v32, 0.0  ;;  %v4301_v40 = vadd.f32 %v1367_v38, %v1290_v36  ;;  %v1368_v41 = vsel %vm1366_vm10, 0.0, %v3847_v37  ;;  %s2969_s24 = sshll.u32 %s5536_s27, 4 }
  0xa0   : > { %p978_p3 = scmp.lt.s32.totalorder %s4239_s30, 3  ;;  %v1917_v35 = vadd.f32 %v1916_v34, %v1915_v33  ;;  %v4304_v42 = vadd.f32 %v1368_v41, %v1291_v39  ;;  %v3032_v51 = vunpack.c.l.bf16 %v3031_v44  ;;  %v3033_v52 = vunpack.c.h.bf16 %v3031_v44 }
  0xa1   : > { %1277 = vmatpush.msrb.mxu3 %v1060_v6  ;;  %s4259_s14 = sshll.u32 %s5538_s16, 7  ;;  %vm1404_vm12 = vcmp.gt.f32.partialorder %v1292_v49, 0.0  ;;  %vm1405_vm13 = vcmp.gt.f32.partialorder %v1293_v50, 0.0  ;;  %v5545_v58 = vmov 0  ;;  %v1380_v33 = vand.u32 2147483647, %v4301_v40 }
  0xa2   : > { %s4245_s7 = scalar_select %p978_p3, %s4239_s30, 3  ;;  %1918 = vadd.xlane.f32.xlu1 %v1917_v35  ;;  %v1406_v55 = vsel %vm1404_vm12, 0.0, %v3847_v37  ;;  %v1407_v56 = vsel %vm1405_vm13, 0.0, %v3847_v37  ;;  %vm4319_vm14 = vcmp.eq.f32.partialorder %v3032_v51, 1.0  ;;  %vm4323_vm15 = vcmp.eq.f32.partialorder %v3033_v52, 1.0 }
  0xa3   : > { %s4262_s13 = sld [smem:[#allocation2 + %s4259_s14]]  ;;  %v5546_v58 = vsel %vm4323_vm15, 4294967295, %v5545_v58  ;;  %v4330_v60 = vadd.f32 %v1406_v55, %v1292_v49  ;;  %v4332_v61 = vadd.f32 %v1407_v56, %v1293_v50  ;;  %v2965_v0 = vsel %vm4319_vm14, 1.0, %v5457_v30  ;;  %s1023_s29 = sadd.s32 9, %s4259_s14 }
  0xa4   : > { %s2937_s4 = sshll.u32 %s4245_s7, 3  ;;  %v2966_v1 = vsel %vm4323_vm15, 1.0, %v5457_v30  ;;  %v2065_v6 = vsel %vm5461_vm8, %v2965_v0, 0.0  ;;  %vm1376_vm12 = vweird.f32 %v4301_v40  ;;  %v1382_v34 = vand.u32 2147483648, %v4301_v40  ;;  %s1025_s21 = sadd.s32 10, %s4259_s14 }
  0xa5   : > { %s981_s0 = scalar_lea.vmem %s5537_s5, %s2937_s4  ;;  %v1394_v56 = vand.u32 2147483647, %v4304_v42  ;;  %s1024_s12 = sld [smem:[#allocation2 + %s1023_s29]] }
  0xa6   : > { %v1058_v4 = vld [vmem:[%s981_s0] sm:$0xff]  ;;  %v1059_v5 = vld [vmem:[%s981_s0 + $0x8] sm:$0xff]  ;;  %v1383_v51 = vor.u32 1.1754944e-38, %v1382_v34  ;;  %s1029_s3 = sadd.s32 12, %s4259_s14  ;;  %s1031_s4 = sadd.s32 13, %s4259_s14 }
  0xa7   : > { %2942 = vmatmul.msk.f32.vlgmr.msra.gmra.mxu0 %vm1063_vm0, %v1058_v4  ;;  %2947 = vmatmul.msk.f32.vlgmr.msra.gmra.mxu2 %vm1063_vm0, %v1058_v4  ;;  %s4543_s22 = sld [smem:[#allocation2 + %s1025_s21]]  ;;  %s1027_s0 = sadd.s32 11, %s4259_s14 }
  0xa8   : > { %s1030_s2 = sld [smem:[#allocation2 + %s1029_s3]]  ;;  %s1035_s29 = sadd.s32 15, %s4259_s14 }
  0xa9   : > { %s1041_s26 = smul.f32 0.54, %s4262_s13  ;;  %s4545_s5 = sld [smem:[#allocation2 + %s1031_s4]] }
  0xaa   : > { %s1037_s3 = sadd.s32 16, %s4259_s14  ;;  %s1011_s4 = sadd.s32 3, %s4259_s14 }
  0xab   : > { %v4265_v8 = vstv %s1041_s26  ;;  %s1033_s26 = sadd.s32 14, %s4259_s14  ;;  %p987_p6 = scmp.lt.s32.totalorder %s5538_s16, 1 }
  0xac   : > { %3275 = vrcp.f32 %v4265_v8  ;;  %v1054_v12 = vand.u32 2147483648, %v4265_v8  ;;  %vm1048_vm2 = vweird.f32 %v4265_v8  ;;  %v1052_v14 = vand.u32 2147483647, %v4265_v8  ;;  %s4561_s21 = sld [smem:[#allocation2 + %s1033_s26]] }
  0xad   : > { %3277 = vrcp.f32 %v4301_v40 }
  0xae   : > { %v1055_v17 = vor.u32 1.1754944e-38, %v1054_v12  ;;  %vm1053_vm5 = vcmp.eq.f32.partialorder %v1052_v14, 8.507059e+37  ;;  %3279 = vrcp.f32 %v4304_v42  ;;  %v1449_v12 = vmul.f32 0.05, %v1291_v39 }
  0xaf   : > { %2943 = vmatmul.msk.f32.gmra.mxu0 %vm1063_vm0, %v1059_v5  ;;  %2948 = vmatmul.msk.f32.gmra.mxu2 %vm1063_vm0, %v1059_v5 }
  0xb2   : > { %v3276_v9 = vpop.eup %3275 }
  0xb3   : > { %v1044_v11 = vmul.f32 %v3276_v9, %v4265_v8  ;;  %vm1049_vm3 = vweird.f32 %v3276_v9  ;;  %v4312_v47 = vpop.eup %3277 }
  0xb4   : > { %vm1050_vm4 = vmor %vm1048_vm2, %vm1049_vm3  ;;  %v1372_v59 = vmul.f32 %v4312_v47, %v4301_v40  ;;  %v4346_v2 = vpop.eup %3279  ;;  %vm1377_vm13 = vweird.f32 %v4312_v47 }
  0xb5   : > { %v1045_v13 = vsub.f32 1.0, %v1044_v11 }
  0xb7   : > { %2952 = vmatmul.msk.f32.vlgmr.msrb.gmra.mxu0 %vm1063_vm0, %v1058_v4  ;;  %v1046_v15 = vmul.f32 %v3276_v9, %v1045_v13  ;;  %v2066_v13 = vsel %vm5461_vm8, %v2966_v1, 0.0 }
  0xb9   : > { %v1047_v18 = vadd.f32 %v3276_v9, %v1046_v15 }
  0xbb   : > { %v1051_v20 = vsel %vm1050_vm4, %v3276_v9, %v1047_v18  ;;  %v1386_v18 = vmul.f32 %v4346_v2, %v4304_v42 }
  0xbc   : > { %v1056_v21 = vsel %vm1053_vm5, %v1055_v17, %v1051_v20  ;;  %v2067_v17 = vadd.f32 %v2066_v13, %v2065_v6 }
  0xbd   : > { %3034 = vpush %v1056_v21 }
  0xbe   : > { %2068 = vadd.xlane.f32.xlu0 %v2067_v17 }
  0xbf   : > { %2953 = vmatmul.msk.f32.gmra.mxu0 %vm1063_vm0, %v1059_v5 }
  0xee   : > { %s3035_s19 = spop %3034 }
  0xef   : > { %v4338_v63 = vstv %s3035_s19  ;;  %s4552_s19 = sld [smem:[#allocation2 + %s1027_s0]]  ;;  %s1039_s0 = sadd.s32 17, %s4259_s14 }
 0x124   : > { %v1087_v10 = vpop.f32.mrf.mxu0 }
 0x125   : > { %2944 = vmatmul.msk.f32.vlgmr.msra.gmra.mxu1 %vm1093_vm1, %v1087_v10  ;;  %v1373_v10 = vsub.f32 1.0, %v1372_v59 }
 0x127   : > { %v1374_v20 = vmul.f32 %v4312_v47, %v1373_v10 }
 0x129   : > { %v1375_v32 = vadd.f32 %v4312_v47, %v1374_v20 }
 0x12a   : > { %v1142_v16 = vpop.f32.mrf.mxu2 }
 0x12b   : > { %2949 = vmatmul.msk.f32.vlgmr.msra.gmra.mxu3 %vm1093_vm1, %v1142_v16 }
 0x12c   : > { %v1090_v19 = vpop.f32.mrf.mxu0 }
 0x12d   : > { %2945 = vmatmul.msk.f32.gmra.mxu1 %vm1093_vm1, %v1090_v19 }
 0x132   : > { %v1145_v22 = vpop.f32.mrf.mxu2 }
 0x133   : > { %2950 = vmatmul.msk.f32.gmra.mxu3 %vm1093_vm1, %v1145_v22 }
 0x134   : > { %v1196_v23 = vpop.f32.mrf.mxu0 }
 0x135   : > { %2957 = vmatmul.msk.f32.vlgmr.msrb.gmra.mxu1 %vm1063_vm0, %v1058_v4  ;;  %2954 = vmatmul.msk.f32.vlgmr.msrb.gmra.mxu2 %vm1093_vm1, %v1196_v23  ;;  %v4354_v4 = vmul.f32 %v4330_v60, %v4338_v63  ;;  %v5549_v23 = vmov 0 }
 0x13c   : > { %v1199_v24 = vpop.f32.mrf.mxu0 }
 0x13d   : > { %2958 = vmatmul.msk.f32.gmra.mxu1 %vm1063_vm0, %v1059_v5  ;;  %2955 = vmatmul.msk.f32.gmra.mxu2 %vm1093_vm1, %v1199_v24  ;;  %v4358_v5 = vmul.f32 %v4332_v61, %v4338_v63  ;;  %v1387_v24 = vsub.f32 1.0, %v1386_v18 }
 0x13f   : > { %v1388_v44 = vmul.f32 %v4346_v2, %v1387_v24 }
 0x141   : > { %v1389_v55 = vadd.f32 %v4346_v2, %v1388_v44 }
 0x1a2   : > { %v1117_v43 = vpop.f32.mrf.mxu1 }
 0x1a3   : > { %vm1324_vm11 = vcmp.gt.f32.partialorder %v1117_v43, 0.0  ;;  %v1442_v45 = vsub.f32 %v1117_v43, %v1290_v36  ;;  %1734 = vst.msk [vmem:[%s4308_s18] sm:$0xff] %vm5461_vm8, %v1117_v43 }
 0x1a4   : > { %v1326_v48 = vsel %vm1324_vm11, 0.0, %v3847_v37 }
 0x1a5   : > { %v4317_v53 = vadd.f32 %v1326_v48, %v1117_v43  ;;  %v1444_v54 = vand.u32 2147483647, %v1442_v45 }
 0x1a7   : > { %3281 = vrcp.f32 %v4317_v53  ;;  %vm1446_vm0 = vcmp.gt.f32.partialorder %v1444_v54, 3.0  ;;  %vm1450_vm2 = vcmp.gt.f32.partialorder %v1444_v54, %v1448_v46  ;;  %v1341_v22 = vand.u32 2147483648, %v4317_v53 }
 0x1a8   : > { %vm4334_vm3 = vmand %vm1446_vm0, %vm1450_vm2  ;;  %v1339_v26 = vand.u32 2147483647, %v4317_v53 }
 0x1a9   : > { %vm5456_vm4 = vmand %vm4334_vm3, %vm4281_vm6  ;;  %v1342_v41 = vor.u32 1.1754944e-38, %v1341_v22 }
 0x1aa   : > { %v1120_v3 = vpop.f32.mrf.mxu1  ;;  %v2967_v9 = vsel %vm5456_vm4, 1.0, %v5457_v30 }
 0x1ab   : > { %vm1325_vm5 = vcmp.gt.f32.partialorder %v1120_v3, 0.0  ;;  %v1443_v7 = vsub.f32 %v1120_v3, %v1291_v39  ;;  %1735 = vst.msk [vmem:[%s4308_s18 + $0x8] sm:$0xff] %vm5461_vm8, %v1120_v3  ;;  %v2077_v36 = vsel %vm5461_vm8, %v2967_v9, 0.0 }
 0x1ac   : > { %v1327_v11 = vsel %vm1325_vm5, 0.0, %v3847_v37  ;;  %1732 = vst.msk [vmem:[%s4370_s1] sm:$0xff] %vm5461_vm8, %v2967_v9  ;;  %vm1335_vm5 = vweird.f32 %v4317_v53 }
 0x1ad   : > { %v3282_v14 = vpop.eup %3281  ;;  %v4375_v15 = vadd.f32 %v1327_v11, %v1120_v3  ;;  %v1445_v16 = vand.u32 2147483647, %v1443_v7 }
 0x1ae   : > { %v1331_v19 = vmul.f32 %v3282_v14, %v4317_v53  ;;  %vm1336_vm0 = vweird.f32 %v3282_v14 }
 0x1af   : > { %3283 = vrcp.f32 %v4375_v15  ;;  %vm1447_vm9 = vcmp.gt.f32.partialorder %v1445_v16, 3.0  ;;  %vm1451_vm10 = vcmp.gt.f32.partialorder %v1445_v16, %v1449_v12  ;;  %v1355_v54 = vand.u32 2147483648, %v4375_v15 }
 0x1b0   : > { %v1332_v21 = vsub.f32 1.0, %v1331_v19  ;;  %vm4383_vm11 = vmand %vm1447_vm9, %vm1451_vm10  ;;  %v1353_v1 = vand.u32 2147483647, %v4375_v15 }
 0x1b1   : > { %v5550_v23 = vsel %vm4383_vm11, 4294967295, %v5549_v23  ;;  %vm5455_vm2 = vmand %vm4383_vm11, %vm4285_vm7  ;;  %v1356_v11 = vor.u32 1.1754944e-38, %v1355_v54 }
 0x1b2   : > { %v1333_v25 = vmul.f32 %v3282_v14, %v1332_v21  ;;  %v1250_v27 = vpop.f32.mrf.mxu1  ;;  %v2968_v31 = vsel %vm5455_vm2, 1.0, %v5457_v30  ;;  %vm4413_vm9 = vmor %vm1376_vm12, %vm1377_vm13  ;;  %vm1340_vm2 = vcmp.eq.f32.partialorder %v1339_v26, 8.507059e+37  ;;  %vm4423_vm12 = vcmp.eq.f32.partialorder %v1380_v33, 8.507059e+37 }
 0x1b3   : > { %2959 = vmatmul.msk.f32.vlgmr.msrb.gmra.mxu3 %vm1093_vm1, %v1250_v27  ;;  %v2078_v37 = vsel %vm5461_vm8, %v2968_v31, 0.0  ;;  %1733 = vst.msk [vmem:[%s4370_s1 + $0x8] sm:$0xff] %vm5461_vm8, %v2968_v31  ;;  %vm1337_vm10 = vmor %vm1335_vm5, %vm1336_vm0  ;;  %v1379_v49 = vsel %vm4413_vm9, %v4312_v47, %v1375_v32  ;;  %vm1390_vm13 = vweird.f32 %v4304_v42  ;;  %vm1391_vm0 = vweird.f32 %v4346_v2 }
 0x1b4   : > { %v1334_v35 = vadd.f32 %v3282_v14, %v1333_v25  ;;  %v2079_v43 = vadd.f32 %v2078_v37, %v2077_v36  ;;  %v1396_v47 = vand.u32 2147483648, %v4304_v42  ;;  %vm4439_vm5 = vmor %vm1390_vm13, %vm1391_vm0  ;;  %vm1349_vm9 = vweird.f32 %v4375_v15 }
 0x1b5   : > { %v3284_v39 = vpop.eup %3283  ;;  %v1384_v10 = vsel %vm4423_vm12, %v1383_v51, %v1379_v49  ;;  %vm1354_vm4 = vcmp.eq.f32.partialorder %v1353_v1, 8.507059e+37  ;;  %v1402_v31 = vmul.f32 %v4338_v63, %v4301_v40  ;;  %v1403_v32 = vmul.f32 %v4338_v63, %v4304_v42 }
 0x1b6   : > { %v1338_v45 = vsel %vm1337_vm10, %v3282_v14, %v1334_v35  ;;  %v1345_v46 = vmul.f32 %v3284_v39, %v4375_v15  ;;  %2080 = vadd.xlane.f32.xlu1 %v2079_v43  ;;  %v1397_v12 = vor.u32 1.1754944e-38, %v1396_v47  ;;  %v1393_v14 = vsel %vm4439_vm5, %v4346_v2, %v1389_v55 }
 0x1b7   : > { %v1343_v48 = vsel %vm1340_vm2, %v1342_v41, %v1338_v45  ;;  %vm1350_vm2 = vweird.f32 %v3284_v39  ;;  %v1399_v16 = vmul.f32 %v1384_v10, %v4265_v8 }
 0x1b8   : > { %v4428_v52 = vmul.f32 %v1343_v48, %v4265_v8  ;;  %v1346_v53 = vsub.f32 1.0, %v1345_v46  ;;  %vm1351_vm10 = vmor %vm1349_vm9, %vm1350_vm2 }
 0x1ba   : > { %v1361_v59 = vmax.f32 %v4428_v52, 0.001  ;;  %v1347_v0 = vmul.f32 %v3284_v39, %v1346_v53  ;;  %v1253_v3 = vpop.f32.mrf.mxu1 }
 0x1bb   : > { %2960 = vmatmul.msk.f32.gmra.mxu3 %vm1093_vm1, %v1253_v3  ;;  %vm1395_vm1 = vcmp.eq.f32.partialorder %v1394_v56, 8.507059e+37 }
 0x1bc   : > { %v4443_v7 = vmin.f32 %v1361_v59, 80.0  ;;  %v1348_v9 = vadd.f32 %v3284_v39, %v1347_v0  ;;  %v1398_v18 = vsel %vm1395_vm1, %v1397_v12, %v1393_v14 }
 0x1bd   : > { %v4467_v21 = vmul.f32 %v1398_v18, %v4265_v8 }
 0x1be   : > { %v1352_v13 = vsel %vm1351_vm10, %v3284_v39, %v1348_v9  ;;  %1736 = vst.msk [vmem:[%s4452_s11] sm:$0xff] %vm5461_vm8, %v4443_v7  ;;  %3285 = vrcp.f32 %v4443_v7  ;;  %v1777_v2 = vsub.f32 %v1399_v16, %v4443_v7  ;;  %v1758_v34 = vand.u32 2147483647, %v4443_v7 }
 0x1bf   : > { %v1357_v15 = vsel %vm1354_vm4, %v1356_v11, %v1352_v13  ;;  %v1760_v35 = vand.u32 2147483648, %v4443_v7  ;;  %vm1754_vm12 = vweird.f32 %v4443_v7  ;;  %v1783_v55 = vmul.f32 %v1402_v31, %v4443_v7 }
 0x1c0   : > { %v4459_v17 = vmul.f32 %v1357_v15, %v4265_v8  ;;  %v1779_v24 = vmul.f32 %v1777_v2, %v1777_v2  ;;  %v1791_v26 = vand.u32 2147483647, %v1777_v2  ;;  %vm1759_vm0 = vcmp.eq.f32.partialorder %v1758_v34, 8.507059e+37 }
 0x1c1   : > { %v1761_v46 = vor.u32 1.1754944e-38, %v1760_v35 }
 0x1c2   : > { %v1362_v19 = vmax.f32 %v4459_v17, 0.001  ;;  %v1825_v37 = vsel %vm4281_vm6, %v1779_v24, 0.0  ;;  %v1793_v41 = vmul.f32 %v1791_v26, %v1402_v31  ;;  %v1809_v6 = vmul.f32 %v1779_v24, %v1402_v31 }
 0x1c3   : > { %v1827_v42 = vsel %vm5461_vm8, %v1825_v37, 0.0 }
 0x1c4   : > { %v4464_v20 = vmin.f32 %v1362_v19, 80.0  ;;  %v3286_v22 = vpop.eup %3285  ;;  %v1795_v49 = vsel %vm4281_vm6, %v1793_v41, 0.0  ;;  %v1811_v15 = vsel %vm4281_vm6, %v1809_v6, 0.0 }
 0x1c5   : > { %v1750_v25 = vmul.f32 %v3286_v22, %v4443_v7  ;;  %vm1755_vm4 = vweird.f32 %v3286_v22  ;;  %v1797_v47 = vsel %vm5461_vm8, %v1795_v49, 0.0 }
 0x1c6   : > { %1737 = vst.msk [vmem:[%s4452_s11 + $0x8] sm:$0xff] %vm5461_vm8, %v4464_v20  ;;  %v1778_v27 = vsub.f32 %v4467_v21, %v4464_v20  ;;  %3287 = vrcp.f32 %v4464_v20  ;;  %vm1756_vm13 = vmor %vm1754_vm12, %vm1755_vm4  ;;  %v1772_v9 = vand.u32 2147483647, %v4464_v20  ;;  %v1774_v10 = vand.u32 2147483648, %v4464_v20 }
 0x1c7   : > { %v1751_v33 = vsub.f32 1.0, %v1750_v25  ;;  %vm1768_vm5 = vweird.f32 %v4464_v20  ;;  %v1784_v25 = vmul.f32 %v1403_v32, %v4464_v20 }
 0x1c8   : > { %v1780_v36 = vmul.f32 %v1778_v27, %v1778_v27  ;;  %v1792_v39 = vand.u32 2147483647, %v1778_v27  ;;  %vm1773_vm10 = vcmp.eq.f32.partialorder %v1772_v9, 8.507059e+37 }
 0x1c9   : > { %v1752_v38 = vmul.f32 %v3286_v22, %v1751_v33 }
 0x1ca   : > { %v1826_v40 = vsel %vm4285_vm7, %v1780_v36, 0.0  ;;  %v1794_v44 = vmul.f32 %v1792_v39, %v1403_v32  ;;  %v1810_v50 = vmul.f32 %v1780_v36, %v1403_v32 }
 0x1cb   : > { %v1753_v43 = vadd.f32 %v3286_v22, %v1752_v38  ;;  %v1828_v63 = vsel %vm5461_vm8, %v1826_v40, 0.0 }
 0x1cc   : > { %v3288_v45 = vpop.eup %3287  ;;  %v1829_v48 = vadd.f32 %v1828_v63, %v1827_v42  ;;  %v1796_v54 = vsel %vm4285_vm7, %v1794_v44, 0.0  ;;  %v1812_v11 = vsel %vm4285_vm7, %v1810_v50, 0.0 }
 0x1cd   : > { %v1757_v51 = vsel %vm1756_vm13, %v3286_v22, %v1753_v43  ;;  %v1764_v53 = vmul.f32 %v3288_v45, %v4464_v20  ;;  %v1798_v59 = vsel %vm5461_vm8, %v1796_v54, 0.0  ;;  %vm1769_vm2 = vweird.f32 %v3288_v45 }
 0x1ce   : > { %v1762_v56 = vsel %vm1759_vm0, %v1761_v46, %v1757_v51  ;;  %1830 = vadd.xlane.f32.xlu1 %v1829_v48  ;;  %v1799_v3 = vadd.f32 %v1798_v59, %v1797_v47  ;;  %vm1770_vm9 = vmor %vm1768_vm5, %vm1769_vm2  ;;  %v1814_v18 = vsel %vm5461_vm8, %v1812_v11, 0.0  ;;  %v1813_v22 = vsel %vm5461_vm8, %v1811_v15, 0.0 }
 0x1cf   : > { %v1781_v0 = vmul.f32 %v1762_v56, %v1399_v16  ;;  %v1765_v1 = vsub.f32 1.0, %v1764_v53  ;;  %v1775_v16 = vor.u32 1.1754944e-38, %v1774_v10  ;;  %v1815_v27 = vadd.f32 %v1814_v18, %v1813_v22 }
 0x1d0   : > { %1800 = vadd.xlane.f32.xlu0 %v1799_v3  ;;  %v1460_v47 = vlaneseq  ;;  %v1472_v11 = vstv %s1024_s12  ;;  %s4573_s12 = sld [smem:[#allocation2 + %s1037_s3]] }
 0x1d1   : > { %v1766_v12 = vmul.f32 %v3288_v45, %v1765_v1  ;;  %v1785_v13 = vmax.f32 %v1781_v0, %v1783_v55  ;;  %3289 = vlog2.f32 %v1781_v0  ;;  %v1467_v0 = vstv %s2969_s24  ;;  %s4567_s24 = sld [smem:[#allocation2 + %s1035_s29]]  ;;  %s1019_s29 = sadd.s32 7, %s4259_s14 }
 0x1d2   : > { %v1464_v59 = vshrl.u32 %v1460_v47, 7  ;;  %v4547_v1 = vand.u32 127, %v1460_v47 }
 0x1d3   : > { %v1767_v14 = vadd.f32 %v3288_v45, %v1766_v12  ;;  %vm1895_vm1 = vcmp.lt.f32.partialorder %v1785_v13, 1.953125  ;;  %vm1855_vm4 = vcmp.lt.f32.partialorder %v1785_v13, 1.25  ;;  %v1474_v12 = vstv %s4543_s22  ;;  %s1017_s22 = sadd.s32 6, %s4259_s14 }
 0x1d4   : > { %vm1897_vm12 = vmand %vm4281_vm6, %vm1895_vm1  ;;  %vm1875_vm1 = vcmp.lt.f32.partialorder %v1785_v13, 1.5625  ;;  %v1468_v3 = vadd.s32 %v1467_v0, %v1464_v59  ;;  %v1465_v6 = vadd.s32 8, %v1464_v59  ;;  %v4555_v9 = vcvt.s32.f32 %v4547_v1  ;;  %s4588_s26 = sld [smem:[#allocation2 + %s1017_s22]] }
 0x1d5   : > { %v1771_v19 = vsel %vm1770_vm9, %v3288_v45, %v1767_v14  ;;  %vm1857_vm13 = vmand %vm4281_vm6, %vm1855_vm4  ;;  %v2982_v34 = vsel %vm1897_vm12, 1.0, %v5457_v30  ;;  %v1484_v13 = vstv %s1030_s2  ;;  %v1486_v14 = vstv %s4545_s5  ;;  %s1007_s2 = sadd.s32 1, %s4259_s14  ;;  %s4583_s5 = sld [smem:[#allocation2 + %s1011_s4]] }
 0x1d6   : > { %v1776_v2 = vsel %vm1773_vm10, %v1775_v16, %v1771_v19  ;;  %v1903_v35 = vsel %vm5461_vm8, %v2982_v34, 0.0  ;;  %vm1877_vm12 = vmand %vm4281_vm6, %vm1875_vm1  ;;  %v4557_v10 = vcvt.s32.f32 %v1468_v3  ;;  %v1469_v15 = vadd.s32 %v1467_v0, %v1465_v6  ;;  %v1171_v34 = vpop.f32.mrf.mxu3  ;;  %s4594_s3 = sld [smem:[#allocation2 + %s1007_s2]]  ;;  %s1013_s4 = sadd.s32 4, %s4259_s14 }
 0x1d7   : > { %v3290_v24 = vpop.eup %3289  ;;  %v1782_v26 = vmul.f32 %v1776_v2, %v4467_v21  ;;  %v2978_v21 = vsel %vm1857_vm13, 1.0, %v5457_v30  ;;  %v2980_v49 = vsel %vm1877_vm12, 1.0, %v5457_v30  ;;  %v1473_v18 = vmul.f32 %v1472_v11, %v4555_v9  ;;  %s4607_s22 = sld [smem:[#allocation2 + %s1013_s4]]  ;;  %s1015_s2 = sadd.s32 5, %s4259_s14 }
 0x1d8   : > { %1816 = vadd.xlane.f32.xlu0 %v1815_v27  ;;  %v1788_v33 = vmul.f32 0.6931472, %v3290_v24  ;;  %v1863_v40 = vsel %vm5461_vm8, %v2978_v21, 0.0  ;;  %v1883_v55 = vsel %vm5461_vm8, %v2980_v49, 0.0  ;;  %v1475_v19 = vmul.f32 %v1474_v12, %v4557_v10 }
 0x1d9   : > { %v1786_v31 = vmax.f32 %v1782_v26, %v1784_v25  ;;  %3291 = vlog2.f32 %v1782_v26  ;;  %v1485_v2 = vmul.f32 %v1484_v13, %v4555_v9  ;;  %v1487_v22 = vmul.f32 %v1486_v14, %v4557_v10 }
 0x1da   : > { %v1839_v38 = vmul.f32 %v1788_v33, %v1788_v33  ;;  %3293 = vrcp.f32 %v4330_v60  ;;  %v4577_v24 = vcvt.s32.f32 %v1469_v15  ;;  %v1477_v26 = vadd.f32 %v1475_v19, %v1473_v18 }
 0x1db   : > { %vm1896_vm0 = vcmp.lt.f32.partialorder %v1786_v31, 1.953125  ;;  %vm1856_vm2 = vcmp.lt.f32.partialorder %v1786_v31, 1.25  ;;  %vm1876_vm9 = vcmp.lt.f32.partialorder %v1786_v31, 1.5625  ;;  %3295 = vrcp.f32 %v4332_v61 }
 0x1dc   : > { %vm1898_vm5 = vmand %vm4285_vm7, %vm1896_vm0  ;;  %v1841_v45 = vsel %vm4281_vm6, %v1839_v38, 0.0  ;;  %v1489_v27 = vadd.f32 %v1487_v22, %v1485_v2  ;;  %v1479_v31 = vstv %s4552_s19  ;;  %v1491_v33 = vstv %s4561_s21  ;;  %s4598_s19 = sld [smem:[#allocation2 + %s1039_s0]] }
 0x1dd   : > { %v2983_v32 = vsel %vm1898_vm5, 1.0, %v5457_v30  ;;  %vm1858_vm10 = vmand %vm4285_vm7, %vm1856_vm2  ;;  %v1843_v50 = vsel %vm5461_vm8, %v1841_v45, 0.0  ;;  %v1476_v21 = vmul.f32 %v1474_v12, %v4577_v24  ;;  %s4602_s21 = sld [smem:[#allocation2 + %s1019_s29]]  ;;  %vm1415_vm13 = vweird.f32 %v4330_v60 }
 0x1de   : > { %v1904_v36 = vsel %vm5461_vm8, %v2983_v32, 0.0  ;;  %v2979_v37 = vsel %vm1858_vm10, 1.0, %v5457_v30  ;;  %vm1878_vm4 = vmand %vm4285_vm7, %vm1876_vm9  ;;  %v1492_v38 = vadd.f32 %v1491_v33, %v1489_v27  ;;  %v1527_v11 = vstv %s4583_s5  ;;  %v1174_v13 = vpop.f32.mrf.mxu3  ;;  %s4670_s5 = scalar_lea.vmem [#allocation25], %s4216_s15 }
 0x1df   : > { %v3292_v39 = vpop.eup %3291  ;;  %v1905_v41 = vadd.f32 %v1904_v36, %v1903_v35  ;;  %v1864_v43 = vsel %vm5461_vm8, %v2979_v37, 0.0  ;;  %v2981_v46 = vsel %vm1878_vm4, 1.0, %v5457_v30  ;;  %v1488_v36 = vmul.f32 %v1486_v14, %v4577_v24 }
 0x1e0   : > { %v1865_v42 = vadd.f32 %v1864_v43, %v1863_v40  ;;  %v1790_v63 = vmul.f32 0.6931472, %v3292_v39  ;;  %v1884_v53 = vsel %vm5461_vm8, %v2981_v46, 0.0  ;;  %v4565_v16 = vpop.eup %3293  ;;  %v1480_v37 = vadd.f32 %v1479_v31, %v1477_v26  ;;  %v1225_v40 = vpop.f32.mrf.mxu2 }
 0x1e1   : > { %1906 = vadd.xlane.f32.xlu0 %v1905_v41  ;;  %v1885_v56 = vadd.f32 %v1884_v53, %v1883_v55  ;;  %v1411_v25 = vmul.f32 %v4565_v16, %v4330_v60  ;;  %v4592_v35 = vpop.eup %3295  ;;  %v1496_v39 = vstv %s4567_s24  ;;  %v1498_v41 = vstv %s4573_s12  ;;  %s1021_s24 = sadd.s32 8, %s4259_s14  ;;  %s1009_s12 = sadd.s32 2, %s4259_s14 }
 0x1e2   : > { %1866 = vadd.xlane.f32.xlu2 %v1865_v42  ;;  %v1840_v44 = vmul.f32 %v1790_v63, %v1790_v63  ;;  %v1478_v43 = vadd.f32 %v1476_v21, %v1473_v18  ;;  %v1425_v63 = vmul.f32 %v4592_v35, %v4332_v61  ;;  %v1497_v45 = vmul.f32 %v1496_v39, %v4555_v9  ;;  %s4629_s0 = sld [smem:[#allocation2 + %s1021_s24]] }
 0x1e3   : > { %v1412_v32 = vsub.f32 1.0, %v1411_v25  ;;  %v1499_v46 = vmul.f32 %v1498_v41, %v4557_v10  ;;  %v1494_v49 = vmul.f32 %v1492_v38, %v4428_v52  ;;  %vm1416_vm0 = vweird.f32 %v4565_v16  ;;  %s4645_s14 = sld [smem:[#allocation2 + %s1015_s2]] }
 0x1e4   : > { %v1842_v48 = vsel %vm4285_vm7, %v1840_v44, 0.0  ;;  %v1490_v44 = vadd.f32 %v1488_v36, %v1485_v2  ;;  %v1426_v55 = vsub.f32 1.0, %v1425_v63  ;;  %v1500_v0 = vmul.f32 %v1498_v41, %v4577_v24  ;;  %vm4622_vm2 = vmor %vm1415_vm13, %vm1416_vm0 }
 0x1e5   : > { %v1844_v51 = vsel %vm5461_vm8, %v1842_v48, 0.0  ;;  %v1413_v42 = vmul.f32 %v4565_v16, %v1412_v32  ;;  %v1482_v48 = vmul.f32 %v1480_v37, %v4428_v52  ;;  %v1501_v59 = vadd.f32 %v1499_v46, %v1497_v45 }
 0x1e6   : > { %v1845_v54 = vadd.f32 %v1844_v51, %v1843_v50  ;;  %v1421_v50 = vand.u32 2147483648, %v4330_v60  ;;  %v1481_v51 = vadd.f32 %v1479_v31, %v1478_v43  ;;  %v1493_v47 = vadd.f32 %v1491_v33, %v1490_v44  ;;  %v4643_v31 = vpop.xlane.xlu1 %1918 }
 0x1e7   : > { %v1414_v53 = vadd.f32 %v4565_v16, %v1413_v42  ;;  %v1508_v6 = vadd.f32 %v1482_v48, %v1171_v34  ;;  %v1510_v12 = vadd.f32 %v1494_v49, %v1225_v40  ;;  %v1503_v14 = vstv %s4598_s19  ;;  %s5576_s19 = sld [smem:[#allocation69_spill]] }
 0x1e8   : > { %1846 = vadd.xlane.f32.xlu1 %v1845_v54  ;;  %v1419_v54 = vand.u32 2147483647, %v4330_v60  ;;  %v1540_v60 = vstv %s4588_s26  ;;  %v1517_v15 = vstv %s4594_s3  ;;  %v1543_v18 = vstv %s4602_s21  ;;  %v1228_v36 = vpop.f32.mrf.mxu2  ;;  %s4981_s3 = scalar_lea.vmem [#allocation22], %s4216_s15 }
 0x1e9   : > { %v1422_v19 = vor.u32 1.1754944e-38, %v1421_v50  ;;  %v1483_v2 = vmul.f32 %v1481_v51, %v4459_v17  ;;  %v1418_v22 = vsel %vm4622_vm2, %v4565_v16, %v1414_v53  ;;  %v1427_v25 = vmul.f32 %v4592_v35, %v1426_v55 }
 0x1ea   : > { %1886 = vadd.xlane.f32.xlu2 %v1885_v56  ;;  %v1514_v56 = vstv %s4262_s13  ;;  %s4635_s13 = sld [smem:[#allocation2 + %s1009_s12]]  ;;  %vm1420_vm5 = vcmp.eq.f32.partialorder %v1419_v54, 8.507059e+37  ;;  %v1530_v26 = vstv %s4607_s22  ;;  %v1495_v27 = vmul.f32 %v1493_v47, %v4459_v17  ;;  %s2998_s22 = sshll.u32 %s5538_s16, 2 }
 0x1eb   : > { %v1504_v33 = vadd.f32 %v1503_v14, %v1501_v59  ;;  %v1502_v34 = vadd.f32 %v1500_v0, %v1497_v45  ;;  %v1515_v21 = vmul.f32 %v1514_v56, %v1508_v6  ;;  %v1518_v32 = vmul.f32 %v1517_v15, %v1510_v12  ;;  %s2232_s24 = sadd.s32 %s2998_s22, %s4239_s30 }
 0x1ec   : > { %vm1429_vm9 = vweird.f32 %v4332_v61  ;;  %vm1430_vm10 = vweird.f32 %v4592_v35  ;;  %v1541_v16 = vmul.f32 %v1540_v60, %v1508_v6  ;;  %v1544_v37 = vmul.f32 %v1543_v18, %v1510_v12  ;;  %s5088_s12 = sshll.u32 %s2232_s24, 3 }
 0x1ed   : > { %v1423_v38 = vsel %vm1420_vm5, %v1422_v19, %v1418_v22  ;;  %v1435_v39 = vand.u32 2147483648, %v4332_v61  ;;  %v1509_v41 = vadd.f32 %v1483_v2, %v1174_v13  ;;  %v1428_v40 = vadd.f32 %v4592_v35, %v1427_v25  ;;  %vm4653_vm1 = vmor %vm1429_vm9, %vm1430_vm10  ;;  %v4680_v25 = vpop.xlane.xlu0 %2068 }
 0x1ee   : > { %v1433_v43 = vand.u32 2147483647, %v4332_v61  ;;  %v1528_v42 = vmul.f32 %v1527_v11, %v1508_v6  ;;  %v1511_v63 = vadd.f32 %v1495_v27, %v1228_v36  ;;  %v1506_v44 = vmul.f32 %v1504_v33, %v4428_v52 }
 0x1ef   : > { %v1505_v45 = vadd.f32 %v1503_v14, %v1502_v34  ;;  %v1520_v48 = vadd.f32 %v1518_v32, %v1515_v21  ;;  %v1531_v49 = vmul.f32 %v1530_v26, %v1510_v12  ;;  %v1548_v51 = vstv %s4629_s0 }
 0x1f0   : > { %v4659_v53 = vmul.f32 %v1423_v38, %v4265_v8  ;;  %v1546_v61 = vadd.f32 %v1544_v37, %v1541_v16  ;;  %v1436_v52 = vor.u32 1.1754944e-38, %v1435_v39  ;;  %v1516_v47 = vmul.f32 %v1514_v56, %v1509_v41  ;;  %v4687_v16 = vld [vmem:[%s4209_s20] sm:$0xff] }
 0x1f1   : > { %v1522_v59 = vstv %s4635_s13  ;;  %v1432_v0 = vsel %vm4653_vm1, %v4592_v35, %v1428_v40  ;;  %vm1434_vm4 = vcmp.eq.f32.partialorder %v1433_v43, 8.507059e+37  ;;  %v1519_v3 = vmul.f32 %v1517_v15, %v1511_v63  ;;  %v4699_v43 = vld [vmem:[%s4209_s20 + $0x10] sm:$0xff]  ;;  %s5600_s13 = sld [smem:[#allocation74_spill]] }
 0x1f2   : > { %v1535_v6 = vstv %s4645_s14  ;;  %v1529_v12 = vmul.f32 %v1527_v11, %v1509_v41  ;;  %v1542_v13 = vmul.f32 %v1540_v60, %v1509_v41  ;;  %v1532_v56 = vmul.f32 %v1530_v26, %v1511_v63 }
 0x1f3   : > { %v1545_v19 = vmul.f32 %v1543_v18, %v1511_v63  ;;  %v1437_v22 = vsel %vm1434_vm4, %v1436_v52, %v1432_v0  ;;  %v1533_v60 = vadd.f32 %v1531_v49, %v1528_v42  ;;  %v1521_v26 = vadd.f32 %v1519_v3, %v1516_v47  ;;  %v4706_v63 = vld [vmem:[%s4209_s20 + $0x8] sm:$0xff] }
 0x1f4   : > { %v1507_v21 = vmul.f32 %v1505_v45, %v4459_v17  ;;  %v1534_v32 = vadd.f32 %v1532_v56, %v1529_v12  ;;  %v4703_v42 = vmul.f32 %v1437_v22, %v4265_v8  ;;  %v4728_v0 = vmul.f32 %v4699_v43, %v4699_v43 }
 0x1f5   : > { %v1547_v40 = vadd.f32 %v1545_v19, %v1542_v13  ;;  %v4741_v12 = vmul.f32 %v4706_v63, %v4706_v63 }
 0x1f7   : > { %s2272_s14 = scalar_lea.hbm %s5600_s13, %s5088_s12 }
 0x229   : > { %v4678_v35 = vpop.xlane.xlu1 %2080 }
 0x236   : > { %v1279_v50 = vpop.f32.mrf.mxu3 }
 0x237   : > { %v1512_v54 = vadd.f32 %v1506_v44, %v1279_v50  ;;  %v4662_v55 = vadd.f32 %v4443_v7, %v1279_v50  ;;  %v4718_v50 = vld [vmem:[%s4209_s20 + $0x18] sm:$0xff]  ;;  %s4835_s20 = scalar_lea.vmem [#allocation20], %s2924_s10  ;;  %s4918_s10 = scalar_lea.vmem [#allocation23], %s4216_s15 }
 0x239   : > { %3297 = vrcp.f32 %v4662_v55  ;;  %1747 = vst.msk [vmem:[%s4670_s5] sm:$0xff] %vm5461_vm8, %v4662_v55  ;;  %v1549_v7 = vmul.f32 %v1548_v51, %v1512_v54  ;;  %v1927_v14 = vsub.f32 %v4659_v53, %v4662_v55  ;;  %v1523_v15 = vmul.f32 %v1522_v59, %v1512_v54 }
 0x23a   : > { %v1536_v27 = vmul.f32 %v1535_v6, %v1512_v54  ;;  %v1684_v33 = vand.u32 2147483648, %v4662_v55  ;;  %v1682_v37 = vand.u32 2147483647, %v4662_v55  ;;  %vm1678_vm12 = vweird.f32 %v4662_v55 }
 0x23b   : > { %v1551_v2 = vadd.f32 %v1549_v7, %v1546_v61  ;;  %v1929_v34 = vmul.f32 %v1927_v14, %v1927_v14  ;;  %v1941_v11 = vand.u32 2147483647, %v1927_v14  ;;  %v4708_v44 = vadd.f32 %v1523_v15, %v1520_v48 }
 0x23c   : > { %v4710_v45 = vadd.f32 %v1536_v27, %v1533_v60  ;;  %v1685_v46 = vor.u32 1.1754944e-38, %v1684_v33  ;;  %v4715_v49 = vmul.f32 %v4662_v55, %v4354_v4  ;;  %v4723_v48 = vmul.f32 %v4687_v16, %v4687_v16 }
 0x23d   : > { %v4684_v18 = vadd.f32 1e-08, %v1551_v2  ;;  %v4691_v38 = vmul.f32 %v1941_v11, %v4354_v4  ;;  %v4694_v39 = vmul.f32 %v1929_v34, %v4354_v4  ;;  %vm4735_vm13 = vcmp.eq.f32.partialorder %v1682_v37, 8.507059e+37 }
 0x23e   : > { %v1282_v36 = vpop.f32.mrf.mxu3  ;;  %v1975_v56 = vsel %vm4319_vm14, %v1929_v34, 0.0 }
 0x23f   : > { %v4696_v41 = vpop.eup %3297  ;;  %v1513_v17 = vadd.f32 %v1507_v21, %v1282_v36  ;;  %3299 = vrcp.f32 %v4684_v18  ;;  %v1566_v52 = vand.u32 2147483648, %v4684_v18  ;;  %v1564_v47 = vand.u32 2147483647, %v4684_v18 }
 0x240   : > { %v4731_v4 = vadd.f32 %v4464_v20, %v1282_v36  ;;  %vm1560_vm0 = vweird.f32 %v4684_v18  ;;  %v4748_v20 = vmul.f32 %v4718_v50, %v4718_v50  ;;  %vm1679_vm5 = vweird.f32 %v4696_v41 }
 0x241   : > { %v1524_v61 = vmul.f32 %v1522_v59, %v1513_v17  ;;  %v1550_v54 = vmul.f32 %v1548_v51, %v1513_v17  ;;  %v1674_v59 = vmul.f32 %v4696_v41, %v4662_v55  ;;  %v1537_v3 = vmul.f32 %v1535_v6, %v1513_v17  ;;  %v1831_v13 = vpop.xlane.xlu1 %1830  ;;  %vm1680_vm10 = vmor %vm1678_vm12, %vm1679_vm5 }
 0x242   : > { %3301 = vrcp.f32 %v4731_v4  ;;  %1748 = vst.msk [vmem:[%s4670_s5 + $0x8] sm:$0xff] %vm5461_vm8, %v4731_v4  ;;  %v1832_v6 = vrot.slane %v1831_v13, 4  ;;  %v1567_v22 = vor.u32 1.1754944e-38, %v1566_v52  ;;  %v1928_v27 = vsub.f32 %v4703_v42, %v4731_v4 }
 0x243   : > { %v1552_v7 = vadd.f32 %v1550_v54, %v1547_v40  ;;  %v1675_v14 = vsub.f32 1.0, %v1674_v59  ;;  %v4754_v15 = vadd.f32 %v1524_v61, %v1521_v26  ;;  %vm4761_vm2 = vcmp.eq.f32.partialorder %v1564_v47, 8.507059e+37  ;;  %v1801_v60 = vpop.xlane.xlu0 %1800 }
 0x244   : > { %v4765_v11 = vadd.f32 %v1832_v6, %v1831_v13  ;;  %v4769_v26 = vadd.f32 %v1537_v3, %v1534_v32  ;;  %v1977_v37 = vsel %vm5461_vm8, %v1975_v56, 0.0  ;;  %v1802_v17 = vrot.slane %v1801_v60, 4 }
 0x245   : > { %v3300_v19 = vpop.eup %3299  ;;  %v4756_v2 = vadd.f32 1e-08, %v1552_v7  ;;  %v1676_v21 = vmul.f32 %v4696_v41, %v1675_v14  ;;  %v1696_v54 = vand.u32 2147483647, %v4731_v4  ;;  %v1930_v32 = vmul.f32 %v1928_v27, %v1928_v27 }
 0x246   : > { %v1556_v33 = vmul.f32 %v3300_v19, %v4684_v18  ;;  %vm1561_vm9 = vweird.f32 %v3300_v19  ;;  %vm1692_vm1 = vweird.f32 %v4731_v4  ;;  %v1803_v13 = vadd.f32 %v1802_v17, %v1801_v60 }
 0x247   : > { %3303 = vrcp.f32 %v4756_v2  ;;  %v1580_v36 = vand.u32 2147483648, %v4756_v2  ;;  %v1677_v61 = vadd.f32 %v4696_v41, %v1676_v21  ;;  %v1578_v52 = vand.u32 2147483647, %v4756_v2 }
 0x248   : > { %v1557_v40 = vsub.f32 1.0, %v1556_v33  ;;  %v3302_v59 = vpop.eup %3301  ;;  %v1976_v14 = vsel %vm4323_vm15, %v1930_v32, 0.0  ;;  %v1698_v33 = vand.u32 2147483648, %v4731_v4  ;;  %vm4794_vm5 = vcmp.eq.f32.partialorder %v1696_v54, 8.507059e+37 }
 0x249   : > { %v4781_v7 = vor.u32 1.1754944e-38, %v1580_v36  ;;  %v1681_v56 = vsel %vm1680_vm10, %v4696_v41, %v1677_v61  ;;  %v1688_v55 = vmul.f32 %v3302_v59, %v4731_v4  ;;  %v1978_v36 = vsel %vm5461_vm8, %v1976_v14, 0.0 }
 0x24a   : > { %v1558_v3 = vmul.f32 %v3300_v19, %v1557_v40  ;;  %v4786_v6 = vsel %vm4735_vm13, %v1685_v46, %v1681_v56  ;;  %v1804_v40 = vrot.slane %v1803_v13, 2  ;;  %vm1693_vm12 = vweird.f32 %v3302_v59  ;;  %vm1562_vm13 = vmor %vm1560_vm0, %vm1561_vm9 }
 0x24b   : > { %v4803_v51 = vmul.f32 %v4786_v6, %v4659_v53  ;;  %v1979_v60 = vadd.f32 %v1978_v36, %v1977_v37  ;;  %v1689_v17 = vsub.f32 1.0, %v1688_v55  ;;  %v1942_v61 = vand.u32 2147483647, %v1928_v27  ;;  %v1817_v14 = vpop.xlane.xlu0 %1816  ;;  %vm1694_vm0 = vmor %vm1692_vm1, %vm1693_vm12 }
 0x24c   : > { %v1559_v21 = vadd.f32 %v3300_v19, %v1558_v3  ;;  %vm4806_vm4 = vcmp.eq.f32.partialorder %v1578_v52, 8.507059e+37  ;;  %v1945_v18 = vsel %vm4319_vm14, %v4691_v38, 0.0  ;;  %v1818_v55 = vrot.slane %v1817_v14, 4 }
 0x24d   : > { %v3304_v46 = vpop.eup %3303  ;;  %1980 = vadd.xlane.f32.xlu1 %v1979_v60  ;;  %v1690_v37 = vmul.f32 %v3302_v59, %v1689_v17  ;;  %v1947_v36 = vsel %vm5461_vm8, %v1945_v18, 0.0  ;;  %3305 = vlog2.f32 %v4803_v51 }
 0x24e   : > { %v1563_v3 = vsel %vm1562_vm13, %v3300_v19, %v1559_v21  ;;  %v1570_v56 = vmul.f32 %v3304_v46, %v4756_v2  ;;  %vm1575_vm10 = vweird.f32 %v3304_v46  ;;  %v1944_v19 = vmul.f32 %v1942_v61, %v4358_v5 }
 0x24f   : > { %v1568_v53 = vsel %vm4761_vm2, %v1567_v22, %v1563_v3  ;;  %v1691_v30 = vadd.f32 %v3302_v59, %v1690_v37  ;;  %v1819_v47 = vadd.f32 %v1818_v55, %v1817_v14  ;;  %v1960_v22 = vmul.f32 %v1930_v32, %v4358_v5 }
 0x250   : > { %v1571_v27 = vsub.f32 1.0, %v1570_v56  ;;  %v1583_v21 = vmul.f32 %v1568_v53, %v4708_v44  ;;  %v1587_v52 = vmul.f32 %v1568_v53, %v4710_v45  ;;  %v1946_v38 = vsel %vm4323_vm15, %v1944_v19, 0.0 }
 0x251   : > { %v1948_v44 = vsel %vm5461_vm8, %v1946_v38, 0.0  ;;  %v1695_v45 = vsel %vm1694_vm0, %v3302_v59, %v1691_v30  ;;  %v1699_v61 = vor.u32 1.1754944e-38, %v1698_v33  ;;  %v1961_v56 = vsel %vm4319_vm14, %v4694_v39, 0.0 }
 0x252   : > { %v1572_v34 = vmul.f32 %v3304_v46, %v1571_v27  ;;  %v1585_v60 = vsub.f32 %v1583_v21, %v4555_v9  ;;  %v1589_v17 = vsub.f32 %v1587_v52, %v4557_v10  ;;  %v1949_v3 = vadd.f32 %v1948_v44, %v1947_v36 }
 0x253   : > { %v1820_v10 = vrot.slane %v1819_v47, 2  ;;  %vm5569_vm2 = vweird.f32 %v4756_v2  ;;  %v4846_v30 = vsel %vm4794_vm5, %v1699_v61, %v1695_v45  ;;  %v1963_v39 = vsel %vm5461_vm8, %v1961_v56, 0.0 }
 0x254   : > { %v1573_v14 = vadd.f32 %v3304_v46, %v1572_v34  ;;  %v1591_v32 = vsub.f32 %v1585_v60, %v4687_v16  ;;  %v1593_v18 = vsub.f32 %v1589_v17, %v4699_v43  ;;  %1738 = vst.msk [vmem:[%s4835_s20] sm:$0xff] %vm5461_vm8, %v1585_v60  ;;  %vm1576_vm9 = vmor %vm5569_vm2, %vm1575_vm10  ;;  %1950 = vadd.xlane.f32.xlu2 %v1949_v3  ;;  %v1962_v16 = vsel %vm4323_vm15, %v1960_v22, 0.0  ;;  %v1907_v2 = vpop.xlane.xlu0 %1906 }
 0x255   : > { %2976 = vst.msk [vmem:[%s4835_s20 + $0x10] sm:$0xff] %vm5461_vm8, %v1589_v17  ;;  %v1805_v43 = vadd.f32 %v1804_v40, %v1803_v13  ;;  %v1964_v37 = vsel %vm5461_vm8, %v1962_v16, 0.0  ;;  %v1908_v27 = vrot.slane %v1907_v2, 4  ;;  %v1867_v21 = vpop.xlane.xlu2 %1866  ;;  %v1932_v13 = vmul.f32 %v4846_v30, %v4703_v42 }
 0x256   : > { %v1577_v59 = vsel %vm1576_vm9, %v3304_v46, %v1573_v14  ;;  %v1595_v33 = vmul.f32 %v1591_v32, %v1591_v32  ;;  %v1597_v53 = vmul.f32 %v1593_v18, %v1593_v18  ;;  %v1965_v41 = vadd.f32 %v1964_v37, %v1963_v39 }
 0x257   : > { %v1582_v55 = vsel %vm4806_vm4, %v4781_v7, %v1577_v59  ;;  %v1806_v19 = vrot.slane %v1805_v43, 1  ;;  %v1868_v40 = vrot.slane %v1867_v21, 4  ;;  %v4859_v38 = vadd.f32 %v1908_v27, %v1907_v2 }
 0x258   : > { %v1584_v52 = vmul.f32 %v1582_v55, %v4754_v15  ;;  %v1588_v36 = vmul.f32 %v1582_v55, %v4769_v26  ;;  %1966 = vadd.xlane.f32.xlu0 %v1965_v41  ;;  %v1821_v22 = vadd.f32 %v1820_v10, %v1819_v47  ;;  %v5570_v7 = vrot.slane %v4765_v11, 2 }
 0x259   : > { %v1807_v46 = vadd.f32 %v1806_v19, %v1805_v43  ;;  %v4866_v26 = vadd.f32 %v1868_v40, %v1867_v21  ;;  %v1934_v42 = vmul.f32 %v4731_v4, %v4358_v5  ;;  %v4870_v60 = vadd.f32 %v1597_v53, %v1595_v33 }
 0x25a   : > { %v1835_v54 = vadd.f32 %v5570_v7, %v4765_v11  ;;  %v1586_v34 = vsub.f32 %v1584_v52, %v4555_v9  ;;  %v1590_v15 = vsub.f32 %v1588_v36, %v4577_v24  ;;  %v1822_v17 = vrot.slane %v1821_v22, 1 }
 0x25b   : > { %3036 = vpush %v1807_v46  ;;  %v1935_v47 = vmax.f32 %v4803_v51, %v4715_v49  ;;  %v1910_v9 = vrot.slane %v4859_v38, 2  ;;  %v1936_v24 = vmax.f32 %v1932_v13, %v1934_v42  ;;  %v1870_v5 = vrot.slane %v4866_v26, 2  ;;  %v1847_v61 = vpop.xlane.xlu1 %1846 }
 0x25c   : > { %v1836_v44 = vrot.slane %v1835_v54, 1  ;;  %v1592_v45 = vsub.f32 %v1586_v34, %v4706_v63  ;;  %v1594_v11 = vsub.f32 %v1590_v15, %v4718_v50  ;;  %1739 = vst.msk [vmem:[%s4835_s20 + $0x8] sm:$0xff] %vm5461_vm8, %v1586_v34  ;;  %v1823_v4 = vadd.f32 %v1822_v17, %v1821_v22  ;;  %v3317_v22 = vld [vmem:[%s4226_s23] sm:$0xff]  ;;  %v3306_v17 = vpop.eup %3305 }
 0x25d   : > { %2977 = vst.msk [vmem:[%s4835_s20 + $0x18] sm:$0xff] %vm5461_vm8, %v1590_v15  ;;  %vm2045_vm1 = vcmp.lt.f32.partialorder %v1935_v47, 1.953125  ;;  %vm2025_vm4 = vcmp.lt.f32.partialorder %v1935_v47, 1.5625  ;;  %v1848_v49 = vrot.slane %v1847_v61, 4  ;;  %vm2046_vm12 = vcmp.lt.f32.partialorder %v1936_v24, 1.953125  ;;  %v1887_v50 = vpop.xlane.xlu2 %1886 }
 0x25e   : > { %v1596_v3 = vmul.f32 %v1592_v45, %v1592_v45  ;;  %v1837_v56 = vadd.f32 %v1836_v44, %v1835_v54  ;;  %vm2047_vm5 = vmand %vm4319_vm14, %vm2045_vm1  ;;  %v1598_v63 = vmul.f32 %v1594_v11, %v1594_v11  ;;  %3038 = vpush %v1823_v4  ;;  %v5571_v14 = vmov 0.0   ;;  %v3318_v54 = vld [vmem:[%s4226_s23 + $0x8] sm:$0xff]  ;;  %s4932_s23 = scalar_select %p987_p6, %s5538_s16, 1 }
 0x25f   : > { %vm2048_vm13 = vmand %vm4323_vm15, %vm2046_vm12  ;;  %v2988_v32 = vsel %vm2047_vm5, 1.0, %v5571_v14  ;;  %vm2026_vm10 = vcmp.lt.f32.partialorder %v1936_v24, 1.5625  ;;  %vm2005_vm0 = vcmp.lt.f32.partialorder %v1935_v47, 1.25  ;;  %v1849_v18 = vadd.f32 %v1848_v49, %v1847_v61 }
 0x260   : > { %3040 = vpush %v1837_v56  ;;  %v1888_v10 = vrot.slane %v1887_v50, 4  ;;  %v2989_v16 = vsel %vm2048_vm13, 1.0, %v5571_v14  ;;  %vm2027_vm2 = vmand %vm4319_vm14, %vm2025_vm4  ;;  %vm2006_vm9 = vcmp.lt.f32.partialorder %v1936_v24, 1.25  ;;  %v2053_v39 = vsel %vm5461_vm8, %v2988_v32, 0.0  ;;  %s2939_s26 = sshll.u32 %s4932_s23, 2  ;;  %s5094_s23 = sshll.u32 %s2272_s14, 4 }
 0x261   : > { %v2054_v43 = vsel %vm5461_vm8, %v2989_v16, 0.0  ;;  %vm2028_vm1 = vmand %vm4323_vm15, %vm2026_vm10  ;;  %v2986_v59 = vsel %vm2027_vm2, 1.0, %v5571_v14  ;;  %v1850_v33 = vrot.slane %v1849_v18, 2  ;;  %3307 = vlog2.f32 %v1932_v13  ;;  %s992_s29 = sadd.s32 %s2939_s26, %s4245_s7  ;;  %5601 = sst [smem:[#allocation61_spill]] %s5094_s23 }
 0x262   : > { %v1889_v53 = vadd.f32 %v1888_v10, %v1887_v50  ;;  %v2055_v37 = vadd.f32 %v2054_v43, %v2053_v39  ;;  %v2987_v2 = vsel %vm2028_vm1, 1.0, %v5571_v14  ;;  %vm2007_vm4 = vmand %vm4319_vm14, %vm2005_vm0  ;;  %v2033_v55 = vsel %vm5461_vm8, %v2986_v59, 0.0  ;;  %s2940_s7 = sshll.u32 %s992_s29, 2  ;;  %s2254_s26 = sshll.u32 %s4308_s18, 4  ;;  %s5099_s26 = int_to_ptr.vmem [resolvable:$true] %s2254_s26 }
 0x263   : > { %v2034_v41 = vsel %vm5461_vm8, %v2987_v2, 0.0  ;;  %vm2008_vm12 = vmand %vm4323_vm15, %vm2006_vm9  ;;  %v2984_v51 = vsel %vm2007_vm4, 1.0, %v5571_v14  ;;  %v1701_v40 = vmul.f32 %v4786_v6, %v4265_v8  ;;  %v1702_v46 = vmul.f32 %v4846_v30, %v4265_v8  ;;  %s994_s21 = scalar_lea.vmem %s5576_s19, %s2940_s7  ;;  %s2235_s29 = sshll.u32 %s4370_s1, 4  ;;  %s5101_s29 = int_to_ptr.vmem [resolvable:$true] %s2235_s29 }
 0x264   : > { %v1890_v19 = vrot.slane %v1889_v53, 2  ;;  %2056 = vadd.xlane.f32.xlu2 %v2055_v37  ;;  %v2035_v27 = vadd.f32 %v2034_v41, %v2033_v55  ;;  %v2985_v21 = vsel %vm2008_vm12, 1.0, %v5571_v14  ;;  %v2013_v52 = vsel %vm5461_vm8, %v2984_v51, 0.0  ;;  %s5603_s19 = sld [smem:[#allocation73_spill]]  ;;  %s5470_s1 = scalar_lea.sflag [#allocation18], %s4193_s9 }
 0x265   : > { %v2014_v36 = vsel %vm5461_vm8, %v2985_v21, 0.0  ;;  %v1709_v7 = vmul.f32 0.05, %v3317_v22  ;;  %v1710_v34 = vmul.f32 0.05, %v3318_v54  ;;  %v1851_v15 = vadd.f32 %v1850_v33, %v1849_v18  ;;  %1745 = vst.msk [vmem:[%s4918_s10] sm:$0xff] %vm5461_vm8, %v1701_v40 }
 0x266   : > { %2036 = vadd.xlane.f32.xlu1 %v2035_v27  ;;  %v2015_v13 = vadd.f32 %v2014_v36, %v2013_v52  ;;  %v1871_v42 = vadd.f32 %v1870_v5, %v4866_v26  ;;  %v1703_v44 = vsub.f32 %v1701_v40, %v3317_v22  ;;  %v1704_v47 = vsub.f32 %v1702_v46, %v3318_v54  ;;  %v3023_v52 = vld [vmem:[%s994_s21] sm:$0xff]  }
 0x267   : > { %v1891_v8 = vadd.f32 %v1890_v19, %v1889_v53  ;;  %v1911_v6 = vadd.f32 %v1910_v9, %v4859_v38  ;;  %v4925_v30 = vadd.f32 %v1598_v63, %v1596_v3  ;;  %v1938_v45 = vmul.f32 0.6931472, %v3306_v17  ;;  %1746 = vst.msk [vmem:[%s4918_s10 + $0x8] sm:$0xff] %vm5461_vm8, %v1702_v46  ;;  %v3308_v24 = vpop.eup %3307 }
 0x268   : > { %2016 = vadd.xlane.f32.xlu0 %v2015_v13  ;;  %v1852_v26 = vrot.slane %v1851_v15, 1  ;;  %v1872_v11 = vrot.slane %v1871_v42, 1  ;;  %v1705_v5 = vand.u32 2147483647, %v1703_v44  ;;  %v1706_v4 = vand.u32 2147483647, %v1704_v47 }
 0x269   : > { %v1892_v61 = vrot.slane %v1891_v8, 1  ;;  %v1912_v56 = vrot.slane %v1911_v6, 1  ;;  %v1940_v49 = vmul.f32 0.6931472, %v3308_v24  ;;  %v1989_v50 = vmul.f32 %v1938_v45, %v1938_v45 }
 0x26a   : > { %v1853_v38 = vadd.f32 %v1852_v26, %v1851_v15  ;;  %v1873_v9 = vadd.f32 %v1872_v11, %v1871_v42  ;;  %vm1707_vm5 = vcmp.gt.f32.partialorder %v1705_v5, 3.0  ;;  %vm1708_vm13 = vcmp.gt.f32.partialorder %v1706_v4, 3.0  ;;  %s5604_s21 = smov %s5603_s19  ;;  %s2253_s22 = scalar_lea.hbm %s5603_s19, %s5088_s12 }
 0x26b   : > { %vm1711_vm10 = vcmp.gt.f32.partialorder %v1705_v5, %v1709_v7  ;;  %vm1712_vm0 = vcmp.gt.f32.partialorder %v1706_v4, %v1710_v34  ;;  %v1990_v3 = vmul.f32 %v1940_v49, %v1940_v49  ;;  %v1991_v63 = vsel %vm4319_vm14, %v1989_v50, 0.0  ;;  %s2256_s18 = sshll.u32 %s2253_s22, 4  ;;  %s3524_s15 = scalar_lea.hbm %s5604_s21, 64  ;;  %s2257_s18 = int_to_ptr.hbm [resolvable:$true] %s2256_s18 }
 0x26c   : > { %vm4936_vm2 = vmand %vm1707_vm5, %vm1711_vm10  ;;  %v5572_v32 = vmov 0  ;;  %3042 = vpush %v1853_v38  ;;  %v1893_v18 = vadd.f32 %v1892_v61, %v1891_v8  ;;  %v4943_v10 = vadd.f32 %v4728_v0, %v4723_v48  ;;  %v5574_v16 = vmov 0  ;;  %s3518_s24 = sshra.s32 %s2257_s18, 4  ;;  %s3519_s24 = int_to_ptr.hbm [resolvable:$true] %s3518_s24 }
 0x26d   : > { %v5573_v32 = vsel %vm4936_vm2, 4294967295, %v5572_v32  ;;  %vm4945_vm9 = vmand %vm1708_vm13, %vm1712_vm0  ;;  %3044 = vpush %v1873_v9  ;;  %v1913_v39 = vadd.f32 %v1912_v56, %v1911_v6  ;;  %3309 = vrsqrt.f32 %v4870_v60  ;;  %v4952_v43 = vadd.f32 %v4748_v20, %v4741_v12  ;;  %s3520_s2 = scalar_lea.hbm %s3519_s24, 16  ;;  %p3525_p1 = scmp.lt.s32.totalorder %s3519_s24, %s5604_s21 }
 0x26e   : > { %v5575_v16 = vsel %vm4945_vm9, 4294967295, %v5574_v16  ;;  %v1992_v59 = vsel %vm4323_vm15, %v1990_v3, 0.0  ;;  %vm5460_vm1 = vmand %vm4936_vm2, %vm4319_vm14  ;;  %3046 = vpush %v1893_v18  ;;  %v1993_v48 = vsel %vm5461_vm8, %v1991_v63, 0.0  ;;  %3311 = vrsqrt.f32 %v4925_v30  ;;  %p3521_p7 = scmp.ne.s32.totalorder %s3519_s24, %s3520_s2  ;;  %p3526_p4 = scmp.lt.s32.totalorder %s3524_s15, %s3520_s2 }
 0x26f   : > { %v1994_v0 = vsel %vm5461_vm8, %v1992_v59, 0.0  ;;  %vm5459_vm4 = vmand %vm4945_vm9, %vm4323_vm15  ;;  %v2972_v12 = vsel %vm5460_vm1, 1.0, %v5571_v14  ;;  %3048 = vpush %v1913_v39  ;;  %3313 = vrsqrt.f32 %v4943_v10  ;;  %v3024_v15 = vunpack.c.l.bf16 %v3023_v52 }
 0x270   : > { %v1995_v20 = vadd.f32 %v1994_v0, %v1993_v48  ;;  %v2973_v33 = vsel %vm5459_vm4, 1.0, %v5571_v14  ;;  %1743 = vst.msk [vmem:[%s4981_s3] sm:$0xff] %vm5461_vm8, %v2972_v12  ;;  %v2101_v53 = vsel %vm5461_vm8, %v2972_v12, 0.0  ;;  %3315 = vrsqrt.f32 %v4952_v43  ;;  %p3522_p12 = pnand %p3521_p7, %p4069_p2  ;;  %p3527_p5 = por %p3526_p4, %p3525_p1 }
 0x271   : > { %v2102_v37 = vsel %vm5461_vm8, %v2973_v33, 0.0  ;;  %1744 = vst.msk [vmem:[%s4981_s3 + $0x8] sm:$0xff] %vm5461_vm8, %v2973_v33  ;;  %v3025_v11 = vunpack.c.h.bf16 %v3023_v52  ;;  %vm4999_vm12 = vcmp.eq.f32.partialorder %v3024_v15, 1.0  ;;  %vm1608_vm5 = vcmp.eq.f32.partialorder %v4870_v60, inf }
 0x272   : > { %1996 = vadd.xlane.f32.xlu2 %v1995_v20  ;;  %v2103_v2 = vadd.f32 %v2102_v37, %v2101_v53  ;;  %vm1610_vm13 = vcmp.eq.f32.partialorder %v4870_v60, 0.0  ;;  %v1611_v56 = vand.u32 2147483648, %v4870_v60  ;;  %vm1638_vm10 = vcmp.eq.f32.partialorder %v4943_v10, inf  ;;  %p3523_p13 = pneg %p3522_p12 }
 0x273   : > { %v3310_v55 = vpop.eup %3309  ;;  %v1641_v49 = vand.u32 2147483648, %v4943_v10  ;;  %vm1640_vm0 = vcmp.eq.f32.partialorder %v4943_v10, 0.0  ;;  %vm5012_vm4 = vcmp.eq.f32.partialorder %v3025_v11, 1.0  ;;  %vm1620_vm1 = vcmp.eq.f32.partialorder %v4925_v30, inf }
 0x274   : > { %2104 = vadd.xlane.f32.xlu0 %v2103_v2  ;;  %v1602_v41 = vmul.f32 %v3310_v55, %v4870_v60  ;;  %v3312_v51 = vpop.eup %3311  ;;  %vm1650_vm8 = vcmp.eq.f32.partialorder %v4952_v43, inf  ;;  %v1653_v63 = vand.u32 2147483648, %v4952_v43  ;;  %v1623_v0 = vand.u32 2147483648, %v4925_v30  ;;  %p3528_p11 = pnand %p3527_p5, %p3523_p13 }
 0x275   : > { %v1614_v27 = vmul.f32 %v3312_v51, %v4925_v30  ;;  %v3314_v21 = vpop.eup %3313  ;;  %vm1622_vm9 = vcmp.eq.f32.partialorder %v4925_v30, 0.0  ;;  %v5583_v2 = vmov 0  ;;  %v2082_v3 = vrot.slane %v4678_v35, 4 }
 0x276   : > { %v1603_v19 = vmul.f32 %v3310_v55, %v1602_v41  ;;  %v1632_v46 = vmul.f32 %v3314_v21, %v4943_v10  ;;  %v3316_v22 = vpop.eup %3315 }
 0x277   : > { %v1615_v40 = vmul.f32 %v3312_v51, %v1614_v27  ;;  %v1644_v34 = vmul.f32 %v3316_v22, %v4952_v43 }
 0x278   : > { %v1604_v36 = vmul.f32 0.5, %v1603_v19  ;;  %v1633_v54 = vmul.f32 %v3314_v21, %v1632_v46 }
 0x279   : > { %v1616_v13 = vmul.f32 0.5, %v1615_v40  ;;  %v1645_v47 = vmul.f32 %v3316_v22, %v1644_v34 }
 0x27a   : > { %v1605_v7 = vsub.f32 1.5, %v1604_v36  ;;  %v1634_v44 = vmul.f32 0.5, %v1633_v54 }
 0x27b   : > { %v1617_v17 = vsub.f32 1.5, %v1616_v13  ;;  %v1646_v26 = vmul.f32 0.5, %v1645_v47 }
 0x27c   : > { %v1606_v42 = vmul.f32 %v3310_v55, %v1605_v7  ;;  %v1635_v45 = vsub.f32 1.5, %v1634_v44 }
 0x27d   : > { %v1618_v6 = vmul.f32 %v3312_v51, %v1617_v17  ;;  %v1647_v61 = vsub.f32 1.5, %v1646_v26 }
 0x27e   : > { %v1607_v8 = vmul.f32 %v1606_v42, %v4870_v60  ;;  %v1636_v4 = vmul.f32 %v3314_v21, %v1635_v45 }
 0x27f   : > { %v1619_v5 = vmul.f32 %v1618_v6, %v4925_v30  ;;  %v1648_v9 = vmul.f32 %v3316_v22, %v1647_v61 }
 0x280   : > { %v1609_v50 = vsel %vm1608_vm5, %v4870_v60, %v1607_v8  ;;  %v1637_v38 = vmul.f32 %v1636_v4, %v4943_v10  ;;  %vm1652_vm5 = vcmp.eq.f32.partialorder %v4952_v43, 0.0 }
 0x281   : > { %v1621_v18 = vsel %vm1620_vm1, %v4925_v30, %v1619_v5  ;;  %v1649_v59 = vmul.f32 %v1648_v9, %v4952_v43  ;;  %v1612_v48 = vsel %vm1610_vm13, %v1611_v56, %v1609_v50  ;;  %vm1312_vm1 = vmand %vm4999_vm12, %vm4281_vm6  ;;  %v5581_v30 = vmov 0 }
 0x282   : > { %v1639_v39 = vsel %vm1638_vm10, %v4943_v10, %v1637_v38  ;;  %v1624_v10 = vsel %vm1622_vm9, %v1623_v0, %v1621_v18  ;;  %vm1313_vm13 = vmand %vm5012_vm4, %vm4285_vm7  ;;  %vm1657_vm10 = vcmp.gt.f32.partialorder %v1612_v48, 3.0  ;;  %v2070_v9 = vrot.slane %v4680_v25, 4 }
 0x283   : > { %v1642_v12 = vsel %vm1640_vm0, %v1641_v49, %v1639_v39  ;;  %v1651_v20 = vsel %vm1650_vm8, %v4952_v43, %v1649_v59  ;;  %vm5038_vm0 = vmand %vm1312_vm1, %vm4319_vm14  ;;  %vm1658_vm8 = vcmp.gt.f32.partialorder %v1624_v10, 3.0 }
 0x284   : > { %v1655_v33 = vadd.f32 1e-08, %v1642_v12  ;;  %v1654_v53 = vsel %vm1652_vm5, %v1653_v63, %v1651_v20  ;;  %v5582_v30 = vsel %vm5038_vm0, 4294967295, %v5581_v30  ;;  %vm5044_vm9 = vmand %vm1313_vm13, %vm4323_vm15  ;;  %vm5585_vm13 = vnez %v5540_v28 }
 0x285   : > { %v1656_v60 = vadd.f32 1e-08, %v1654_v53  ;;  %v5584_v2 = vsel %vm5044_vm9, 4294967295, %v5583_v2  ;;  %vm5586_vm0 = vmand %vm4334_vm3, %vm5585_vm13  ;;  %vm5594_vm3 = vnez %v5575_v16 }
 0x286   : > { %v1659_v37 = vmul.f32 0.05, %v1655_v33 }
 0x287   : > { %v1660_v43 = vmul.f32 0.05, %v1656_v60 }
 0x288   : > { %vm1661_vm2 = vcmp.gt.f32.partialorder %v1612_v48, %v1659_v37 }
 0x289   : > { %vm1663_vm5 = vmand %vm1657_vm10, %vm1661_vm2  ;;  %vm1662_vm7 = vcmp.gt.f32.partialorder %v1624_v10, %v1660_v43  ;;  %vm5587_vm2 = vnez %v5550_v23  ;;  %vm5588_vm10 = vnez %v5542_v29 }
 0x28a   : > { %vm1665_vm11 = vmand %vm1663_vm5, %vm4999_vm12 }
 0x28b   : > { %vm1664_vm6 = vmand %vm1658_vm8, %vm1662_vm7  ;;  %v2970_v55 = vsel %vm1665_vm11, 1.0, %v5571_v14  ;;  %vm5590_vm7 = vcmask 523264  }
 0x28c   : > { %vm1666_vm1 = vmand %vm1664_vm6, %vm5012_vm4  ;;  %v2089_v51 = vsel %vm5590_vm7, %v2970_v55, 0.0  ;;  %vm5592_vm6 = vnez %v5573_v32 }
 0x28d   : > { %v2971_v41 = vsel %vm1666_vm1, 1.0, %v5571_v14  ;;  %vm1721_vm15 = vmor %vm1665_vm11, %vm5586_vm0  ;;  %vm5595_vm11 = vnez %v5546_v58  ;;  %v1920_v58 = vrot.slane %v4643_v31, 4 }
 0x28e   : > { %vm5589_vm9 = vmand %vm5587_vm2, %vm5588_vm10  ;;  %vm5598_vm2 = vnez %v5584_v2 }
 0x28f   : > { %vm1722_vm12 = vmor %vm1666_vm1, %vm5589_vm9  ;;  %vm5597_vm9 = vnez %v5582_v30  ;;  %v1921_v32 = vadd.f32 %v1920_v58, %v4643_v31 }
 0x290   : > { %vm5591_vm8 = vmmov %vm5590_vm7 }
 0x291   : > { %v2090_v19 = vsel %vm5591_vm8, %v2971_v41, 0.0  ;;  %vm5593_vm4 = vmand %vm5592_vm6, %vm4319_vm14  ;;  %v1922_v16 = vrot.slane %v1921_v32, 2 }
 0x292   : > { %v2091_v27 = vadd.f32 %v2090_v19, %v2089_v51  ;;  %vm1723_vm5 = vmor %vm1721_vm15, %vm5593_vm4 }
 0x293   : > { %vm5596_vm0 = vmand %vm5594_vm3, %vm5595_vm11  ;;  %v1923_v21 = vadd.f32 %v1922_v16, %v1921_v32 }
 0x294   : > { %vm1724_vm13 = vmor %vm1722_vm12, %vm5596_vm0  ;;  %2092 = vadd.xlane.f32.xlu2 %v2091_v27 }
 0x295   : > { %vm1725_vm1 = vmand %vm1723_vm5, %vm5597_vm9  ;;  %v1924_v52 = vrot.slane %v1923_v21, 1 }
 0x296   : > { %vm1726_vm10 = vmand %vm1724_vm13, %vm5598_vm2  ;;  %v2974_v28 = vsel %vm1725_vm1, 1.0, %v5571_v14 }
 0x297   : > { %v2975_v29 = vsel %vm1726_vm10, 1.0, %v5571_v14  ;;  %v2113_v57 = vsel %vm5590_vm7, %v2974_v28, 0.0  ;;  %vm5599_vm14 = vmmov %vm5590_vm7  ;;  %v1925_v36 = vadd.f32 %v1924_v52, %v1923_v21 }
 0x298   : > { %v2114_v62 = vsel %vm5599_vm14, %v2975_v29, 0.0 }
 0x299   : > { %v2115_v23 = vadd.f32 %v2114_v62, %v2113_v57  ;;  %3050 = vpush %v1925_v36 }
 0x29b   : > { %2116 = vadd.xlane.f32.xlu1 %v2115_v23 }
 0x2c0   : > { %v1981_v40 = vpop.xlane.xlu1 %1980 }
 0x2c1   : > { %v1982_v46 = vrot.slane %v1981_v40, 4 }
 0x2c3   : > { %v1983_v14 = vadd.f32 %v1982_v46, %v1981_v40 }
 0x2c5   : > { %v1984_v54 = vrot.slane %v1983_v14, 2 }
 0x2c7   : > { %v1951_v22 = vpop.xlane.xlu2 %1950  ;;  %v1985_v44 = vadd.f32 %v1984_v54, %v1983_v14 }
 0x2c8   : > { %v1952_v7 = vrot.slane %v1951_v22, 4 }
 0x2c9   : > { %v1986_v26 = vrot.slane %v1985_v44, 1 }
 0x2ca   : > { %v1953_v13 = vadd.f32 %v1952_v7, %v1951_v22 }
 0x2cb   : > { %v1967_v34 = vpop.xlane.xlu0 %1966  ;;  %v1987_v5 = vadd.f32 %v1986_v26, %v1985_v44 }
 0x2cc   : > { %v1954_v15 = vrot.slane %v1953_v13, 2  ;;  %v1968_v42 = vrot.slane %v1967_v34, 4 }
 0x2ce   : > { %v1969_v31 = vadd.f32 %v1968_v42, %v1967_v34  ;;  %v1955_v17 = vadd.f32 %v1954_v15, %v1953_v13 }
 0x2d0   : > { %v1970_v47 = vrot.slane %v1969_v31, 2  ;;  %v1956_v8 = vrot.slane %v1955_v17, 1 }
 0x2d2   : > { %v1957_v6 = vadd.f32 %v1956_v8, %v1955_v17  ;;  %v1971_v45 = vadd.f32 %v1970_v47, %v1969_v31 }
 0x2d4   : > { %3052 = vpush %v1957_v6  ;;  %v1972_v11 = vrot.slane %v1971_v45, 1 }
 0x2d6   : > { %v1973_v24 = vadd.f32 %v1972_v11, %v1971_v45 }
 0x2d7   : > { %v2057_v4 = vpop.xlane.xlu2 %2056 }
 0x2d8   : > { %3054 = vpush %v1973_v24  ;;  %v2058_v38 = vrot.slane %v2057_v4, 4 }
 0x2d9   : > { %3056 = vpush %v1987_v5  ;;  %v2037_v61 = vpop.xlane.xlu1 %2036 }
 0x2da   : > { %v2038_v50 = vrot.slane %v2037_v61, 4 }
 0x2db   : > { %v2017_v56 = vpop.xlane.xlu0 %2016 }
 0x2dc   : > { %v2018_v49 = vrot.slane %v2017_v56, 4 }
 0x2de   : > { %v2019_v63 = vadd.f32 %v2018_v49, %v2017_v56 }
 0x2df   : > { %3531 = shalt.err (!%p3528_p11)
}
 0x2e0   : > { %s5471_s22 = smov 128   ;;  %s5473_s23 = smov 8   ;;  %v2039_v18 = vadd.f32 %v2038_v50, %v2037_v61  ;;  %v2059_v39 = vadd.f32 %v2058_v38, %v2057_v4  ;;  %v2071_v59 = vadd.f32 %v2070_v9, %v4680_v25  ;;  %v2083_v48 = vadd.f32 %v2082_v3, %v4678_v35 }
 0x2e1   : > { %3104 = dma.vmem_to_hbm [thread:$0]  (%p4069_p2), %s5099_s26, 256, %s2257_s18, %s5470_s1, %s5471_s22, %s5471_s22, %s5473_s23   ;;  %v2020_v0 = vrot.slane %v2019_v63, 2 }
 0x2e2   : > { %s5605_s0 = sld [smem:[#allocation72_spill]]  ;;  %s2273_s4 = sshll.u32 %s4452_s11, 4  ;;  %v2040_v20 = vrot.slane %v2039_v18, 2  ;;  %s5132_s4 = int_to_ptr.vmem [resolvable:$true] %s2273_s4 }
 0x2e3   : > { %s2187_s26 = scalar_lea.sflag [#allocation4], %s4204_s17 }
 0x2e5   : > { %v1997_v12 = vpop.xlane.xlu2 %1996 }
 0x2e6   : > { %v1998_v33 = vrot.slane %v1997_v12, 4 }
 0x2e8   : > { %s5606_s14 = smov %s5605_s0  ;;  %s2234_s15 = scalar_lea.hbm %s5605_s0, %s5088_s12 }
 0x2e9   : > { %s2237_s19 = sshll.u32 %s2234_s15, 4  ;;  %s3552_s2 = scalar_lea.hbm %s5606_s14, 64  ;;  %s2238_s19 = int_to_ptr.hbm [resolvable:$true] %s2237_s19 }
 0x2ea   : > { %s3546_s18 = sshra.s32 %s2238_s19, 4  ;;  %s3547_s18 = int_to_ptr.hbm [resolvable:$true] %s3546_s18 }
 0x2eb   : > { %s3548_s1 = scalar_lea.hbm %s3547_s18, 16  ;;  %p3553_p3 = scmp.lt.s32.totalorder %s3547_s18, %s5606_s14 }
 0x2ec   : > { %p3549_p8 = scmp.ne.s32.totalorder %s3547_s18, %s3548_s1  ;;  %p3554_p6 = scmp.lt.s32.totalorder %s3552_s2, %s3548_s1 }
 0x2ee   : > { %p3550_p9 = pnand %p3549_p8, %p4069_p2  ;;  %p3555_p7 = por %p3554_p6, %p3553_p3 }
 0x2f0   : > { %p3551_p0 = pneg %p3550_p9 }
 0x2f2   : > { %p3556_p12 = pnand %p3555_p7, %p3551_p0 }
 0x2f4   : > { %3559 = shalt.err (!%p3556_p12)
}
 0x2f5   : > { %s5607_s6 = sld [smem:[#allocation61_spill]]  ;;  %v2060_v35 = vrot.slane %v2059_v39, 2  ;;  %s3580_s2 = scalar_lea.hbm %s5600_s13, 64 }
 0x2f6   : > { %3103 = dma.vmem_to_hbm [thread:$0]  (%p4069_p2), %s5101_s29, 256, %s2238_s19, %s2187_s26, %s5471_s22, %s5471_s22, %s5473_s23  }
 0x2fb   : > { %s5608_s11 = int_to_ptr.hbm [resolvable:$true] %s5607_s6 }
 0x2fc   : > { %s3574_s24 = sshra.s32 %s5608_s11, 4  ;;  %s3575_s24 = int_to_ptr.hbm [resolvable:$true] %s3574_s24 }
 0x2fd   : > { %s3576_s8 = scalar_lea.hbm %s3575_s24, 16  ;;  %p3581_p5 = scmp.lt.s32.totalorder %s3575_s24, %s5600_s13 }
 0x2fe   : > { %p3577_p13 = scmp.ne.s32.totalorder %s3575_s24, %s3576_s8  ;;  %p3582_p11 = scmp.lt.s32.totalorder %s3580_s2, %s3576_s8 }
 0x300   : > { %p3578_p1 = pnand %p3577_p13, %p4069_p2  ;;  %p3583_p8 = por %p3582_p11, %p3581_p5 }
 0x302   : > { %p3579_p4 = pneg %p3578_p1 }
 0x304   : > { %p3584_p9 = pnand %p3583_p8, %p3579_p4 }
 0x306   : > { %3587 = shalt.err (!%p3584_p9)
}
 0x307   : > { %s5609_s29 = scalar_lea.sflag [#allocation18], %s4193_s9  ;;  %s5610_s19 = smov %s5608_s11  ;;  %v2072_v25 = vrot.slane %v2071_v59, 2  ;;  %v1999_v10 = vadd.f32 %v1998_v33, %v1997_v12  ;;  %v2084_v53 = vrot.slane %v2083_v48, 2  ;;  %v2021_v60 = vadd.f32 %v2020_v0, %v2019_v63  ;;  %v2105_v52 = vpop.xlane.xlu0 %2104  ;;  %v2093_v14 = vpop.xlane.xlu2 %2092 }
 0x308   : > { %3105 = dma.vmem_to_hbm [thread:$0]  (%p4069_p2), %s5132_s4, 256, %s5610_s19, %s5609_s29, %s5471_s22, %s5471_s22, %s5473_s23   ;;  %v2041_v30 = vadd.f32 %v2040_v20, %v2039_v18  ;;  %v2061_v43 = vadd.f32 %v2060_v35, %v2059_v39  ;;  %v2106_v36 = vrot.slane %v2105_v52, 4  ;;  %v2094_v22 = vrot.slane %v2093_v14, 4 }
 0x309   : > { %v2000_v37 = vrot.slane %v1999_v10, 2  ;;  %v2073_v55 = vadd.f32 %v2072_v25, %v2071_v59  ;;  %v2022_v41 = vrot.slane %v2021_v60, 1  ;;  %v2085_v51 = vadd.f32 %v2084_v53, %v2083_v48  ;;  %s5170_s6 = spop %3036 }
 0x30a   : > { %v2042_v27 = vrot.slane %v2041_v30, 1  ;;  %v2062_v28 = vrot.slane %v2061_v43, 1  ;;  %v2107_v40 = vadd.f32 %v2106_v36, %v2105_v52  ;;  %v2095_v7 = vadd.f32 %v2094_v22, %v2093_v14  ;;  %s5172_s8 = spop %3038 }
 0x30b   : > { %v2001_v2 = vadd.f32 %v2000_v37, %v1999_v10  ;;  %v2074_v57 = vrot.slane %v2073_v55, 1  ;;  %v2023_v62 = vadd.f32 %v2022_v41, %v2021_v60  ;;  %v2086_v23 = vrot.slane %v2085_v51, 1  ;;  %s5174_s4 = spop %3040 }
 0x30c   : > { %v2043_v58 = vadd.f32 %v2042_v27, %v2041_v30  ;;  %v2063_v32 = vadd.f32 %v2062_v28, %v2061_v43  ;;  %v2108_v46 = vrot.slane %v2107_v40, 2  ;;  %v2096_v54 = vrot.slane %v2095_v7, 2  ;;  %s5176_s26 = spop %3042 }
 0x30d   : > { %v2002_v19 = vrot.slane %v2001_v2, 1  ;;  %v2075_v16 = vadd.f32 %v2074_v57, %v2073_v55  ;;  %v2087_v21 = vadd.f32 %v2086_v23, %v2085_v51  ;;  %s5178_s11 = spop %3044  ;;  %vm2125_vm15 = vcmp.eq.s32.totalorder %v4547_v1, 0 }
 0x30e   : > { %v2109_v13 = vadd.f32 %v2108_v46, %v2107_v40  ;;  %v2117_v34 = vpop.xlane.xlu1 %2116  ;;  %v2097_v15 = vadd.f32 %v2096_v54, %v2095_v7  ;;  %s5180_s24 = spop %3046  ;;  %vm2128_vm12 = vcmp.eq.s32.totalorder %v4547_v1, 1  ;;  %vm2131_vm8 = vcmp.eq.s32.totalorder %v4547_v1, 2 }
 0x30f   : > { %v2003_v29 = vadd.f32 %v2002_v19, %v2001_v2  ;;  %v2118_v42 = vrot.slane %v2117_v34, 4  ;;  %s5182_s1 = spop %3048  ;;  %vm2134_vm6 = vcmp.eq.s32.totalorder %v4547_v1, 3  ;;  %vm2137_vm4 = vcmp.eq.s32.totalorder %v4547_v1, 4 }
 0x310   : > { %v2110_v31 = vrot.slane %v2109_v13, 1  ;;  %v2098_v44 = vrot.slane %v2097_v15, 1  ;;  %s5184_s18 = spop %3050  ;;  %vm2140_vm5 = vcmp.eq.s32.totalorder %v4547_v1, 5  ;;  %v2138_v38 = vstv %s5170_s6 }
 0x311   : > { %3058 = vpush %v2003_v29  ;;  %v2119_v17 = vadd.f32 %v2118_v42, %v2117_v34  ;;  %s5186_s2 = spop %3052  ;;  %vm2143_vm3 = vcmp.eq.s32.totalorder %v4547_v1, 6  ;;  %v2141_v3 = vstv %s5172_s8  ;;  %vm2146_vm11 = vcmp.eq.s32.totalorder %v4547_v1, 7 }
 0x312   : > { %3060 = vpush %v2023_v62  ;;  %v2099_v8 = vadd.f32 %v2098_v44, %v2097_v15  ;;  %v2111_v6 = vadd.f32 %v2110_v31, %v2109_v13  ;;  %s5188_s0 = spop %3054  ;;  %v2144_v18 = vstv %s5174_s4  ;;  %vm2149_vm0 = vcmp.eq.s32.totalorder %v4547_v1, 8 }
 0x313   : > { %3062 = vpush %v2043_v58  ;;  %v2120_v47 = vrot.slane %v2119_v17, 2  ;;  %s5190_s15 = spop %3056  ;;  %v2147_v59 = vstv %s5176_s26  ;;  %vm2152_vm13 = vcmp.eq.s32.totalorder %v4547_v1, 9  ;;  %v2150_v0 = vstv %s5178_s11 }
 0x314   : > { %3064 = vpush %v2063_v32  ;;  %vm2155_vm9 = vcmp.eq.s32.totalorder %v4547_v1, 10  ;;  %v2153_v20 = vstv %s5180_s24  ;;  %vm2158_vm1 = vcmp.eq.s32.totalorder %v4547_v1, 11  ;;  %v2156_v35 = vstv %s5182_s1 }
 0x315   : > { %3066 = vpush %v2075_v16  ;;  %v2121_v45 = vadd.f32 %v2120_v47, %v2119_v17  ;;  %vm2161_vm2 = vcmp.eq.s32.totalorder %v4547_v1, 12  ;;  %v2159_v10 = vstv %s5184_s18  ;;  %vm2164_vm10 = vcmp.eq.s32.totalorder %v4547_v1, 13 }
 0x316   : > { %3068 = vpush %v2087_v21  ;;  %v2162_v60 = vstv %s5186_s2  ;;  %vm2167_vm7 = vcmp.eq.s32.totalorder %v4547_v1, 14  ;;  %v2165_v30 = vstv %s5188_s0  ;;  %vm2170_vm14 = vcmp.eq.s32.totalorder %v4547_v1, 15 }
 0x317   : > { %3070 = vpush %v2099_v8  ;;  %v2122_v26 = vrot.slane %v2121_v45, 1  ;;  %v2168_v2 = vstv %s5190_s15 }
 0x318   : > { %3072 = vpush %v2111_v6 }
 0x319   : > { %v2123_v11 = vadd.f32 %v2122_v26, %v2121_v45 }
 0x31b   : > { %3074 = vpush %v2123_v11 }
 0x342   : > { %s5192_s29 = spop %3058 }
 0x343   : > { %s5194_s19 = spop %3060  ;;  %v2171_v41 = vstv %s5192_s29 }
 0x344   : > { %s5196_s22 = spop %3062  ;;  %v2174_v19 = vstv %s5194_s19 }
 0x345   : > { %s5198_s23 = spop %3064  ;;  %v2177_v28 = vstv %s5196_s22 }
 0x346   : > { %s5200_s13 = spop %3066  ;;  %v2180_v57 = vstv %s5198_s23 }
 0x347   : > { %s3069_s14 = spop %3068  ;;  %v2183_v23 = vstv %s5200_s13 }
 0x348   : > { %v2126_v24 = vstv %s3069_s14  ;;  %s3071_s21 = spop %3070  ;;  %s2222_s14 = scalar_lea.sflag [#allocation27], %s4204_s17 }
 0x349   : > { %v2127_v5 = vsel %vm2125_vm15, %v2126_v24, 0.0  ;;  %v2129_v4 = vstv %s3071_s21  ;;  %s3073_s28 = spop %3072  ;;  %vm2173_vm15 = vcmp.eq.s32.totalorder %v4547_v1, 16  ;;  %s2212_s21 = scalar_lea.sflag [#allocation24], %s4193_s9 }
 0x34a   : > { %v2130_v61 = vsel %vm2128_vm12, %v2129_v4, %v2127_v5  ;;  %v2132_v56 = vstv %s3073_s28  ;;  %vm2176_vm12 = vcmp.eq.s32.totalorder %v4547_v1, 17  ;;  %s2202_s28 = scalar_lea.sflag [#allocation21], %s4193_s9 }
 0x34b   : > { %v2133_v49 = vsel %vm2131_vm8, %v2132_v56, %v2130_v61  ;;  %vm2179_vm8 = vcmp.eq.s32.totalorder %v4547_v1, 18 }
 0x34c   : > { %s3075_s25 = spop %3074 }
 0x34d   : > { %v2135_v50 = vstv %s3075_s25  ;;  %s976_s25 = scalar_lea.vmem [#allocation26], %s4204_s17 }
 0x34e   : > { %v2136_v9 = vsel %vm2134_vm6, %v2135_v50, %v2133_v49  ;;  %vm2182_vm6 = vcmp.eq.s32.totalorder %v4547_v1, 19 }
 0x34f   : > { %v2139_v63 = vsel %vm2137_vm4, %v2138_v38, %v2136_v9 }
 0x350   : > { %v2142_v39 = vsel %vm2140_vm5, %v2141_v3, %v2139_v63 }
 0x351   : > { %v2145_v48 = vsel %vm2143_vm3, %v2144_v18, %v2142_v39 }
 0x352   : > { %v2148_v12 = vsel %vm2146_vm11, %v2147_v59, %v2145_v48 }
 0x353   : > { %v2151_v33 = vsel %vm2149_vm0, %v2150_v0, %v2148_v12 }
 0x354   : > { %v2154_v25 = vsel %vm2152_vm13, %v2153_v20, %v2151_v33 }
 0x355   : > { %v2157_v53 = vsel %vm2155_vm9, %v2156_v35, %v2154_v25 }
 0x356   : > { %v2160_v37 = vsel %vm2158_vm1, %v2159_v10, %v2157_v53 }
 0x357   : > { %v2163_v43 = vsel %vm2161_vm2, %v2162_v60, %v2160_v37 }
 0x358   : > { %v2166_v55 = vsel %vm2164_vm10, %v2165_v30, %v2163_v43 }
 0x359   : > { %v2169_v51 = vsel %vm2167_vm7, %v2168_v2, %v2166_v55 }
 0x35a   : > { %v2172_v27 = vsel %vm2170_vm14, %v2171_v41, %v2169_v51 }
 0x35b   : > { %v2175_v29 = vsel %vm2173_vm15, %v2174_v19, %v2172_v27 }
 0x35c   : > { %v2178_v62 = vsel %vm2176_vm12, %v2177_v28, %v2175_v29 }
 0x35d   : > { %v2181_v58 = vsel %vm2179_vm8, %v2180_v57, %v2178_v62 }
 0x35e   : > { %v2184_v32 = vsel %vm2182_vm6, %v2183_v23, %v2181_v58 }
 0x35f   : > { %2185 = vst [vmem:[%s976_s25] sm:$0x1] %v2184_v32 }
 0x360   : > { %s3007_s22 = sshll.u32 %s5538_s16, 3  ;;  %s2302_s23 = sshll.u32 %s4835_s20, 4  ;;  %s2303_s23 = int_to_ptr.vmem [resolvable:$true] %s2302_s23 }
 0x361   : > { %s2289_s6 = sadd.s32 %s3007_s22, %s4239_s30  ;;  %s5611_s26 = sld [smem:[#allocation75_spill]] }
 0x362   : > { %s3008_s13 = sshll.u32 %s2289_s6, 3  ;;  %s3850_s24 = smov 256  }
 0x363   : > { %3106 = sst [smem:[#allocation31]] (%p4069_p2), %s3850_s24  ;;  %s3851_s18 = smov 512  }
 0x364   : > { %3107 = sst [smem:[#allocation31 + $0x1]] (%p4069_p2), %s3851_s18  ;;  %s3852_s2 = smov 2  }
 0x365   : > { %3108 = sst [smem:[#allocation31 + $0x2]] (%p4069_p2), %s3852_s2  ;;  %s3853_s30 = smov 128  }
 0x366   : > { %3109 = sst [smem:[#allocation31 + $0x3]] (%p4069_p2), %s3853_s30  ;;  %s3854_s20 = smov 8  }
 0x367   : > { %s2291_s11 = scalar_lea.hbm %s5611_s26, %s3008_s13  ;;  %3110 = sst [smem:[#allocation31 + $0x4]] (%p4069_p2), %s3853_s30 }
 0x368   : > { %s2304_s1 = sshll.u32 %s2291_s11, 4  ;;  %3111 = sst [smem:[#allocation31 + $0x5]] (%p4069_p2), %s3854_s20  ;;  %s2305_s1 = int_to_ptr.hbm [resolvable:$true] %s2304_s1 }
 0x369   : > { %s3855_s0 = smov [#allocation30]   ;;  %s3856_s15 = smov 0  }
 0x36a   : > { %3112 = dma.general (%p4069_p2), %s2303_s23, 512, %s2305_s1, %s2202_s28, %s3855_s0, [#allocation31], %s3856_s15, 0  }
 0x36b   : > { %s5612_s22 = sld [smem:[#allocation77_spill]]  ;;  %s2353_s13 = sshll.u32 %s4918_s10, 4  ;;  %s2354_s13 = int_to_ptr.vmem [resolvable:$true] %s2353_s13 }
 0x36c   : > { %s5613_s11 = sld [smem:[#allocation76_spill]] }
 0x371   : > { %s2352_s6 = scalar_lea.hbm %s5612_s22, %s5088_s12  ;;  %s3608_s30 = scalar_lea.hbm %s5612_s22, 64 }
 0x372   : > { %s2355_s8 = sshll.u32 %s2352_s6, 4  ;;  %s2333_s24 = scalar_lea.hbm %s5613_s11, %s5088_s12  ;;  %s2356_s8 = int_to_ptr.hbm [resolvable:$true] %s2355_s8 }
 0x373   : > { %s3602_s18 = sshra.s32 %s2356_s8, 4  ;;  %s3603_s18 = int_to_ptr.hbm [resolvable:$true] %s3602_s18 }
 0x374   : > { %s3604_s2 = scalar_lea.hbm %s3603_s18, 16  ;;  %p3609_p7 = scmp.lt.s32.totalorder %s3603_s18, %s5612_s22 }
 0x375   : > { %p3605_p0 = scmp.ne.s32.totalorder %s3603_s18, %s3604_s2  ;;  %p3610_p12 = scmp.lt.s32.totalorder %s3608_s30, %s3604_s2 }
 0x377   : > { %p3606_p3 = pnand %p3605_p0, %p4069_p2  ;;  %p3611_p13 = por %p3610_p12, %p3609_p7 }
 0x379   : > { %p3607_p6 = pneg %p3606_p3 }
 0x37b   : > { %p3612_p1 = pnand %p3611_p13, %p3607_p6 }
 0x37d   : > { %3615 = shalt.err (!%p3612_p1)
}
 0x37e   : > { %s5614_s0 = smov 8   ;;  %s5615_s15 = smov 128  }
 0x37f   : > { %3114 = dma.vmem_to_hbm [thread:$0]  (%p4069_p2), %s2354_s13, 256, %s2356_s8, %s2212_s21, %s5615_s15, %s5615_s15, %s5614_s0  }
 0x380   : > { %s2334_s29 = sshll.u32 %s4981_s3, 4  ;;  %s2336_s19 = sshll.u32 %s2333_s24, 4  ;;  %s2335_s29 = int_to_ptr.vmem [resolvable:$true] %s2334_s29  ;;  %s2337_s19 = int_to_ptr.hbm [resolvable:$true] %s2336_s19 }
 0x381   : > { %s3630_s6 = sshra.s32 %s2337_s19, 4  ;;  %s3636_s2 = scalar_lea.hbm %s5613_s11, 64  ;;  %s3631_s6 = int_to_ptr.hbm [resolvable:$true] %s3630_s6 }
 0x382   : > { %s3632_s4 = scalar_lea.hbm %s3631_s6, 16  ;;  %p3637_p8 = scmp.lt.s32.totalorder %s3631_s6, %s5613_s11 }
 0x383   : > { %p3633_p4 = scmp.ne.s32.totalorder %s3631_s6, %s3632_s4  ;;  %p3638_p9 = scmp.lt.s32.totalorder %s3636_s2, %s3632_s4 }
 0x385   : > { %p3634_p5 = pnand %p3633_p4, %p4069_p2  ;;  %p3639_p0 = por %p3638_p9, %p3637_p8 }
 0x387   : > { %p3635_p11 = pneg %p3634_p5 }
 0x389   : > { %p3640_p3 = pnand %p3639_p0, %p3635_p11 }
 0x38b   : > { %3643 = shalt.err (!%p3640_p3)
}
 0x38c   : > { %3113 = dma.vmem_to_hbm [thread:$0]  (%p4069_p2), %s2335_s29, 256, %s2337_s19, %s2202_s28, %s5615_s15, %s5615_s15, %s5614_s0  }
 0x38d   : > { %s5616_s8 = sld [smem:[#allocation78_spill]]  ;;  %s2372_s30 = sshll.u32 %s4670_s5, 4  ;;  %s2373_s30 = int_to_ptr.vmem [resolvable:$true] %s2372_s30 }
 0x38e   : > { %s3018_s10 = sshll.u32 %s5538_s16, 1 }
 0x393   : > { %s2371_s24 = scalar_lea.hbm %s5616_s8, %s5088_s12  ;;  %s3664_s28 = scalar_lea.hbm %s5616_s8, 64 }
 0x394   : > { %s2374_s20 = sshll.u32 %s2371_s24, 4  ;;  %s2375_s20 = int_to_ptr.hbm [resolvable:$true] %s2374_s20 }
 0x395   : > { %s3658_s6 = sshra.s32 %s2375_s20, 4  ;;  %s3659_s6 = int_to_ptr.hbm [resolvable:$true] %s3658_s6 }
 0x396   : > { %s3660_s4 = scalar_lea.hbm %s3659_s6, 16  ;;  %p3665_p13 = scmp.lt.s32.totalorder %s3659_s6, %s5616_s8 }
 0x397   : > { %p3661_p6 = scmp.ne.s32.totalorder %s3659_s6, %s3660_s4  ;;  %p3666_p1 = scmp.lt.s32.totalorder %s3664_s28, %s3660_s4 }
 0x399   : > { %p3662_p7 = pnand %p3661_p6, %p4069_p2  ;;  %p3667_p4 = por %p3666_p1, %p3665_p13 }
 0x39b   : > { %p3663_p12 = pneg %p3662_p7 }
 0x39d   : > { %p3668_p5 = pnand %p3667_p4, %p3663_p12 }
 0x39f   : > { %3671 = shalt.err (!%p3668_p5)
}
 0x3a0   : > { %3115 = dma.vmem_to_hbm [thread:$0]  (%p4069_p2), %s2373_s30, 256, %s2375_s20, %s2212_s21, %s5615_s15, %s5615_s15, %s5614_s0  }
 0x3a1   : > { %s2387_s16 = sadd.s32 %s5536_s27, %s3018_s10  ;;  %s2390_s5 = sshll.u32 %s976_s25, 4  ;;  %s2391_s5 = int_to_ptr.vmem [resolvable:$true] %s2390_s5 }
 0x3a2   : > { %s5617_s23 = sld [smem:[#allocation79_spill]] }
 0x3a8   : > { %s2388_s1 = scalar_lea.hbm %s5617_s23, %s2387_s16  ;;  %s3692_s27 = scalar_lea.hbm %s5617_s23, 4 }
 0x3a9   : > { %s2392_s3 = sshll.u32 %s2388_s1, 4  ;;  %s2393_s3 = int_to_ptr.hbm [resolvable:$true] %s2392_s3 }
 0x3aa   : > { %s3686_s13 = sshra.s32 %s2393_s3, 4  ;;  %s3687_s13 = int_to_ptr.hbm [resolvable:$true] %s3686_s13 }
 0x3ab   : > { %s3688_s24 = scalar_lea.hbm %s3687_s13, 1  ;;  %p3693_p0 = scmp.lt.s32.totalorder %s3687_s13, %s5617_s23 }
 0x3ac   : > { %p3689_p11 = scmp.ne.s32.totalorder %s3687_s13, %s3688_s24  ;;  %p3694_p3 = scmp.lt.s32.totalorder %s3692_s27, %s3688_s24 }
 0x3ae   : > { %p3690_p8 = pnand %p3689_p11, %p4069_p2  ;;  %p3695_p6 = por %p3694_p3, %p3693_p0 }
 0x3b0   : > { %p3691_p9 = pneg %p3690_p8 }
 0x3b2   : > { %p3696_p7 = pnand %p3695_p6, %p3691_p9 }
 0x3b4   : > { %3699 = shalt.err (!%p3696_p7)
}
 0x3b5   : > { %3116 = dma.vmem_to_hbm [thread:$0]  (%p4069_p2), %s2391_s5, 16, %s2393_s3, %s2222_s14  }
 0x3b6 PF: > { %s5618_s0 = sld [smem:[#allocation53_spill]] }
 0x3b7   : > { %s5619_s15 = sld [smem:[#allocation44_spill]] }
 0x3bc   : > { %p3161_p12 = scmp.ge.s32.totalorder %s5618_s0, 2 }
 0x3bd   : > { %s2404_s20 = sand.u32 1, %s5619_s15  }
 0x3be   : > { %p3133_p13 = pnand %p3161_p12, %p4077_p10  ;;  %s2405_s4 = scalar_lea.sflag [#allocation4], %s2404_s20 }
 0x3c0   : > { %p5349_p1 = pneg %p3133_p13 }
 0x3c2   : > { %3769 = dma.done.wait (%p5349_p1), %s2405_s4, 256  }
 0x3c3   : > { %3771 = vsyncadd (%p5349_p1), %s2405_s4, 4294967040  ;;  %s5622_s17 = sadd.s32 4294967294, %s5618_s0  }
 0x3c4   : > { %s2414_s7 = sand.u32 1, %s5622_s17  }
 0x3c5   : > { %s2415_s14 = scalar_lea.sflag [#allocation18], %s2414_s7 }
 0x3c6   : > { %3773 = dma.done.wait (%p5349_p1), %s2415_s14, 512  }
 0x3c7   : > { %3775 = vsyncadd (%p5349_p1), %s2415_s14, 4294966784  ;;  %s2435_s26 = scalar_lea.sflag [#allocation21], %s2414_s7 }
 0x3c8   : > { %3777 = dma.done.wait (%p5349_p1), %s2435_s26, 768  }
 0x3c9   : > { %3779 = vsyncadd (%p5349_p1), %s2435_s26, 4294966528  ;;  %s2455_s18 = scalar_lea.sflag [#allocation24], %s2414_s7 }
 0x3ca   : > { %3781 = dma.done.wait (%p5349_p1), %s2455_s18, 512  }
 0x3cb   : > { %3783 = vsyncadd (%p5349_p1), %s2455_s18, 4294966784  ;;  %s2475_s28 = scalar_lea.sflag [#allocation27], %s2404_s20 }
 0x3cc   : > { %3785 = dma.done.wait (%p5349_p1), %s2475_s28, 16  }
 0x3cd   : > { %3787 = vsyncadd (%p5349_p1), %s2475_s28, 4294967280  ;;  %s54_s1 = sadd.s32 1, %s5618_s0   ;;  %s5623_s24 = sld [smem:[#allocation45_spill]] }
 0x3ce   : > { %p51_p2 = scmp.ge.s32.totalorder %s54_s1, 6   ;;  %s5624_s25 = sld [smem:[#allocation46_spill]] }
 0x3cf   : > { %s5625_s26 = sld [smem:[#allocation57_spill]] }
 0x3d0   : > { %s5626_s27 = sld [smem:[#allocation47_spill]] }
 0x3d1   : > { %s5627_s28 = sld [smem:[#allocation48_spill]] }
 0x3d2   : > { %s5628_s29 = sld [smem:[#allocation56_spill]]  ;;  %53 = sbr.rel (!%p51_p2) target bundleno = 42 (0x2a), region = 308 }
 0x3d3   : > { %s5629_s0 = sld [smem:[#allocation51_spill]] }
 0x3d4   : > { %s5630_s30 = sld [smem:[#allocation52_spill]] }
 0x3d5   : > { %s5631_s18 = sld [smem:[#allocation54_spill]] }
 0x3d6   : > { %s5632_s19 = sld [smem:[#allocation55_spill]] }
 0x3d7   :  { %2480 = vsyncpa [#allocation3], 1 }
 0x3d8   :  { %2482 = vsyncpa [#allocation3 + $0x1], 1 }
 0x3d9   :  { %2483 = vsyncpa [#allocation8], 1 }
 0x3da   :  { %2485 = vsyncpa [#allocation8 + $0x1], 1 }
 0x3db   :  { %2486 = vsyncpa [#allocation11], 1 }
 0x3dc   :  { %2488 = vsyncpa [#allocation11 + $0x1], 1 }
 0x3dd   :  { %2489 = vsyncpa [#allocation14], 1 }
 0x3de   :  { %2491 = vsyncpa [#allocation14 + $0x1], 1 }
 0x3df   :  { %2492 = vsyncpa [#allocation4], 1 }
 0x3e0   :  { %2494 = vsyncpa [#allocation4 + $0x1], 1 }
 0x3e1   :  { %2495 = vsyncpa [#allocation18], 1 }
 0x3e2   :  { %2497 = vsyncpa [#allocation18 + $0x1], 1 }
 0x3e3   :  { %2498 = vsyncpa [#allocation21], 1 }
 0x3e4   :  { %2500 = vsyncpa [#allocation21 + $0x1], 1 }
 0x3e5   :  { %2501 = vsyncpa [#allocation24], 1 }
 0x3e6   :  { %2503 = vsyncpa [#allocation24 + $0x1], 1 }
 0x3e7   :  { %2504 = vsyncpa [#allocation27], 1 }
 0x3e8   :  { %2506 = vsyncpa [#allocation27 + $0x1], 1 }
 0x3e9   :  { %2507 = vsyncpa [#allocation5], 1 }
 0x3ea   :  { %2509 = vsyncpa [#allocation5 + $0x1], 1 }

</bundles_post_ra>
